<compile_context>
chip_gen: v7x
topology: tpu7x:2x2x1
jax: 0.10.0
libtpu: 0.0.40
codegen_flags: <defaults>
</compile_context>

<pallas_src>
import jax
import jax.numpy as jnp
from jax.experimental import pallas as pl
from jax.experimental.pallas import tpu as pltpu


def crossnet_moe_kernel(x0_ref, wgt_ref, v_ref, ct_ref, ut_ref, b_ref, out_ref):
    # x0_ref : (TB, Dp)        batch tile of x_0
    # wgt_ref: (Dp, E)         gate weights, pre-transposed (Wg^T)
    # v_ref  : (L, E, Dp, rp)  V (already in (in_dim, rank) layout -> x_l @ V)
    # ct_ref : (L, E, rp, rp)  C^T per layer/expert
    # ut_ref : (L, E, rp, Dp)  U^T per layer/expert
    # b_ref  : (L, 1, Dp)      per-layer bias (sublane-broadcast layout)
    f32 = jnp.float32
    x0 = x0_ref[...].astype(f32)
    xl = x0
    L = v_ref.shape[0]
    E = v_ref.shape[1]
    wgt = wgt_ref[...].astype(f32)

    for l in range(L):  # static unroll: L and E are small
        # Gating uses x_l at the start of the layer (matches PyTorch loop order).
        logits = jnp.dot(xl, wgt, preferred_element_type=f32)            # (TB, E)
        logits = logits - jnp.max(logits, axis=-1, keepdims=True)
        eg = jnp.exp(logits)
        gate = eg / jnp.sum(eg, axis=-1, keepdims=True)                  # (TB, E)

        bias_l = b_ref[l].astype(f32)                                    # (1, Dp)
        moe = jnp.zeros_like(x0)
        for i in range(E):
            v = jnp.tanh(jnp.dot(xl, v_ref[l, i].astype(f32),
                                 preferred_element_type=f32))            # (TB, rp)
            v = jnp.tanh(jnp.dot(v, ct_ref[l, i].astype(f32),
                                 preferred_element_type=f32))            # (TB, rp)
            u = jnp.dot(v, ut_ref[l, i].astype(f32),
                        preferred_element_type=f32)                      # (TB, Dp)
            expert = x0 * (u + bias_l)                                   # (TB, Dp)
            moe = moe + expert * gate[:, i:i + 1]                        # gated sum
        xl = moe + xl

    out_ref[...] = xl.astype(out_ref.dtype)


def _round_up(x, m):
    return (x + m - 1) // m * m


def crossnet_v2_moe(x, U, V, C, Wg, b, *, tile_b=None):
    """Forward pass of CrossNetV2_with_MoE.

    x : (B, D)
    U : (L, E, D, r)   stacked U_list
    V : (L, E, D, r)   stacked V_list
    C : (L, E, r, r)   stacked C_list
    Wg: (E, D)         stacked gate weights (each nn.Linear(D, 1, bias=False).weight)
    b : (L, D)         per-layer bias (squeezed from (D, 1))
    """
    B, D = x.shape
    L, E, _, r = U.shape

    # Lane-dense padding of feature / rank dims (zero padding is exact here).
    Dp = _round_up(D, 128)
    rp = _round_up(r, 128)

    # Batch tiling: multiple of 8 sublanes; >= 2 grid steps when batch allows
    # (software pipelining of the x0/out DMA + megacore sharding on v7x).
    if tile_b is None:
        if B >= 16:
            tile_b = min(256, _round_up(B // 2, 8))
        else:
            tile_b = _round_up(max(B, 1), 8)
    tile_b = _round_up(tile_b, 8)
    Bp = _round_up(B, tile_b)

    dt = x.dtype
    xp = jnp.zeros((Bp, Dp), dt).at[:B, :D].set(x)

    # Pre-transpose in the wrapper so the kernel never transposes:
    #   x_l @ V[l,i]   -> V stays (D, r)
    #   v   @ C[l,i]^T -> Ct = swap last two axes of C
    #   v   @ U[l,i]^T -> Ut = swap last two axes of U
    #   x_l @ Wg^T     -> Wgt = Wg.T
    Vp = jnp.zeros((L, E, Dp, rp), dt).at[:, :, :D, :r].set(V)
    Ctp = jnp.zeros((L, E, rp, rp), dt).at[:, :, :r, :r].set(jnp.swapaxes(C, -1, -2))
    Utp = jnp.zeros((L, E, rp, Dp), dt).at[:, :, :r, :D].set(jnp.swapaxes(U, -1, -2))
    Wgt = jnp.zeros((Dp, E), dt).at[:D, :].set(Wg.T)
    bp = jnp.zeros((L, 1, Dp), dt).at[:, 0, :D].set(b)

    grid = (Bp // tile_b,)
    out = pl.pallas_call(
        crossnet_moe_kernel,
        out_shape=jax.ShapeDtypeStruct((Bp, Dp), dt),
        grid_spec=pltpu.PrefetchScalarGridSpec(
            num_scalar_prefetch=0,
            grid=grid,
            in_specs=[
                pl.BlockSpec((tile_b, Dp), lambda i: (i, 0)),            # x_0 tile
                pl.BlockSpec((Dp, E), lambda i: (0, 0)),                 # Wg^T
                pl.BlockSpec((L, E, Dp, rp), lambda i: (0, 0, 0, 0)),    # V
                pl.BlockSpec((L, E, rp, rp), lambda i: (0, 0, 0, 0)),    # C^T
                pl.BlockSpec((L, E, rp, Dp), lambda i: (0, 0, 0, 0)),    # U^T
                pl.BlockSpec((L, 1, Dp), lambda i: (0, 0, 0)),           # bias
            ],
            out_specs=pl.BlockSpec((tile_b, Dp), lambda i: (i, 0)),
        ),
        compiler_params=pltpu.CompilerParams(
            dimension_semantics=("parallel",),
        ),
    )(xp, Wgt, Vp, Ctp, Utp, bp)
    return out[:B, :D]


def crossnet_v2_moe_ref(x, U, V, C, Wg, b):
    """Pure-JAX reference matching the PyTorch forward exactly."""
    x0 = x
    xl = x
    L, E = U.shape[0], U.shape[1]
    for l in range(L):
        gate = jax.nn.softmax(xl @ Wg.T, axis=-1)          # (B, E)
        moe = jnp.zeros_like(x0)
        for i in range(E):
            v = jnp.tanh(xl @ V[l, i])
            v = jnp.tanh(v @ C[l, i].T)
            u = v @ U[l, i].T
            moe = moe + (x0 * (u + b[l])) * gate[:, i:i + 1]
        xl = moe + xl
    return xl


if __name__ == "__main__":
    batch, input_dim, layer_num, num_experts, low_rank = 64, 40, 2, 4, 16

    key = jax.random.PRNGKey(0)
    kx, ku, kv, kc, kg = jax.random.split(key, 5)

    # xavier_normal-style std for the factor matrices; zeros for bias (as in the module).
    std_dr = (2.0 / (input_dim + low_rank)) ** 0.5
    std_rr = (2.0 / (low_rank + low_rank)) ** 0.5
    x = jax.random.normal(kx, (batch, input_dim), jnp.float32)
    U = std_dr * jax.random.normal(
        ku, (layer_num, num_experts, input_dim, low_rank), jnp.float32)
    V = std_dr * jax.random.normal(
        kv, (layer_num, num_experts, input_dim, low_rank), jnp.float32)
    C = std_rr * jax.random.normal(
        kc, (layer_num, num_experts, low_rank, low_rank), jnp.float32)
    gbound = 1.0 / (input_dim ** 0.5)
    Wg = jax.random.uniform(kg, (num_experts, input_dim), jnp.float32,
                            minval=-gbound, maxval=gbound)
    b = jnp.zeros((layer_num, input_dim), jnp.float32)

    out = jax.block_until_ready(crossnet_v2_moe(x, U, V, C, Wg, b))
    ref = crossnet_v2_moe_ref(x, U, V, C, Wg, b)

    assert out.shape == (batch, input_dim)
    err = jnp.max(jnp.abs(out - ref))
    assert jnp.allclose(out, ref, atol=1e-3, rtol=1e-3), f"max abs err {err}"

    print("KERNEL_OK")
</pallas_src>

<mosaic_0001>
module attributes {stable_mosaic.version = 11 : i64} {
  func.func @crossnet_moe_kernel(%arg0: i32, %arg1: memref<32x128xf32, #tpu.memory_space<vmem>>, %arg2: memref<128x4xf32, #tpu.memory_space<vmem>>, %arg3: memref<2x4x128x128xf32, #tpu.memory_space<vmem>>, %arg4: memref<2x4x128x128xf32, #tpu.memory_space<vmem>>, %arg5: memref<2x4x128x128xf32, #tpu.memory_space<vmem>>, %arg6: memref<2x1x128xf32, #tpu.memory_space<vmem>>, %arg7: memref<32x128xf32, #tpu.memory_space<vmem>>) attributes {dimension_semantics = [#tpu.dimension_semantics<parallel>], iteration_bounds = array<i64: 2>, scalar_prefetch = 0 : i64, scratch_operands = 0 : i64, tpu.core_type = #tpu.core_type<tc>, window_params = [{transform_indices = @transform_0, window_bounds = array<i64: 32, 128>}, {pipeline_mode = #tpu.pipeline_mode<synchronous>, transform_indices = @transform_1, window_bounds = array<i64: 128, 4>}, {pipeline_mode = #tpu.pipeline_mode<synchronous>, transform_indices = @transform_2, window_bounds = array<i64: 2, 4, 128, 128>}, {pipeline_mode = #tpu.pipeline_mode<synchronous>, transform_indices = @transform_3, window_bounds = array<i64: 2, 4, 128, 128>}, {pipeline_mode = #tpu.pipeline_mode<synchronous>, transform_indices = @transform_4, window_bounds = array<i64: 2, 4, 128, 128>}, {pipeline_mode = #tpu.pipeline_mode<synchronous>, transform_indices = @transform_5, window_bounds = array<i64: 2, 1, 128>}, {transform_indices = @transform_6, window_bounds = array<i64: 32, 128>}]} {
    %c0 = arith.constant 0 : index
    %c0_0 = arith.constant 0 : index
    %0 = vector.load %arg1[%c0, %c0_0] : memref<32x128xf32, #tpu.memory_space<vmem>>, vector<32x128xf32>
    %c0_1 = arith.constant 0 : index
    %c0_2 = arith.constant 0 : index
    %1 = vector.load %arg2[%c0_1, %c0_2] : memref<128x4xf32, #tpu.memory_space<vmem>>, vector<128x4xf32>
    %cst = arith.constant dense<0.000000e+00> : vector<32x4xf32>
    %2 = tpu.matmul %0, %1, %cst {dimension_numbers = #tpu.dot_dimension_numbers<[1], [0], [0], [1], [0, 0, 1, 1], [], []>} : vector<32x128xf32>, vector<128x4xf32>, vector<32x4xf32> -> vector<32x4xf32>
    %cst_3 = arith.constant dense<0xFF800000> : vector<32xf32>
    %3 = vector.multi_reduction <maximumf>, %2, %cst_3 [1] : vector<32x4xf32> to vector<32xf32>
    %4 = vector.shape_cast %3 : vector<32xf32> to vector<32x1xf32>
    %5 = vector.broadcast %4 : vector<32x1xf32> to vector<32x4xf32>
    %6 = arith.subf %2, %5 : vector<32x4xf32>
    %7 = math.exp %6 : vector<32x4xf32>
    %cst_4 = arith.constant dense<0.000000e+00> : vector<32xf32>
    %8 = vector.multi_reduction <add>, %7, %cst_4 [1] : vector<32x4xf32> to vector<32xf32>
    %9 = vector.shape_cast %8 : vector<32xf32> to vector<32x1xf32>
    %10 = vector.broadcast %9 : vector<32x1xf32> to vector<32x4xf32>
    %11 = arith.divf %7, %10 : vector<32x4xf32>
    %c0_5 = arith.constant 0 : index
    %c0_6 = arith.constant 0 : index
    %c0_7 = arith.constant 0 : index
    %12 = vector.load %arg6[%c0_5, %c0_6, %c0_7] : memref<2x1x128xf32, #tpu.memory_space<vmem>>, vector<1x1x128xf32>
    %13 = vector.shape_cast %12 : vector<1x1x128xf32> to vector<1x128xf32>
    %cst_8 = arith.constant 0.000000e+00 : f32
    %14 = vector.broadcast %cst_8 : f32 to vector<32x128xf32>
    %c0_9 = arith.constant 0 : index
    %c0_10 = arith.constant 0 : index
    %c0_11 = arith.constant 0 : index
    %c0_12 = arith.constant 0 : index
    %15 = vector.load %arg3[%c0_9, %c0_10, %c0_11, %c0_12] : memref<2x4x128x128xf32, #tpu.memory_space<vmem>>, vector<1x1x128x128xf32>
    %16 = vector.shape_cast %15 : vector<1x1x128x128xf32> to vector<128x128xf32>
    %cst_13 = arith.constant dense<0.000000e+00> : vector<32x128xf32>
    %17 = tpu.matmul %0, %16, %cst_13 {dimension_numbers = #tpu.dot_dimension_numbers<[1], [0], [0], [1], [0, 0, 1, 1], [], []>} : vector<32x128xf32>, vector<128x128xf32>, vector<32x128xf32> -> vector<32x128xf32>
    %18 = math.tanh %17 : vector<32x128xf32>
    %c0_14 = arith.constant 0 : index
    %c0_15 = arith.constant 0 : index
    %c0_16 = arith.constant 0 : index
    %c0_17 = arith.constant 0 : index
    %19 = vector.load %arg4[%c0_14, %c0_15, %c0_16, %c0_17] : memref<2x4x128x128xf32, #tpu.memory_space<vmem>>, vector<1x1x128x128xf32>
    %20 = vector.shape_cast %19 : vector<1x1x128x128xf32> to vector<128x128xf32>
    %cst_18 = arith.constant dense<0.000000e+00> : vector<32x128xf32>
    %21 = tpu.matmul %18, %20, %cst_18 {dimension_numbers = #tpu.dot_dimension_numbers<[1], [0], [0], [1], [0, 0, 1, 1], [], []>} : vector<32x128xf32>, vector<128x128xf32>, vector<32x128xf32> -> vector<32x128xf32>
    %22 = math.tanh %21 : vector<32x128xf32>
    %c0_19 = arith.constant 0 : index
    %c0_20 = arith.constant 0 : index
    %c0_21 = arith.constant 0 : index
    %c0_22 = arith.constant 0 : index
    %23 = vector.load %arg5[%c0_19, %c0_20, %c0_21, %c0_22] : memref<2x4x128x128xf32, #tpu.memory_space<vmem>>, vector<1x1x128x128xf32>
    %24 = vector.shape_cast %23 : vector<1x1x128x128xf32> to vector<128x128xf32>
    %cst_23 = arith.constant dense<0.000000e+00> : vector<32x128xf32>
    %25 = tpu.matmul %22, %24, %cst_23 {dimension_numbers = #tpu.dot_dimension_numbers<[1], [0], [0], [1], [0, 0, 1, 1], [], []>} : vector<32x128xf32>, vector<128x128xf32>, vector<32x128xf32> -> vector<32x128xf32>
    %26 = vector.broadcast %13 : vector<1x128xf32> to vector<32x128xf32>
    %27 = arith.addf %25, %26 : vector<32x128xf32>
    %28 = arith.mulf %0, %27 : vector<32x128xf32>
    %29 = vector.extract_strided_slice %11 {offsets = [0, 0], sizes = [32, 1], strides = [1, 1]} : vector<32x4xf32> to vector<32x1xf32>
    %30 = vector.broadcast %29 : vector<32x1xf32> to vector<32x128xf32>
    %31 = arith.mulf %28, %30 : vector<32x128xf32>
    %32 = arith.addf %14, %31 : vector<32x128xf32>
    %c0_24 = arith.constant 0 : index
    %c1 = arith.constant 1 : index
    %c0_25 = arith.constant 0 : index
    %c0_26 = arith.constant 0 : index
    %33 = vector.load %arg3[%c0_24, %c1, %c0_25, %c0_26] : memref<2x4x128x128xf32, #tpu.memory_space<vmem>>, vector<1x1x128x128xf32>
    %34 = vector.shape_cast %33 : vector<1x1x128x128xf32> to vector<128x128xf32>
    %cst_27 = arith.constant dense<0.000000e+00> : vector<32x128xf32>
    %35 = tpu.matmul %0, %34, %cst_27 {dimension_numbers = #tpu.dot_dimension_numbers<[1], [0], [0], [1], [0, 0, 1, 1], [], []>} : vector<32x128xf32>, vector<128x128xf32>, vector<32x128xf32> -> vector<32x128xf32>
    %36 = math.tanh %35 : vector<32x128xf32>
    %c0_28 = arith.constant 0 : index
    %c1_29 = arith.constant 1 : index
    %c0_30 = arith.constant 0 : index
    %c0_31 = arith.constant 0 : index
    %37 = vector.load %arg4[%c0_28, %c1_29, %c0_30, %c0_31] : memref<2x4x128x128xf32, #tpu.memory_space<vmem>>, vector<1x1x128x128xf32>
    %38 = vector.shape_cast %37 : vector<1x1x128x128xf32> to vector<128x128xf32>
    %cst_32 = arith.constant dense<0.000000e+00> : vector<32x128xf32>
    %39 = tpu.matmul %36, %38, %cst_32 {dimension_numbers = #tpu.dot_dimension_numbers<[1], [0], [0], [1], [0, 0, 1, 1], [], []>} : vector<32x128xf32>, vector<128x128xf32>, vector<32x128xf32> -> vector<32x128xf32>
    %40 = math.tanh %39 : vector<32x128xf32>
    %c0_33 = arith.constant 0 : index
    %c1_34 = arith.constant 1 : index
    %c0_35 = arith.constant 0 : index
    %c0_36 = arith.constant 0 : index
    %41 = vector.load %arg5[%c0_33, %c1_34, %c0_35, %c0_36] : memref<2x4x128x128xf32, #tpu.memory_space<vmem>>, vector<1x1x128x128xf32>
    %42 = vector.shape_cast %41 : vector<1x1x128x128xf32> to vector<128x128xf32>
    %cst_37 = arith.constant dense<0.000000e+00> : vector<32x128xf32>
    %43 = tpu.matmul %40, %42, %cst_37 {dimension_numbers = #tpu.dot_dimension_numbers<[1], [0], [0], [1], [0, 0, 1, 1], [], []>} : vector<32x128xf32>, vector<128x128xf32>, vector<32x128xf32> -> vector<32x128xf32>
    %44 = vector.broadcast %13 : vector<1x128xf32> to vector<32x128xf32>
    %45 = arith.addf %43, %44 : vector<32x128xf32>
    %46 = arith.mulf %0, %45 : vector<32x128xf32>
    %47 = vector.extract_strided_slice %11 {offsets = [0, 1], sizes = [32, 1], strides = [1, 1]} : vector<32x4xf32> to vector<32x1xf32>
    %48 = vector.broadcast %47 : vector<32x1xf32> to vector<32x128xf32>
    %49 = arith.mulf %46, %48 : vector<32x128xf32>
    %50 = arith.addf %32, %49 : vector<32x128xf32>
    %c0_38 = arith.constant 0 : index
    %c2 = arith.constant 2 : index
    %c0_39 = arith.constant 0 : index
    %c0_40 = arith.constant 0 : index
    %51 = vector.load %arg3[%c0_38, %c2, %c0_39, %c0_40] : memref<2x4x128x128xf32, #tpu.memory_space<vmem>>, vector<1x1x128x128xf32>
    %52 = vector.shape_cast %51 : vector<1x1x128x128xf32> to vector<128x128xf32>
    %cst_41 = arith.constant dense<0.000000e+00> : vector<32x128xf32>
    %53 = tpu.matmul %0, %52, %cst_41 {dimension_numbers = #tpu.dot_dimension_numbers<[1], [0], [0], [1], [0, 0, 1, 1], [], []>} : vector<32x128xf32>, vector<128x128xf32>, vector<32x128xf32> -> vector<32x128xf32>
    %54 = math.tanh %53 : vector<32x128xf32>
    %c0_42 = arith.constant 0 : index
    %c2_43 = arith.constant 2 : index
    %c0_44 = arith.constant 0 : index
    %c0_45 = arith.constant 0 : index
    %55 = vector.load %arg4[%c0_42, %c2_43, %c0_44, %c0_45] : memref<2x4x128x128xf32, #tpu.memory_space<vmem>>, vector<1x1x128x128xf32>
    %56 = vector.shape_cast %55 : vector<1x1x128x128xf32> to vector<128x128xf32>
    %cst_46 = arith.constant dense<0.000000e+00> : vector<32x128xf32>
    %57 = tpu.matmul %54, %56, %cst_46 {dimension_numbers = #tpu.dot_dimension_numbers<[1], [0], [0], [1], [0, 0, 1, 1], [], []>} : vector<32x128xf32>, vector<128x128xf32>, vector<32x128xf32> -> vector<32x128xf32>
    %58 = math.tanh %57 : vector<32x128xf32>
    %c0_47 = arith.constant 0 : index
    %c2_48 = arith.constant 2 : index
    %c0_49 = arith.constant 0 : index
    %c0_50 = arith.constant 0 : index
    %59 = vector.load %arg5[%c0_47, %c2_48, %c0_49, %c0_50] : memref<2x4x128x128xf32, #tpu.memory_space<vmem>>, vector<1x1x128x128xf32>
    %60 = vector.shape_cast %59 : vector<1x1x128x128xf32> to vector<128x128xf32>
    %cst_51 = arith.constant dense<0.000000e+00> : vector<32x128xf32>
    %61 = tpu.matmul %58, %60, %cst_51 {dimension_numbers = #tpu.dot_dimension_numbers<[1], [0], [0], [1], [0, 0, 1, 1], [], []>} : vector<32x128xf32>, vector<128x128xf32>, vector<32x128xf32> -> vector<32x128xf32>
    %62 = vector.broadcast %13 : vector<1x128xf32> to vector<32x128xf32>
    %63 = arith.addf %61, %62 : vector<32x128xf32>
    %64 = arith.mulf %0, %63 : vector<32x128xf32>
    %65 = vector.extract_strided_slice %11 {offsets = [0, 2], sizes = [32, 1], strides = [1, 1]} : vector<32x4xf32> to vector<32x1xf32>
    %66 = vector.broadcast %65 : vector<32x1xf32> to vector<32x128xf32>
    %67 = arith.mulf %64, %66 : vector<32x128xf32>
    %68 = arith.addf %50, %67 : vector<32x128xf32>
    %c0_52 = arith.constant 0 : index
    %c3 = arith.constant 3 : index
    %c0_53 = arith.constant 0 : index
    %c0_54 = arith.constant 0 : index
    %69 = vector.load %arg3[%c0_52, %c3, %c0_53, %c0_54] : memref<2x4x128x128xf32, #tpu.memory_space<vmem>>, vector<1x1x128x128xf32>
    %70 = vector.shape_cast %69 : vector<1x1x128x128xf32> to vector<128x128xf32>
    %cst_55 = arith.constant dense<0.000000e+00> : vector<32x128xf32>
    %71 = tpu.matmul %0, %70, %cst_55 {dimension_numbers = #tpu.dot_dimension_numbers<[1], [0], [0], [1], [0, 0, 1, 1], [], []>} : vector<32x128xf32>, vector<128x128xf32>, vector<32x128xf32> -> vector<32x128xf32>
    %72 = math.tanh %71 : vector<32x128xf32>
    %c0_56 = arith.constant 0 : index
    %c3_57 = arith.constant 3 : index
    %c0_58 = arith.constant 0 : index
    %c0_59 = arith.constant 0 : index
    %73 = vector.load %arg4[%c0_56, %c3_57, %c0_58, %c0_59] : memref<2x4x128x128xf32, #tpu.memory_space<vmem>>, vector<1x1x128x128xf32>
    %74 = vector.shape_cast %73 : vector<1x1x128x128xf32> to vector<128x128xf32>
    %cst_60 = arith.constant dense<0.000000e+00> : vector<32x128xf32>
    %75 = tpu.matmul %72, %74, %cst_60 {dimension_numbers = #tpu.dot_dimension_numbers<[1], [0], [0], [1], [0, 0, 1, 1], [], []>} : vector<32x128xf32>, vector<128x128xf32>, vector<32x128xf32> -> vector<32x128xf32>
    %76 = math.tanh %75 : vector<32x128xf32>
    %c0_61 = arith.constant 0 : index
    %c3_62 = arith.constant 3 : index
    %c0_63 = arith.constant 0 : index
    %c0_64 = arith.constant 0 : index
    %77 = vector.load %arg5[%c0_61, %c3_62, %c0_63, %c0_64] : memref<2x4x128x128xf32, #tpu.memory_space<vmem>>, vector<1x1x128x128xf32>
    %78 = vector.shape_cast %77 : vector<1x1x128x128xf32> to vector<128x128xf32>
    %cst_65 = arith.constant dense<0.000000e+00> : vector<32x128xf32>
    %79 = tpu.matmul %76, %78, %cst_65 {dimension_numbers = #tpu.dot_dimension_numbers<[1], [0], [0], [1], [0, 0, 1, 1], [], []>} : vector<32x128xf32>, vector<128x128xf32>, vector<32x128xf32> -> vector<32x128xf32>
    %80 = vector.broadcast %13 : vector<1x128xf32> to vector<32x128xf32>
    %81 = arith.addf %79, %80 : vector<32x128xf32>
    %82 = arith.mulf %0, %81 : vector<32x128xf32>
    %83 = vector.extract_strided_slice %11 {offsets = [0, 3], sizes = [32, 1], strides = [1, 1]} : vector<32x4xf32> to vector<32x1xf32>
    %84 = vector.broadcast %83 : vector<32x1xf32> to vector<32x128xf32>
    %85 = arith.mulf %82, %84 : vector<32x128xf32>
    %86 = arith.addf %68, %85 : vector<32x128xf32>
    %87 = arith.addf %86, %0 : vector<32x128xf32>
    %cst_66 = arith.constant dense<0.000000e+00> : vector<32x4xf32>
    %88 = tpu.matmul %87, %1, %cst_66 {dimension_numbers = #tpu.dot_dimension_numbers<[1], [0], [0], [1], [0, 0, 1, 1], [], []>} : vector<32x128xf32>, vector<128x4xf32>, vector<32x4xf32> -> vector<32x4xf32>
    %cst_67 = arith.constant dense<0xFF800000> : vector<32xf32>
    %89 = vector.multi_reduction <maximumf>, %88, %cst_67 [1] : vector<32x4xf32> to vector<32xf32>
    %90 = vector.shape_cast %89 : vector<32xf32> to vector<32x1xf32>
    %91 = vector.broadcast %90 : vector<32x1xf32> to vector<32x4xf32>
    %92 = arith.subf %88, %91 : vector<32x4xf32>
    %93 = math.exp %92 : vector<32x4xf32>
    %cst_68 = arith.constant dense<0.000000e+00> : vector<32xf32>
    %94 = vector.multi_reduction <add>, %93, %cst_68 [1] : vector<32x4xf32> to vector<32xf32>
    %95 = vector.shape_cast %94 : vector<32xf32> to vector<32x1xf32>
    %96 = vector.broadcast %95 : vector<32x1xf32> to vector<32x4xf32>
    %97 = arith.divf %93, %96 : vector<32x4xf32>
    %c1_69 = arith.constant 1 : index
    %c0_70 = arith.constant 0 : index
    %c0_71 = arith.constant 0 : index
    %98 = vector.load %arg6[%c1_69, %c0_70, %c0_71] : memref<2x1x128xf32, #tpu.memory_space<vmem>>, vector<1x1x128xf32>
    %99 = vector.shape_cast %98 : vector<1x1x128xf32> to vector<1x128xf32>
    %cst_72 = arith.constant 0.000000e+00 : f32
    %100 = vector.broadcast %cst_72 : f32 to vector<32x128xf32>
    %c1_73 = arith.constant 1 : index
    %c0_74 = arith.constant 0 : index
    %c0_75 = arith.constant 0 : index
    %c0_76 = arith.constant 0 : index
    %101 = vector.load %arg3[%c1_73, %c0_74, %c0_75, %c0_76] : memref<2x4x128x128xf32, #tpu.memory_space<vmem>>, vector<1x1x128x128xf32>
    %102 = vector.shape_cast %101 : vector<1x1x128x128xf32> to vector<128x128xf32>
    %cst_77 = arith.constant dense<0.000000e+00> : vector<32x128xf32>
    %103 = tpu.matmul %87, %102, %cst_77 {dimension_numbers = #tpu.dot_dimension_numbers<[1], [0], [0], [1], [0, 0, 1, 1], [], []>} : vector<32x128xf32>, vector<128x128xf32>, vector<32x128xf32> -> vector<32x128xf32>
    %104 = math.tanh %103 : vector<32x128xf32>
    %c1_78 = arith.constant 1 : index
    %c0_79 = arith.constant 0 : index
    %c0_80 = arith.constant 0 : index
    %c0_81 = arith.constant 0 : index
    %105 = vector.load %arg4[%c1_78, %c0_79, %c0_80, %c0_81] : memref<2x4x128x128xf32, #tpu.memory_space<vmem>>, vector<1x1x128x128xf32>
    %106 = vector.shape_cast %105 : vector<1x1x128x128xf32> to vector<128x128xf32>
    %cst_82 = arith.constant dense<0.000000e+00> : vector<32x128xf32>
    %107 = tpu.matmul %104, %106, %cst_82 {dimension_numbers = #tpu.dot_dimension_numbers<[1], [0], [0], [1], [0, 0, 1, 1], [], []>} : vector<32x128xf32>, vector<128x128xf32>, vector<32x128xf32> -> vector<32x128xf32>
    %108 = math.tanh %107 : vector<32x128xf32>
    %c1_83 = arith.constant 1 : index
    %c0_84 = arith.constant 0 : index
    %c0_85 = arith.constant 0 : index
    %c0_86 = arith.constant 0 : index
    %109 = vector.load %arg5[%c1_83, %c0_84, %c0_85, %c0_86] : memref<2x4x128x128xf32, #tpu.memory_space<vmem>>, vector<1x1x128x128xf32>
    %110 = vector.shape_cast %109 : vector<1x1x128x128xf32> to vector<128x128xf32>
    %cst_87 = arith.constant dense<0.000000e+00> : vector<32x128xf32>
    %111 = tpu.matmul %108, %110, %cst_87 {dimension_numbers = #tpu.dot_dimension_numbers<[1], [0], [0], [1], [0, 0, 1, 1], [], []>} : vector<32x128xf32>, vector<128x128xf32>, vector<32x128xf32> -> vector<32x128xf32>
    %112 = vector.broadcast %99 : vector<1x128xf32> to vector<32x128xf32>
    %113 = arith.addf %111, %112 : vector<32x128xf32>
    %114 = arith.mulf %0, %113 : vector<32x128xf32>
    %115 = vector.extract_strided_slice %97 {offsets = [0, 0], sizes = [32, 1], strides = [1, 1]} : vector<32x4xf32> to vector<32x1xf32>
    %116 = vector.broadcast %115 : vector<32x1xf32> to vector<32x128xf32>
    %117 = arith.mulf %114, %116 : vector<32x128xf32>
    %118 = arith.addf %100, %117 : vector<32x128xf32>
    %c1_88 = arith.constant 1 : index
    %c1_89 = arith.constant 1 : index
    %c0_90 = arith.constant 0 : index
    %c0_91 = arith.constant 0 : index
    %119 = vector.load %arg3[%c1_88, %c1_89, %c0_90, %c0_91] : memref<2x4x128x128xf32, #tpu.memory_space<vmem>>, vector<1x1x128x128xf32>
    %120 = vector.shape_cast %119 : vector<1x1x128x128xf32> to vector<128x128xf32>
    %cst_92 = arith.constant dense<0.000000e+00> : vector<32x128xf32>
    %121 = tpu.matmul %87, %120, %cst_92 {dimension_numbers = #tpu.dot_dimension_numbers<[1], [0], [0], [1], [0, 0, 1, 1], [], []>} : vector<32x128xf32>, vector<128x128xf32>, vector<32x128xf32> -> vector<32x128xf32>
    %122 = math.tanh %121 : vector<32x128xf32>
    %c1_93 = arith.constant 1 : index
    %c1_94 = arith.constant 1 : index
    %c0_95 = arith.constant 0 : index
    %c0_96 = arith.constant 0 : index
    %123 = vector.load %arg4[%c1_93, %c1_94, %c0_95, %c0_96] : memref<2x4x128x128xf32, #tpu.memory_space<vmem>>, vector<1x1x128x128xf32>
    %124 = vector.shape_cast %123 : vector<1x1x128x128xf32> to vector<128x128xf32>
    %cst_97 = arith.constant dense<0.000000e+00> : vector<32x128xf32>
    %125 = tpu.matmul %122, %124, %cst_97 {dimension_numbers = #tpu.dot_dimension_numbers<[1], [0], [0], [1], [0, 0, 1, 1], [], []>} : vector<32x128xf32>, vector<128x128xf32>, vector<32x128xf32> -> vector<32x128xf32>
    %126 = math.tanh %125 : vector<32x128xf32>
    %c1_98 = arith.constant 1 : index
    %c1_99 = arith.constant 1 : index
    %c0_100 = arith.constant 0 : index
    %c0_101 = arith.constant 0 : index
    %127 = vector.load %arg5[%c1_98, %c1_99, %c0_100, %c0_101] : memref<2x4x128x128xf32, #tpu.memory_space<vmem>>, vector<1x1x128x128xf32>
    %128 = vector.shape_cast %127 : vector<1x1x128x128xf32> to vector<128x128xf32>
    %cst_102 = arith.constant dense<0.000000e+00> : vector<32x128xf32>
    %129 = tpu.matmul %126, %128, %cst_102 {dimension_numbers = #tpu.dot_dimension_numbers<[1], [0], [0], [1], [0, 0, 1, 1], [], []>} : vector<32x128xf32>, vector<128x128xf32>, vector<32x128xf32> -> vector<32x128xf32>
    %130 = vector.broadcast %99 : vector<1x128xf32> to vector<32x128xf32>
    %131 = arith.addf %129, %130 : vector<32x128xf32>
    %132 = arith.mulf %0, %131 : vector<32x128xf32>
    %133 = vector.extract_strided_slice %97 {offsets = [0, 1], sizes = [32, 1], strides = [1, 1]} : vector<32x4xf32> to vector<32x1xf32>
    %134 = vector.broadcast %133 : vector<32x1xf32> to vector<32x128xf32>
    %135 = arith.mulf %132, %134 : vector<32x128xf32>
    %136 = arith.addf %118, %135 : vector<32x128xf32>
    %c1_103 = arith.constant 1 : index
    %c2_104 = arith.constant 2 : index
    %c0_105 = arith.constant 0 : index
    %c0_106 = arith.constant 0 : index
    %137 = vector.load %arg3[%c1_103, %c2_104, %c0_105, %c0_106] : memref<2x4x128x128xf32, #tpu.memory_space<vmem>>, vector<1x1x128x128xf32>
    %138 = vector.shape_cast %137 : vector<1x1x128x128xf32> to vector<128x128xf32>
    %cst_107 = arith.constant dense<0.000000e+00> : vector<32x128xf32>
    %139 = tpu.matmul %87, %138, %cst_107 {dimension_numbers = #tpu.dot_dimension_numbers<[1], [0], [0], [1], [0, 0, 1, 1], [], []>} : vector<32x128xf32>, vector<128x128xf32>, vector<32x128xf32> -> vector<32x128xf32>
    %140 = math.tanh %139 : vector<32x128xf32>
    %c1_108 = arith.constant 1 : index
    %c2_109 = arith.constant 2 : index
    %c0_110 = arith.constant 0 : index
    %c0_111 = arith.constant 0 : index
    %141 = vector.load %arg4[%c1_108, %c2_109, %c0_110, %c0_111] : memref<2x4x128x128xf32, #tpu.memory_space<vmem>>, vector<1x1x128x128xf32>
    %142 = vector.shape_cast %141 : vector<1x1x128x128xf32> to vector<128x128xf32>
    %cst_112 = arith.constant dense<0.000000e+00> : vector<32x128xf32>
    %143 = tpu.matmul %140, %142, %cst_112 {dimension_numbers = #tpu.dot_dimension_numbers<[1], [0], [0], [1], [0, 0, 1, 1], [], []>} : vector<32x128xf32>, vector<128x128xf32>, vector<32x128xf32> -> vector<32x128xf32>
    %144 = math.tanh %143 : vector<32x128xf32>
    %c1_113 = arith.constant 1 : index
    %c2_114 = arith.constant 2 : index
    %c0_115 = arith.constant 0 : index
    %c0_116 = arith.constant 0 : index
    %145 = vector.load %arg5[%c1_113, %c2_114, %c0_115, %c0_116] : memref<2x4x128x128xf32, #tpu.memory_space<vmem>>, vector<1x1x128x128xf32>
    %146 = vector.shape_cast %145 : vector<1x1x128x128xf32> to vector<128x128xf32>
    %cst_117 = arith.constant dense<0.000000e+00> : vector<32x128xf32>
    %147 = tpu.matmul %144, %146, %cst_117 {dimension_numbers = #tpu.dot_dimension_numbers<[1], [0], [0], [1], [0, 0, 1, 1], [], []>} : vector<32x128xf32>, vector<128x128xf32>, vector<32x128xf32> -> vector<32x128xf32>
    %148 = vector.broadcast %99 : vector<1x128xf32> to vector<32x128xf32>
    %149 = arith.addf %147, %148 : vector<32x128xf32>
    %150 = arith.mulf %0, %149 : vector<32x128xf32>
    %151 = vector.extract_strided_slice %97 {offsets = [0, 2], sizes = [32, 1], strides = [1, 1]} : vector<32x4xf32> to vector<32x1xf32>
    %152 = vector.broadcast %151 : vector<32x1xf32> to vector<32x128xf32>
    %153 = arith.mulf %150, %152 : vector<32x128xf32>
    %154 = arith.addf %136, %153 : vector<32x128xf32>
    %c1_118 = arith.constant 1 : index
    %c3_119 = arith.constant 3 : index
    %c0_120 = arith.constant 0 : index
    %c0_121 = arith.constant 0 : index
    %155 = vector.load %arg3[%c1_118, %c3_119, %c0_120, %c0_121] : memref<2x4x128x128xf32, #tpu.memory_space<vmem>>, vector<1x1x128x128xf32>
    %156 = vector.shape_cast %155 : vector<1x1x128x128xf32> to vector<128x128xf32>
    %cst_122 = arith.constant dense<0.000000e+00> : vector<32x128xf32>
    %157 = tpu.matmul %87, %156, %cst_122 {dimension_numbers = #tpu.dot_dimension_numbers<[1], [0], [0], [1], [0, 0, 1, 1], [], []>} : vector<32x128xf32>, vector<128x128xf32>, vector<32x128xf32> -> vector<32x128xf32>
    %158 = math.tanh %157 : vector<32x128xf32>
    %c1_123 = arith.constant 1 : index
    %c3_124 = arith.constant 3 : index
    %c0_125 = arith.constant 0 : index
    %c0_126 = arith.constant 0 : index
    %159 = vector.load %arg4[%c1_123, %c3_124, %c0_125, %c0_126] : memref<2x4x128x128xf32, #tpu.memory_space<vmem>>, vector<1x1x128x128xf32>
    %160 = vector.shape_cast %159 : vector<1x1x128x128xf32> to vector<128x128xf32>
    %cst_127 = arith.constant dense<0.000000e+00> : vector<32x128xf32>
    %161 = tpu.matmul %158, %160, %cst_127 {dimension_numbers = #tpu.dot_dimension_numbers<[1], [0], [0], [1], [0, 0, 1, 1], [], []>} : vector<32x128xf32>, vector<128x128xf32>, vector<32x128xf32> -> vector<32x128xf32>
    %162 = math.tanh %161 : vector<32x128xf32>
    %c1_128 = arith.constant 1 : index
    %c3_129 = arith.constant 3 : index
    %c0_130 = arith.constant 0 : index
    %c0_131 = arith.constant 0 : index
    %163 = vector.load %arg5[%c1_128, %c3_129, %c0_130, %c0_131] : memref<2x4x128x128xf32, #tpu.memory_space<vmem>>, vector<1x1x128x128xf32>
    %164 = vector.shape_cast %163 : vector<1x1x128x128xf32> to vector<128x128xf32>
    %cst_132 = arith.constant dense<0.000000e+00> : vector<32x128xf32>
    %165 = tpu.matmul %162, %164, %cst_132 {dimension_numbers = #tpu.dot_dimension_numbers<[1], [0], [0], [1], [0, 0, 1, 1], [], []>} : vector<32x128xf32>, vector<128x128xf32>, vector<32x128xf32> -> vector<32x128xf32>
    %166 = vector.broadcast %99 : vector<1x128xf32> to vector<32x128xf32>
    %167 = arith.addf %165, %166 : vector<32x128xf32>
    %168 = arith.mulf %0, %167 : vector<32x128xf32>
    %169 = vector.extract_strided_slice %97 {offsets = [0, 3], sizes = [32, 1], strides = [1, 1]} : vector<32x4xf32> to vector<32x1xf32>
    %170 = vector.broadcast %169 : vector<32x1xf32> to vector<32x128xf32>
    %171 = arith.mulf %168, %170 : vector<32x128xf32>
    %172 = arith.addf %154, %171 : vector<32x128xf32>
    %173 = arith.addf %172, %87 : vector<32x128xf32>
    %c0_133 = arith.constant 0 : index
    %c0_134 = arith.constant 0 : index
    %174 = vector.load %arg7[%c0_133, %c0_134] : memref<32x128xf32, #tpu.memory_space<vmem>>, vector<32x128xf32>
    tpu.vector_store %arg7[%c0_133, %c0_134], %173 {strides = array<i32>} : memref<32x128xf32, #tpu.memory_space<vmem>>, vector<32x128xf32>,
    return
  }
  func.func @transform_0(%arg0: i32) -> (i32, i32) {
    %c0_i32 = arith.constant 0 : i32
    %c0_i32_0 = arith.constant 0 : i32
    return %arg0, %c0_i32 : i32, i32
  }
  func.func @transform_1(%arg0: i32) -> (i32, i32) {
    %c0_i32 = arith.constant 0 : i32
    %c0_i32_0 = arith.constant 0 : i32
    %c0_i32_1 = arith.constant 0 : i32
    return %c0_i32, %c0_i32_0 : i32, i32
  }
  func.func @transform_2(%arg0: i32) -> (i32, i32, i32, i32) {
    %c0_i32 = arith.constant 0 : i32
    %c0_i32_0 = arith.constant 0 : i32
    %c0_i32_1 = arith.constant 0 : i32
    %c0_i32_2 = arith.constant 0 : i32
    %c0_i32_3 = arith.constant 0 : i32
    return %c0_i32, %c0_i32_0, %c0_i32_1, %c0_i32_2 : i32, i32, i32, i32
  }
  func.func @transform_3(%arg0: i32) -> (i32, i32, i32, i32) {
    %c0_i32 = arith.constant 0 : i32
    %c0_i32_0 = arith.constant 0 : i32
    %c0_i32_1 = arith.constant 0 : i32
    %c0_i32_2 = arith.constant 0 : i32
    %c0_i32_3 = arith.constant 0 : i32
    return %c0_i32, %c0_i32_0, %c0_i32_1, %c0_i32_2 : i32, i32, i32, i32
  }
  func.func @transform_4(%arg0: i32) -> (i32, i32, i32, i32) {
    %c0_i32 = arith.constant 0 : i32
    %c0_i32_0 = arith.constant 0 : i32
    %c0_i32_1 = arith.constant 0 : i32
    %c0_i32_2 = arith.constant 0 : i32
    %c0_i32_3 = arith.constant 0 : i32
    return %c0_i32, %c0_i32_0, %c0_i32_1, %c0_i32_2 : i32, i32, i32, i32
  }
  func.func @transform_5(%arg0: i32) -> (i32, i32, i32) {
    %c0_i32 = arith.constant 0 : i32
    %c0_i32_0 = arith.constant 0 : i32
    %c0_i32_1 = arith.constant 0 : i32
    %c0_i32_2 = arith.constant 0 : i32
    return %c0_i32, %c0_i32_0, %c0_i32_1 : i32, i32, i32
  }
  func.func @transform_6(%arg0: i32) -> (i32, i32) {
    %c0_i32 = arith.constant 0 : i32
    %c0_i32_0 = arith.constant 0 : i32
    return %arg0, %c0_i32 : i32, i32
  }
}

</mosaic_0001>

<bundles_post_ra>
// kernel: tpu_custom_call.1
= control target key start
LH: loop header
LB: loop body
LE: loop exit
PB: predicated region body
PF: predicated region fallthrough
CT: control target
= control target key end

     0   :  { %11 = vsyncpa [#allocation3], 0  ;;  %s6988_s0 = inlined_call_operand.vmem [shape: f32[64,128], index: 0, kind: input, shape index: {}]   ;;  %s6989_s1 = inlined_call_operand.vmem [shape: f32[128,4], index: 1, kind: input, shape index: {}]   ;;  %s6990_s2 = inlined_call_operand.hbm [shape: f32[2,4,128,128], index: 2, kind: input, shape index: {}]   ;;  %s6991_s3 = inlined_call_operand.hbm [shape: f32[2,4,128,128], index: 3, kind: input, shape index: {}]   ;;  %s6992_s4 = inlined_call_operand.hbm [shape: f32[2,4,128,128], index: 4, kind: input, shape index: {}]   ;;  %s6993_s5 = inlined_call_operand.vmem [shape: f32[2,1,128], index: 5, kind: input, shape index: {}]   ;;  %s6994_s6 = inlined_call_operand.hbm [shape: f32[64,128], index: 6, kind: output, shape index: {}]  }
   0x1   :  { %12 = vsyncpa [#allocation6], 0 }
   0x2   :  { %13 = vsyncpa [#allocation4], 0 }
   0x3   :  { %15 = vsyncpa [#allocation4 + $0x1], 0  ;;  %s6292_s21 = smov 0   ;;  %s6294_s22 = smov 0  }
   0x4   :  { %s6296_s23 = smov 0   ;;  %s6298_s24 = smov 0  }
   0x5 LB: > { %6999 = sst [smem:[#allocation12_spill]] %s6239_s23  ;;  %s6313_s25 = sadd.s32 4294967295, %s6243_s24   ;;  %s6243_s24 = sphi %s6298_s24, %s7017_s24   ;;  %s6239_s23 = sphi %s6296_s23, %s7014_s23   ;;  %s6235_s22 = sphi %s6294_s22, %s7016_s22   ;;  %s6231_s21 = sphi %s6292_s21, %s7015_s21  }
   0x6   : > { %s3451_s26 = sadd.s32 4294967294, %s6243_s24   ;;  %s6317_s27 = sadd.s32 1, %s6243_s24  }
   0x7   : > { %s159_s28 = sadd.s32 1, %s6239_s23  ;;  %s156_s29 = ssub.s32 %s6243_s24, %s6317_s27 }
   0x8   : > { %p169_p0 = scmp.ne.s32.totalorder %s6239_s23, %s6235_s22  ;;  %p157_p1 = scmp.eq.s32.totalorder %s156_s29, 0 }
   0x9   : > { %p170_p2 = scmp.eq.s32.totalorder %s6313_s25, 1  ;;  %p175_p3 = scmp.ne.s32.totalorder %s6235_s22, %s6231_s21 }
   0xa   : > { %p176_p4 = scmp.eq.s32.totalorder %s3451_s26, 1  ;;  %p3452_p7 = scmp.ge.s32.totalorder %s6243_s24, 1 }
   0xb   : > { %s6328_s30 = scalar_select %p157_p1, %s6239_s23, %s159_s28  }
   0xc   : > { %p6330_p5 = por %p170_p2, %p169_p0  ;;  %p6334_p6 = por %p176_p4, %p175_p3 }
   0xd   : > { %7000 = sst [smem:[#allocation13_spill]] %s6328_s30  ;;  %p183_p8 = scmp.lt.s32.totalorder %s6243_s24, 3 }
   0xe   : > { %s7001_s7 = scalar_select %p6330_p5, 1, 0 }
   0xf   : > { %s7002_s8 = scalar_select %p6334_p6, 1, 0 }
  0x10   : > { %p6995_p9 = scmp.eq.s32.totalorder %s6313_s25, 0  ;;  %p6341_p10 = pnand %p3452_p7, %p183_p8 }
  0x11   : > { %s6245_s10 = smov [#allocation5]   ;;  %s6246_s13 = smov [#allocation2]  }
  0x12   : > { %s7003_s9 = scalar_select %p6341_p10, 1, 0 }
  0x13   : > { %p5827_p11 = pneg %p6341_p10  ;;  %s211_s11 = sshll.u32 %s6245_s10, 4  ;;  %s6347_s11 = int_to_ptr.vmem [resolvable:$true] %s211_s11 }
  0x14   : > { %s198_s14 = sshll.u32 %s6246_s13, 4  ;;  %s6247_s15 = smov [#allocation7]   ;;  %s6355_s14 = int_to_ptr.vmem [resolvable:$true] %s198_s14 }
  0x15   : > { %p6351_p12 = pnand %p6995_p9, %p5827_p11  ;;  %s6357_s16 = sshll.u32 %s6247_s15, 4  ;;  %s225_s16 = int_to_ptr.vmem [resolvable:$true] %s6357_s16 }
  0x16   : > { %s6089_s19 = scalar_lea.hbm %s6991_s3, 16384 }
  0x17   : > { %p6090_p13 = scmp.ne.s32.totalorder %s6991_s3, %s6089_s19  ;;  %p6367_p0 = pneg %p6351_p12 }
  0x18   : > { %p6096_p3 = scmp.lt.u32.totalorder %s6089_s19, %s6991_s3 }
  0x19   : > { %p6092_p1 = pnand %p6367_p0, %p6090_p13 }
  0x1b   : > { %p6093_p2 = pneg %p6092_p1 }
  0x1d   : > { %p6098_p4 = pnand %p6096_p3, %p6093_p2 }
  0x1f   : > { %6101 = shalt.err (!%p6098_p4)
}
  0x20   : > { %s6102_s13 = scalar_lea.vmem %s6347_s11, 16384  ;;  %p6110_p9 = scmp.lt.s32.totalorder %s6347_s11, %s6347_s11 }
  0x21   : > { %p6103_p7 = scmp.ne.s32.totalorder %s6347_s11, %s6102_s13  ;;  %p6111_p6 = scmp.lt.s32.totalorder %s6102_s13, %s6102_s13 }
  0x23   : > { %p6105_p8 = pnand %p6103_p7, %p6367_p0  ;;  %p6112_p13 = por %p6111_p6, %p6110_p9 }
  0x25   : > { %p6106_p11 = pneg %p6105_p8 }
  0x27   : > { %p6113_p1 = pnand %p6112_p13, %p6106_p11 }
  0x29   : > { %6116 = shalt.err (!%p6113_p1)
}
  0x2a   : > { %s6248_s15 = smov 128   ;;  %s6249_s17 = smov 8  }
  0x2b   : > { %5833 = dma.hbm_to_vmem [thread:$0]  (!%p6351_p12), %s6991_s3, 16384, %s6347_s11, [#allocation6], %s6248_s15, %s6248_s15, %s6249_s17  }
  0x2c   : > { %s6117_s29 = scalar_lea.hbm %s6990_s2, 16384 }
  0x2d   : > { %p6118_p6 = scmp.ne.s32.totalorder %s6990_s2, %s6117_s29  ;;  %p6124_p3 = scmp.lt.u32.totalorder %s6117_s29, %s6990_s2 }
  0x2f   : > { %p6120_p9 = pnand %p6118_p6, %p6367_p0 }
  0x31   : > { %p6121_p2 = pneg %p6120_p9 }
  0x33   : > { %p6126_p4 = pnand %p6124_p3, %p6121_p2 }
  0x35   : > { %6129 = shalt.err (!%p6126_p4)
}
  0x36   : > { %s6130_s11 = scalar_lea.vmem %s6355_s14, 16384  ;;  %p6138_p13 = scmp.lt.s32.totalorder %s6355_s14, %s6355_s14 }
  0x37   : > { %p6131_p7 = scmp.ne.s32.totalorder %s6355_s14, %s6130_s11  ;;  %p6139_p1 = scmp.lt.s32.totalorder %s6130_s11, %s6130_s11 }
  0x39   : > { %p6133_p8 = pnand %p6131_p7, %p6367_p0  ;;  %p6140_p6 = por %p6139_p1, %p6138_p13 }
  0x3b   : > { %p6134_p11 = pneg %p6133_p8 }
  0x3d   : > { %p6141_p9 = pnand %p6140_p6, %p6134_p11 }
  0x3f   : > { %6144 = shalt.err (!%p6141_p9)
}
  0x40   : > { %5830 = dma.hbm_to_vmem [thread:$0]  (!%p6351_p12), %s6990_s2, 16384, %s6355_s14, [#allocation3], %s6248_s15, %s6248_s15, %s6249_s17  }
  0x41   : > { %s6145_s20 = scalar_lea.hbm %s6992_s4, 16384 }
  0x42   : > { %p6146_p2 = scmp.ne.s32.totalorder %s6992_s4, %s6145_s20  ;;  %p6152_p7 = scmp.lt.u32.totalorder %s6145_s20, %s6992_s4 }
  0x44   : > { %p6148_p3 = pnand %p6146_p2, %p6367_p0 }
  0x46   : > { %p6149_p4 = pneg %p6148_p3 }
  0x48   : > { %p6154_p8 = pnand %p6152_p7, %p6149_p4 }
  0x4a   : > { %6157 = shalt.err (!%p6154_p8)
}
  0x4b   : > { %s6158_s11 = scalar_lea.vmem %s225_s16, 16384  ;;  %p6166_p6 = scmp.lt.s32.totalorder %s225_s16, %s225_s16 }
  0x4c   : > { %p6159_p11 = scmp.ne.s32.totalorder %s225_s16, %s6158_s11  ;;  %p6167_p9 = scmp.lt.s32.totalorder %s6158_s11, %s6158_s11 }
  0x4e   : > { %p6161_p13 = pnand %p6159_p11, %p6367_p0  ;;  %p6168_p5 = por %p6167_p9, %p6166_p6 }
  0x50   : > { %p6162_p1 = pneg %p6161_p13 }
  0x52   : > { %p6169_p10 = pnand %p6168_p5, %p6162_p1 }
  0x54   : > { %6172 = shalt.err (!%p6169_p10)
}
  0x55   : > { %5836 = dma.hbm_to_vmem [thread:$0]  (!%p6351_p12), %s6992_s4, 16384, %s225_s16, [#allocation6], %s6248_s15, %s6248_s15, %s6249_s17  }
  0x56   : > { %p7006_p2 = scmp.ne.s32.totalorder %s7003_s9, 0 }
  0x57   : > { %p7007_p0 = scmp.eq.s32.totalorder (!%p7006_p2), %s6313_s25, 0 }
  0x58   : > { %252 = sbr.rel (%p7006_p2) target bundleno = 3043 (0xbe3), region = 44 }
  0x5f   : > { %6218 = dma.done.wait (%p7007_p0), [#allocation3], 16384   ;;  %p7008_p3 = pmov %p7007_p0 }
  0x60   : > { %p7009_p5 = pmov %p7007_p0 }
  0x61   : > { %6220 = vsyncadd (%p7008_p3), [#allocation3], 4294950912 }
  0x62   : > { %6222 = dma.done.wait (%p7009_p5), [#allocation6], 32768   ;;  %p7010_p10 = pmov %p7007_p0 }
  0x63   : > { %s3462_s12 = sshll.u32 %s6313_s25, 2  ;;  %v301_v0 = vld [vmem:[%s6989_s1] sm:$0xff]  ;;  %v302_v1 = vld [vmem:[%s6989_s1 + $0x8] sm:$0xff]  ;;  %v303_v5 = vld [vmem:[%s6989_s1 + $0x10] sm:$0xff]  ;;  %vm402_vm0 = vcmask 31744   ;;  %s3472_s20 = sshll.u32 %s6313_s25, 9 }
  0x64   : > { %6224 = vsyncadd (%p7010_p10), [#allocation6], 4294934528  ;;  %p291_p4 = scmp.lt.s32.totalorder %s3462_s12, 7  ;;  %v448_v2 = vld [vmem:[#allocation2] sm:$0xff]  ;;  %v6456_v3 = vpack.c.bf16 %v302_v1, %v301_v0  ;;  %v449_v4 = vld [vmem:[#allocation2 + $0x8] sm:$0xff]  ;;  %s6940_s11 = scalar_lea.hbm %s6994_s6, %s3472_s20 }
  0x65   : > { %v304_v6 = vld [vmem:[%s6989_s1 + $0x18] sm:$0xff]  ;;  %v5013_v7 = vpack.c.bf16 %v449_v4, %v448_v2  ;;  %v450_v9 = vld [vmem:[#allocation2 + $0x10] sm:$0xff]  ;;  %v305_v11 = vld [vmem:[%s6989_s1 + $0x20] sm:$0xff]  ;;  %p7011_p7 = scmp.ne.s32.totalorder %s7001_s7, 0  ;;  %s6254_s23 = smov [#allocation8]  }
  0x66   : > { %s7019_s12 = smov (!%p291_p4, %s3462_s12), 7  ;;  %v6464_v8 = vpack.c.bf16 %v304_v6, %v303_v5  ;;  %v451_v10 = vld [vmem:[#allocation2 + $0x18] sm:$0xff]  ;;  %4982 = vmatprep.subr.bf16.mxu0 %v6456_v3  ;;  %v306_v13 = vld [vmem:[%s6989_s1 + $0x28] sm:$0xff]  ;;  %v452_v14 = vld [vmem:[#allocation2 + $0x20] sm:$0xff]  ;;  %s6177_s28 = sshll.u32 %s6254_s23, 4  ;;  %s6178_s28 = int_to_ptr.vmem [resolvable:$false] %s6177_s28 }
  0x67   : > { %v5017_v12 = vpack.c.bf16 %v451_v10, %v450_v9  ;;  %v453_v15 = vld [vmem:[#allocation2 + $0x28] sm:$0xff]  ;;  %5014 = vmatprep.subr.bf16.mxu1 %v5013_v7  ;;  %4984 = vmatpush3.bf16.msra.mxu0 %v6456_v3  ;;  %s3463_s13 = sshll.u32 %s7019_s12, 3  ;;  %v6475_v16 = vpack.c.bf16 %v306_v13, %v305_v11  ;;  %v307_v18 = vld [vmem:[%s6989_s1 + $0x30] sm:$0xff]  ;;  %v308_v19 = vld [vmem:[%s6989_s1 + $0x38] sm:$0xff]  ;;  %s6179_s16 = scalar_lea.vmem %s6178_s28, 1024 }
  0x68   : > { %5016 = vmatpush3.bf16.msra.mxu1 %v5013_v7  ;;  %4986 = vmatprep.subr.bf16.mxu0 %v6464_v8  ;;  %v5021_v17 = vpack.c.bf16 %v453_v15, %v452_v14  ;;  %v454_v20 = vld [vmem:[#allocation2 + $0x30] sm:$0xff]  ;;  %v455_v21 = vld [vmem:[#allocation2 + $0x38] sm:$0xff]  ;;  %s6486_s12 = scalar_lea.vmem %s6988_s0, %s3463_s13  ;;  %v6490_v22 = vpack.c.bf16 %v308_v19, %v307_v18  ;;  %v309_v24 = vld [vmem:[%s6989_s1 + $0x40] sm:$0xff] }
  0x69   : > { %5018 = vmatprep.subr.bf16.mxu1 %v5017_v12  ;;  %v5025_v23 = vpack.c.bf16 %v455_v21, %v454_v20  ;;  %v310_v25 = vld [vmem:[%s6989_s1 + $0x48] sm:$0xff]  ;;  %v6499_v26 = vld [vmem:[%s6486_s12] sm:$0xff]  ;;  %v311_v31 = vld [vmem:[%s6989_s1 + $0x50] sm:$0xff] }
  0x6a   : > { %v456_v27 = vld [vmem:[#allocation2 + $0x40] sm:$0xff]  ;;  %v457_v28 = vld [vmem:[#allocation2 + $0x48] sm:$0xff]  ;;  %4025 = vmatprep.mubr.f32.mxu0 %v6499_v26  ;;  %4063 = vmatprep.mubr.f32.mxu1 %v6499_v26  ;;  %v6505_v29 = vpack.c.bf16 %v310_v25, %v309_v24  ;;  %v312_v32 = vld [vmem:[%s6989_s1 + $0x58] sm:$0xff] }
  0x6b   : > { %4988 = vmatpush3.bf16.msra.mxu0 %v6464_v8  ;;  %v5029_v30 = vpack.c.bf16 %v457_v28, %v456_v27  ;;  %v458_v33 = vld [vmem:[#allocation2 + $0x50] sm:$0xff]  ;;  %v459_v34 = vld [vmem:[#allocation2 + $0x58] sm:$0xff]  ;;  %v6515_v35 = vpack.c.bf16 %v312_v32, %v311_v31  ;;  %v313_v37 = vld [vmem:[%s6989_s1 + $0x60] sm:$0xff] }
  0x6c   : > { %5020 = vmatpush3.bf16.msra.mxu1 %v5017_v12  ;;  %4990 = vmatprep.subr.bf16.mxu0 %v6475_v16  ;;  %v5033_v36 = vpack.c.bf16 %v459_v34, %v458_v33  ;;  %v314_v38 = vld [vmem:[%s6989_s1 + $0x68] sm:$0xff]  ;;  %v460_v39 = vld [vmem:[#allocation2 + $0x60] sm:$0xff]  ;;  %v315_v43 = vld [vmem:[%s6989_s1 + $0x70] sm:$0xff] }
  0x6d   : > { %5022 = vmatprep.subr.bf16.mxu1 %v5021_v17  ;;  %v461_v40 = vld [vmem:[#allocation2 + $0x68] sm:$0xff]  ;;  %v6525_v41 = vpack.c.bf16 %v314_v38, %v313_v37  ;;  %v316_v44 = vld [vmem:[%s6989_s1 + $0x78] sm:$0xff]  ;;  %v462_v45 = vld [vmem:[#allocation2 + $0x70] sm:$0xff] }
  0x6e   : > { %v5037_v42 = vpack.c.bf16 %v461_v40, %v460_v39  ;;  %v463_v46 = vld [vmem:[#allocation2 + $0x78] sm:$0xff]  ;;  %v6535_v47 = vpack.c.bf16 %v316_v44, %v315_v43  ;;  %v553_v49 = vld [vmem:[#allocation5] sm:$0xff]  ;;  %v554_v50 = vld [vmem:[#allocation5 + $0x8] sm:$0xff] }
  0x6f   : > { %4992 = vmatpush3.bf16.msra.mxu0 %v6475_v16  ;;  %v5041_v48 = vpack.c.bf16 %v463_v46, %v462_v45  ;;  %v5045_v51 = vpack.c.bf16 %v554_v50, %v553_v49  ;;  %v555_v52 = vld [vmem:[#allocation5 + $0x10] sm:$0xff]  ;;  %v556_v53 = vld [vmem:[#allocation5 + $0x18] sm:$0xff]  ;;  %v6541_v54 = vld [vmem:[%s6486_s12 + $0x8] sm:$0xff] }
  0x70   : > { %5024 = vmatpush3.bf16.msra.mxu1 %v5021_v17  ;;  %4994 = vmatprep.subr.bf16.mxu0 %v6490_v22  ;;  %v6544_v55 = vld [vmem:[%s6486_s12 + $0x10] sm:$0xff]  ;;  %v5049_v56 = vpack.c.bf16 %v556_v53, %v555_v52  ;;  %v557_v57 = vld [vmem:[#allocation5 + $0x20] sm:$0xff]  ;;  %v558_v58 = vld [vmem:[#allocation5 + $0x28] sm:$0xff] }
  0x71   : > { %5026 = vmatprep.subr.bf16.mxu1 %v5025_v23  ;;  %v6550_v59 = vld [vmem:[%s6486_s12 + $0x18] sm:$0xff]  ;;  %v5053_v60 = vpack.c.bf16 %v558_v58, %v557_v57  ;;  %v559_v61 = vld [vmem:[#allocation5 + $0x30] sm:$0xff]  ;;  %v561_v0 = vld [vmem:[#allocation5 + $0x40] sm:$0xff] }
  0x72   : > { %v560_v62 = vld [vmem:[#allocation5 + $0x38] sm:$0xff]  ;;  %v562_v1 = vld [vmem:[#allocation5 + $0x48] sm:$0xff]  ;;  %v563_v4 = vld [vmem:[#allocation5 + $0x50] sm:$0xff] }
  0x73   : > { %4996 = vmatpush3.bf16.msra.mxu0 %v6490_v22  ;;  %v5057_v63 = vpack.c.bf16 %v560_v62, %v559_v61  ;;  %v5061_v2 = vpack.c.bf16 %v562_v1, %v561_v0  ;;  %v564_v5 = vld [vmem:[#allocation5 + $0x58] sm:$0xff]  ;;  %v565_v7 = vld [vmem:[#allocation5 + $0x60] sm:$0xff]  ;;  %v566_v9 = vld [vmem:[#allocation5 + $0x68] sm:$0xff] }
  0x74   : > { %5028 = vmatpush3.bf16.msra.mxu1 %v5025_v23  ;;  %4998 = vmatprep.subr.bf16.mxu0 %v6505_v29  ;;  %v5065_v6 = vpack.c.bf16 %v564_v5, %v563_v4  ;;  %v5069_v10 = vpack.c.bf16 %v566_v9, %v565_v7  ;;  %v567_v11 = vld [vmem:[#allocation5 + $0x70] sm:$0xff]  ;;  %v568_v12 = vld [vmem:[#allocation5 + $0x78] sm:$0xff]  ;;  %v798_v14 = vld [vmem:[#allocation2 + $0x80] sm:$0xff] }
  0x75   : > { %5030 = vmatprep.subr.bf16.mxu1 %v5029_v30  ;;  %v5073_v13 = vpack.c.bf16 %v568_v12, %v567_v11  ;;  %v799_v15 = vld [vmem:[#allocation2 + $0x88] sm:$0xff]  ;;  %v800_v33 = vld [vmem:[#allocation2 + $0x90] sm:$0xff]  ;;  %v801_v34 = vld [vmem:[#allocation2 + $0x98] sm:$0xff] }
  0x76   : > { %v5109_v17 = vpack.c.bf16 %v799_v15, %v798_v14  ;;  %v5113_v37 = vpack.c.bf16 %v801_v34, %v800_v33  ;;  %v802_v39 = vld [vmem:[#allocation2 + $0xa0] sm:$0xff]  ;;  %v803_v40 = vld [vmem:[#allocation2 + $0xa8] sm:$0xff]  ;;  %v804_v45 = vld [vmem:[#allocation2 + $0xb0] sm:$0xff] }
  0x77   : > { %5000 = vmatpush3.bf16.msra.mxu0 %v6505_v29  ;;  %v5117_v44 = vpack.c.bf16 %v803_v40, %v802_v39  ;;  %v805_v46 = vld [vmem:[#allocation2 + $0xb8] sm:$0xff]  ;;  %v806_v49 = vld [vmem:[#allocation2 + $0xc0] sm:$0xff]  ;;  %v807_v50 = vld [vmem:[#allocation2 + $0xc8] sm:$0xff] }
  0x78   : > { %5032 = vmatpush3.bf16.msra.mxu1 %v5029_v30  ;;  %5002 = vmatprep.subr.bf16.mxu0 %v6515_v35  ;;  %v808_v52 = vld [vmem:[#allocation2 + $0xd0] sm:$0xff]  ;;  %v809_v53 = vld [vmem:[#allocation2 + $0xd8] sm:$0xff]  ;;  %v810_v57 = vld [vmem:[#allocation2 + $0xe0] sm:$0xff] }
  0x79   : > { %5034 = vmatprep.subr.bf16.mxu1 %v5033_v36  ;;  %v811_v58 = vld [vmem:[#allocation2 + $0xe8] sm:$0xff]  ;;  %v812_v61 = vld [vmem:[#allocation2 + $0xf0] sm:$0xff]  ;;  %v813_v62 = vld [vmem:[#allocation2 + $0xf8] sm:$0xff] }
  0x7a   : > { %v658_v0 = vld [vmem:[#allocation7] sm:$0xff]  ;;  %v659_v1 = vld [vmem:[#allocation7 + $0x8] sm:$0xff]  ;;  %v661_v5 = vld [vmem:[#allocation7 + $0x18] sm:$0xff] }
  0x7b   : > { %5004 = vmatpush3.bf16.msra.mxu0 %v6515_v35  ;;  %v5077_v4 = vpack.c.bf16 %v659_v1, %v658_v0  ;;  %v662_v7 = vld [vmem:[#allocation7 + $0x20] sm:$0xff]  ;;  %v663_v9 = vld [vmem:[#allocation7 + $0x28] sm:$0xff]  ;;  %v664_v11 = vld [vmem:[#allocation7 + $0x30] sm:$0xff] }
  0x7c   : > { %5036 = vmatpush3.bf16.msra.mxu1 %v5033_v36  ;;  %5006 = vmatprep.subr.bf16.mxu0 %v6525_v41  ;;  %v665_v12 = vld [vmem:[#allocation7 + $0x38] sm:$0xff]  ;;  %v666_v14 = vld [vmem:[#allocation7 + $0x40] sm:$0xff]  ;;  %v667_v15 = vld [vmem:[#allocation7 + $0x48] sm:$0xff] }
  0x7d   : > { %5038 = vmatprep.subr.bf16.mxu1 %v5037_v42  ;;  %v904_v34 = vld [vmem:[#allocation5 + $0x80] sm:$0xff]  ;;  %v906_v0 = vld [vmem:[#allocation5 + $0x90] sm:$0xff]  ;;  %v907_v1 = vld [vmem:[#allocation5 + $0x98] sm:$0xff] }
  0x7f   : > { %5008 = vmatpush3.bf16.msra.mxu0 %v6525_v41 }
  0x80   : > { %5040 = vmatpush3.bf16.msra.mxu1 %v5037_v42  ;;  %5010 = vmatprep.subr.bf16.mxu0 %v6535_v47 }
  0x81   : > { %5042 = vmatprep.subr.bf16.mxu1 %v5041_v48 }
  0x83   : > { %5012 = vmatpush3.bf16.msra.mxu0 %v6535_v47 }
  0x84   : > { %5044 = vmatpush3.bf16.msra.mxu1 %v5041_v48  ;;  %5046 = vmatprep.subr.bf16.mxu0 %v5045_v51  ;;  %v5121_v48 = vpack.c.bf16 %v805_v46, %v804_v45 }
  0x85   : > { %5078 = vmatprep.subr.bf16.mxu1 %v5077_v4 }
  0x86   : > { %4026 = vmatmul.mubr.f32.vlgmr.msra.gmra.mrb[0].mxu0 %v6541_v54 }
  0x87   : > { %4064 = vmatmul.mubr.f32.vlgmr.msra.gmra.mrb[0].mxu1 %v6541_v54  ;;  %4028 = vmatprep.mubr.f32.mxu0 %v6544_v55 }
  0x88   : > { %4066 = vmatprep.mubr.f32.mxu1 %v6544_v55  ;;  %5048 = vmatpush3.bf16.msra.mxu0 %v5045_v51  ;;  %v5125_v51 = vpack.c.bf16 %v807_v50, %v806_v49 }
  0x89   : > { %5050 = vmatprep.subr.bf16.mxu0 %v5049_v56  ;;  %5080 = vmatpush3.bf16.msra.mxu1 %v5077_v4  ;;  %v5145_v4 = vpack.c.bf16 %v907_v1, %v906_v0  ;;  %v1150_v1 = vld [vmem:[#allocation2 + $0x150] sm:$0xff] }
  0x8a   : > { %4029 = vmatmul.mubr.f32.gmra.mrb[2].mxu0 %v6550_v59 }
  0x8b   : > { %4067 = vmatmul.mubr.f32.gmra.mrb[2].mxu1 %v6550_v59 }
  0x8c   : > { %5052 = vmatpush3.bf16.msra.mxu0 %v5049_v56  ;;  %v5129_v56 = vpack.c.bf16 %v809_v53, %v808_v52 }
  0x8d   : > { %5054 = vmatprep.subr.bf16.mxu0 %v5053_v60 }
  0x90   : > { %5056 = vmatpush3.bf16.msra.mxu0 %v5053_v60  ;;  %v5133_v60 = vpack.c.bf16 %v811_v58, %v810_v57  ;;  %v6250_v58 = vmov 0  }
  0x91   : > { %5058 = vmatprep.subr.bf16.mxu0 %v5057_v63  ;;  %5891 = vset.pattern.permute.xlu0 %v6250_v58 }
  0x92   : > { %5892 = vset.pattern.permute.xlu1 %v6250_v58 }
  0x94   : > { %5060 = vmatpush3.bf16.msra.mxu0 %v5057_v63  ;;  %v5137_v63 = vpack.c.bf16 %v813_v62, %v812_v61 }
  0x95   : > { %5062 = vmatprep.subr.bf16.mxu0 %v5061_v2 }
  0x98   : > { %5064 = vmatpush3.bf16.msra.mxu0 %v5061_v2  ;;  %v660_v2 = vld [vmem:[#allocation7 + $0x10] sm:$0xff] }
  0x99   : > { %5066 = vmatprep.subr.bf16.mxu0 %v5065_v6 }
  0x9c   : > { %5068 = vmatpush3.bf16.msra.mxu0 %v5065_v6  ;;  %v5081_v6 = vpack.c.bf16 %v661_v5, %v660_v2 }
  0x9d   : > { %5070 = vmatprep.subr.bf16.mxu0 %v5069_v10 }
  0x9e   : > { %5082 = vmatprep.subr.bf16.mxu1 %v5081_v6 }
  0x9f   : > { %5084 = vmatpush3.bf16.msra.mxu1 %v5081_v6  ;;  %v908_v6 = vld [vmem:[#allocation5 + $0xa0] sm:$0xff] }
  0xa0   : > { %5072 = vmatpush3.bf16.msra.mxu0 %v5069_v10  ;;  %v5085_v10 = vpack.c.bf16 %v663_v9, %v662_v7  ;;  %v909_v7 = vld [vmem:[#allocation5 + $0xa8] sm:$0xff] }
  0xa1   : > { %5074 = vmatprep.subr.bf16.mxu0 %v5073_v13 }
  0xa2   : > { %5086 = vmatprep.subr.bf16.mxu1 %v5085_v10 }
  0xa3   : > { %5088 = vmatpush3.bf16.msra.mxu1 %v5085_v10 }
  0xa4   : > { %5076 = vmatpush3.bf16.msra.mxu0 %v5073_v13  ;;  %v5089_v13 = vpack.c.bf16 %v665_v12, %v664_v11  ;;  %v5149_v11 = vpack.c.bf16 %v909_v7, %v908_v6  ;;  %v910_v12 = vld [vmem:[#allocation5 + $0xb0] sm:$0xff]  ;;  %v1153_v6 = vld [vmem:[#allocation2 + $0x168] sm:$0xff] }
  0xa5   : > { %5110 = vmatprep.subr.bf16.mxu0 %v5109_v17 }
  0xa6   : > { %5090 = vmatprep.subr.bf16.mxu1 %v5089_v13 }
  0xa7   : > { %5092 = vmatpush3.bf16.msra.mxu1 %v5089_v13  ;;  %v911_v13 = vld [vmem:[#allocation5 + $0xb8] sm:$0xff] }
 0x159   : > { %v6555_v18 = vpop.f32.mrb[0].mxu0 }
 0x15a   : > { %v4065_v19 = vpop.f32.mrb[0].mxu1  ;;  %v6557_v20 = vpop.f32.mrb[1].mxu0  ;;  %v406_v25 = vsel %vm402_vm0, %v6555_v18, -inf }
 0x15b   : > { %v530_v21 = vpop.f32.mrb[1].mxu1  ;;  %v403_v23 = vsel %vm402_vm0, %v6557_v20, -inf }
 0x15c   : > { %5921 = vtanh.f32 %v530_v21  ;;  %404 = vmax.xlane.f32.xlu0 %v403_v23  ;;  %v669_v21 = vld [vmem:[#allocation7 + $0x58] sm:$0xff] }
 0x15d   : > { %5923 = vtanh.f32 %v4065_v19  ;;  %v6561_v24 = vpop.f32.mrb[2].mxu0  ;;  %v668_v19 = vld [vmem:[#allocation7 + $0x50] sm:$0xff] }
 0x15e   : > { %v6565_v27 = vpop.f32.mrb[3].mxu0  ;;  %v4068_v28 = vpop.f32.mrb[2].mxu1  ;;  %v412_v32 = vsel %vm402_vm0, %v6561_v24, -inf  ;;  %v5097_v23 = vpack.c.bf16 %v669_v21, %v668_v19  ;;  %v914_v21 = vld [vmem:[#allocation5 + $0xd0] sm:$0xff] }
 0x15f   : > { %v409_v30 = vsel %vm402_vm0, %v6565_v27, -inf  ;;  %5925 = vtanh.f32 %v4068_v28  ;;  %v540_v31 = vpop.f32.mrb[3].mxu1  ;;  %v671_v28 = vld [vmem:[#allocation7 + $0x68] sm:$0xff] }
 0x160   : > { %407 = vmax.xlane.f32.xlu0 %v406_v25  ;;  %410 = vmax.xlane.f32.xlu1 %v409_v30  ;;  %5927 = vtanh.f32 %v540_v31  ;;  %v670_v25 = vld [vmem:[#allocation7 + $0x60] sm:$0xff]  ;;  %v672_v30 = vld [vmem:[#allocation7 + $0x70] sm:$0xff] }
 0x161   : > { %v5101_v31 = vpack.c.bf16 %v671_v28, %v670_v25  ;;  %v916_v28 = vld [vmem:[#allocation5 + $0xe0] sm:$0xff] }
 0x164   : > { %413 = vmax.xlane.f32.xlu1 %v412_v32  ;;  %v673_v32 = vld [vmem:[#allocation7 + $0x78] sm:$0xff] }
 0x165   : > { %v5105_v33 = vpack.c.bf16 %v673_v32, %v672_v30  ;;  %v917_v30 = vld [vmem:[#allocation5 + $0xe8] sm:$0xff] }
 0x166   : > { %v5922_v36 = vpop.eup %5921  ;;  %v5165_v32 = vpack.c.bf16 %v917_v30, %v916_v28  ;;  %v6252_v28 = vmov 2   ;;  %v1010_v30 = vld [vmem:[#allocation7 + $0x80] sm:$0xff] }
 0x167   : > { %v5924_v38 = vpop.eup %5923  ;;  %4101 = vmatprep.mubr.f32.mxu0 %v5922_v36  ;;  %v905_v36 = vld [vmem:[#allocation5 + $0x88] sm:$0xff] }
 0x168   : > { %4102 = vmatmul.mubr.f32.vlgmr.msra.gmra.mrb[4].mxu0 %v5924_v38 }
 0x169   : > { %v5926_v42 = vpop.eup %5925  ;;  %5112 = vmatpush3.bf16.msra.mxu0 %v5109_v17  ;;  %v5093_v17 = vpack.c.bf16 %v667_v15, %v666_v14  ;;  %v5153_v14 = vpack.c.bf16 %v911_v13, %v910_v12  ;;  %v912_v15 = vld [vmem:[#allocation5 + $0xc0] sm:$0xff] }
 0x16a   : > { %v5928_v43 = vpop.eup %5927  ;;  %5114 = vmatprep.subr.bf16.mxu0 %v5113_v37 }
 0x16b   : > { %4104 = vmatprep.mubr.f32.mxu0 %v5928_v43  ;;  %5094 = vmatprep.subr.bf16.mxu1 %v5093_v17 }
 0x16c   : > { %4105 = vmatmul.mubr.f32.gmra.mrb[6].mxu0 %v5926_v42  ;;  %5096 = vmatpush3.bf16.msra.mxu1 %v5093_v17  ;;  %v913_v17 = vld [vmem:[#allocation5 + $0xc8] sm:$0xff] }
 0x16d   : > { %5116 = vmatpush3.bf16.msra.mxu0 %v5113_v37  ;;  %4177 = vmatprep.mubr.f32.mxu0 %v6499_v26  ;;  %v5141_v37 = vpack.c.bf16 %v905_v36, %v904_v34  ;;  %v5157_v19 = vpack.c.bf16 %v913_v17, %v912_v15  ;;  %v918_v34 = vld [vmem:[#allocation5 + $0xf0] sm:$0xff]  ;;  %v919_v36 = vld [vmem:[#allocation5 + $0xf8] sm:$0xff] }
 0x16e   : > { %5118 = vmatprep.subr.bf16.mxu0 %v5117_v44  ;;  %5098 = vmatprep.subr.bf16.mxu1 %v5097_v23 }
 0x170   : > { %5100 = vmatpush3.bf16.msra.mxu1 %v5097_v23  ;;  %v915_v23 = vld [vmem:[#allocation5 + $0xd8] sm:$0xff] }
 0x171   : > { %5120 = vmatpush3.bf16.msra.mxu0 %v5117_v44  ;;  %5102 = vmatprep.subr.bf16.mxu1 %v5101_v31  ;;  %v5161_v25 = vpack.c.bf16 %v915_v23, %v914_v21 }
 0x172   : > { %5122 = vmatprep.subr.bf16.mxu0 %v5121_v48 }
 0x174   : > { %5104 = vmatpush3.bf16.msra.mxu1 %v5101_v31 }
 0x175   : > { %5124 = vmatpush3.bf16.msra.mxu0 %v5121_v48  ;;  %5106 = vmatprep.subr.bf16.mxu1 %v5105_v33 }
 0x176   : > { %5126 = vmatprep.subr.bf16.mxu0 %v5125_v51 }
 0x178   : > { %5108 = vmatpush3.bf16.msra.mxu1 %v5105_v33 }
 0x179   : > { %5128 = vmatpush3.bf16.msra.mxu0 %v5125_v51  ;;  %5142 = vmatprep.subr.bf16.mxu1 %v5141_v37 }
 0x17a   : > { %5130 = vmatprep.subr.bf16.mxu0 %v5129_v56 }
 0x17d   : > { %5132 = vmatpush3.bf16.msra.mxu0 %v5129_v56 }
 0x17e   : > { %5134 = vmatprep.subr.bf16.mxu0 %v5133_v60 }
 0x181   : > { %5136 = vmatpush3.bf16.msra.mxu0 %v5133_v60 }
 0x182   : > { %5138 = vmatprep.subr.bf16.mxu0 %v5137_v63 }
 0x185   : > { %5140 = vmatpush3.bf16.msra.mxu0 %v5137_v63 }
 0x188   : > { %4178 = vmatmul.mubr.f32.vlgmr.msra.gmra.mrb[8].mxu0 %v6541_v54 }
 0x189   : > { %4180 = vmatprep.mubr.f32.mxu0 %v6544_v55 }
 0x18c   : > { %4181 = vmatmul.mubr.f32.gmra.mrb[10].mxu0 %v6550_v59 }
 0x1e9   : > { %v405_v38 = vpop.xlane.xlu0 %404 }
 0x1ea   : > { %v415_v39 = vsub.f32 %v6557_v20, %v405_v38  ;;  %v5169_v38 = vpack.c.bf16 %v919_v36, %v918_v34  ;;  %v1013_v34 = vld [vmem:[#allocation7 + $0x98] sm:$0xff] }
 0x1ec   : > { %v419_v40 = vmul.f32 1.442695, %v415_v39 }
 0x1ed   : > { %v408_v42 = vpop.xlane.xlu0 %407  ;;  %v411_v43 = vpop.xlane.xlu1 %410 }
 0x1ee   : > { %5929 = vpow2.f32 %v419_v40  ;;  %v416_v44 = vsub.f32 %v6555_v18, %v408_v42  ;;  %v417_v45 = vsub.f32 %v6565_v27, %v411_v43  ;;  %v1140_v40 = vld [vmem:[#allocation2 + $0x100] sm:$0xff]  ;;  %v1141_v42 = vld [vmem:[#allocation2 + $0x108] sm:$0xff] }
 0x1ef   : > { %v5205_v43 = vpack.c.bf16 %v1141_v42, %v1140_v40  ;;  %v1017_v40 = vld [vmem:[#allocation7 + $0xb8] sm:$0xff] }
 0x1f0   : > { %v421_v46 = vmul.f32 1.442695, %v416_v44  ;;  %v423_v48 = vmul.f32 1.442695, %v417_v45  ;;  %v1142_v44 = vld [vmem:[#allocation2 + $0x110] sm:$0xff]  ;;  %v1143_v45 = vld [vmem:[#allocation2 + $0x118] sm:$0xff] }
 0x1f1   : > { %v414_v49 = vpop.xlane.xlu1 %413 }
 0x1f2   : > { %5931 = vpow2.f32 %v421_v46  ;;  %v418_v50 = vsub.f32 %v6561_v24, %v414_v49 }
 0x1f3   : > { %5933 = vpow2.f32 %v423_v48  ;;  %v5209_v48 = vpack.c.bf16 %v1143_v45, %v1142_v44  ;;  %v1019_v44 = vld [vmem:[#allocation7 + $0xc8] sm:$0xff] }
 0x1f4   : > { %v425_v51 = vmul.f32 1.442695, %v418_v50  ;;  %v1144_v50 = vld [vmem:[#allocation2 + $0x120] sm:$0xff] }
 0x1f6   : > { %5935 = vpow2.f32 %v425_v51  ;;  %v1145_v51 = vld [vmem:[#allocation2 + $0x128] sm:$0xff] }
 0x1f8   : > { %v6579_v52 = vpop.eup %5929 }
 0x1f9   : > { %v427_v20 = vsel %vm402_vm0, %v6579_v52, 0.0 }
 0x1fa   : > { %428 = vadd.xlane.f32.xlu0 %v427_v20 }
 0x1fc   : > { %v6583_v53 = vpop.eup %5931 }
 0x1fd   : > { %v6585_v18 = vpop.eup %5933  ;;  %v430_v27 = vsel %vm402_vm0, %v6583_v53, 0.0 }
 0x1fe   : > { %431 = vadd.xlane.f32.xlu1 %v430_v27  ;;  %v433_v24 = vsel %vm402_vm0, %v6585_v18, 0.0 }
 0x1ff   : > { %434 = vadd.xlane.f32.xlu0 %v433_v24  ;;  %v5213_v24 = vpack.c.bf16 %v1145_v51, %v1144_v50  ;;  %v1022_v50 = vld [vmem:[#allocation7 + $0xe0] sm:$0xff]  ;;  %v1023_v51 = vld [vmem:[#allocation7 + $0xe8] sm:$0xff] }
 0x200   : > { %v6591_v56 = vpop.eup %5935 }
 0x201   : > { %v436_v57 = vsel %vm402_vm0, %v6591_v56, 0.0 }
 0x202   : > { %437 = vadd.xlane.f32.xlu1 %v436_v57  ;;  %v1146_v57 = vld [vmem:[#allocation2 + $0x130] sm:$0xff] }
 0x23b   : > { %v4103_v60 = vpop.f32.mrb[4].mxu0 }
 0x23c   : > { %v635_v61 = vpop.f32.mrb[5].mxu0 }
 0x23d   : > { %5937 = vtanh.f32 %v635_v61 }
 0x23e   : > { %5939 = vtanh.f32 %v4103_v60  ;;  %v1147_v60 = vld [vmem:[#allocation2 + $0x138] sm:$0xff] }
 0x23f   : > { %v4106_v62 = vpop.f32.mrb[6].mxu0  ;;  %v5217_v61 = vpack.c.bf16 %v1147_v60, %v1146_v57  ;;  %v1246_v60 = vld [vmem:[#allocation5 + $0x100] sm:$0xff] }
 0x240   : > { %5941 = vtanh.f32 %v4106_v62  ;;  %v645_v63 = vpop.f32.mrb[7].mxu0  ;;  %v1148_v62 = vld [vmem:[#allocation2 + $0x140] sm:$0xff] }
 0x241   : > { %5943 = vtanh.f32 %v645_v63  ;;  %v1149_v63 = vld [vmem:[#allocation2 + $0x148] sm:$0xff] }
 0x242   : > { %v5221_v0 = vpack.c.bf16 %v1149_v63, %v1148_v62 }
 0x247   : > { %v5938_v2 = vpop.eup %5937 }
 0x248   : > { %v5940_v5 = vpop.eup %5939  ;;  %4139 = vmatprep.mubr.f32.mxu1 %v5938_v2  ;;  %v1151_v2 = vld [vmem:[#allocation2 + $0x158] sm:$0xff] }
 0x249   : > { %4140 = vmatmul.mubr.f32.vlgmr.msra.gmra.mrb[4].mxu1 %v5940_v5  ;;  %v1152_v5 = vld [vmem:[#allocation2 + $0x160] sm:$0xff] }
 0x24a   : > { %v5942_v9 = vpop.eup %5941  ;;  %5144 = vmatpush3.bf16.msra.mxu1 %v5141_v37  ;;  %v5229_v7 = vpack.c.bf16 %v1153_v6, %v1152_v5 }
 0x24b   : > { %v5944_v10 = vpop.eup %5943  ;;  %5146 = vmatprep.subr.bf16.mxu1 %v5145_v4 }
 0x24c   : > { %4142 = vmatprep.mubr.f32.mxu1 %v5944_v10  ;;  %v1155_v10 = vld [vmem:[#allocation2 + $0x178] sm:$0xff] }
 0x24d   : > { %4143 = vmatmul.mubr.f32.gmra.mrb[6].mxu1 %v5942_v9  ;;  %v1154_v9 = vld [vmem:[#allocation2 + $0x170] sm:$0xff] }
 0x24e   : > { %5148 = vmatpush3.bf16.msra.mxu1 %v5145_v4  ;;  %v5225_v4 = vpack.c.bf16 %v1151_v2, %v1150_v1 }
 0x24f   : > { %5150 = vmatprep.subr.bf16.mxu1 %v5149_v11 }
 0x252   : > { %5152 = vmatpush3.bf16.msra.mxu1 %v5149_v11 }
 0x253   : > { %5154 = vmatprep.subr.bf16.mxu1 %v5153_v14 }
 0x256   : > { %5156 = vmatpush3.bf16.msra.mxu1 %v5153_v14 }
 0x257   : > { %5158 = vmatprep.subr.bf16.mxu1 %v5157_v19 }
 0x25a   : > { %5160 = vmatpush3.bf16.msra.mxu1 %v5157_v19 }
 0x25b   : > { %v4179_v31 = vpop.f32.mrb[8].mxu0  ;;  %5162 = vmatprep.subr.bf16.mxu1 %v5161_v25 }
 0x25c   : > { %v880_v33 = vpop.f32.mrb[9].mxu0 }
 0x25d   : > { %5945 = vtanh.f32 %v880_v33  ;;  %v1012_v33 = vld [vmem:[#allocation7 + $0x90] sm:$0xff] }
 0x25e   : > { %5947 = vtanh.f32 %v4179_v31  ;;  %5164 = vmatpush3.bf16.msra.mxu1 %v5161_v25  ;;  %v6251_v25 = vmov 1   ;;  %v1011_v31 = vld [vmem:[#allocation7 + $0x88] sm:$0xff]  ;;  %v5177_v36 = vpack.c.bf16 %v1013_v34, %v1012_v33  ;;  %v1258_v34 = vld [vmem:[#allocation5 + $0x160] sm:$0xff] }
 0x25f   : > { %v4182_v37 = vpop.f32.mrb[10].mxu0  ;;  %5166 = vmatprep.subr.bf16.mxu1 %v5165_v32 }
 0x260   : > { %5949 = vtanh.f32 %v4182_v37  ;;  %v890_v39 = vpop.f32.mrb[11].mxu0  ;;  %v1015_v37 = vld [vmem:[#allocation7 + $0xa8] sm:$0xff] }
 0x261   : > { %5951 = vtanh.f32 %v890_v39  ;;  %v1016_v39 = vld [vmem:[#allocation7 + $0xb0] sm:$0xff] }
 0x262   : > { %5168 = vmatpush3.bf16.msra.mxu1 %v5165_v32  ;;  %v5173_v32 = vpack.c.bf16 %v1011_v31, %v1010_v30  ;;  %v5185_v42 = vpack.c.bf16 %v1017_v40, %v1016_v39  ;;  %v1256_v31 = vld [vmem:[#allocation5 + $0x150] sm:$0xff]  ;;  %v1261_v40 = vld [vmem:[#allocation5 + $0x178] sm:$0xff] }
 0x263   : > { %5170 = vmatprep.subr.bf16.mxu1 %v5169_v38  ;;  %v1260_v39 = vld [vmem:[#allocation5 + $0x170] sm:$0xff] }
 0x264   : > { %5174 = vmatprep.subr.bf16.mxu0 %v5173_v32 }
 0x265   : > { %5176 = vmatpush3.bf16.msra.mxu0 %v5173_v32  ;;  %v1257_v32 = vld [vmem:[#allocation5 + $0x158] sm:$0xff] }
 0x266   : > { %5172 = vmatpush3.bf16.msra.mxu1 %v5169_v38  ;;  %5178 = vmatprep.subr.bf16.mxu0 %v5177_v36  ;;  %v5257_v33 = vpack.c.bf16 %v1257_v32, %v1256_v31  ;;  %v1354_v31 = vld [vmem:[#allocation7 + $0x110] sm:$0xff]  ;;  %v1355_v32 = vld [vmem:[#allocation7 + $0x118] sm:$0xff] }
 0x267   : > { %v5946_v46 = vpop.eup %5945  ;;  %5206 = vmatprep.subr.bf16.mxu1 %v5205_v43 }
 0x268   : > { %v5948_v49 = vpop.eup %5947  ;;  %4215 = vmatprep.mubr.f32.mxu1 %v5946_v46  ;;  %v1020_v46 = vld [vmem:[#allocation7 + $0xd0] sm:$0xff] }
 0x269   : > { %4216 = vmatmul.mubr.f32.vlgmr.msra.gmra.mrb[8].mxu1 %v5948_v49  ;;  %5180 = vmatpush3.bf16.msra.mxu0 %v5177_v36  ;;  %v1259_v36 = vld [vmem:[#allocation5 + $0x168] sm:$0xff] }
 0x26a   : > { %v5950_v20 = vpop.eup %5949  ;;  %5208 = vmatpush3.bf16.msra.mxu1 %v5205_v43  ;;  %v1018_v43 = vld [vmem:[#allocation7 + $0xc0] sm:$0xff] }
 0x26b   : > { %v5952_v27 = vpop.eup %5951  ;;  %5210 = vmatprep.subr.bf16.mxu1 %v5209_v48  ;;  %v5189_v45 = vpack.c.bf16 %v1019_v44, %v1018_v43  ;;  %v5265_v43 = vpack.c.bf16 %v1261_v40, %v1260_v39  ;;  %v1361_v40 = vld [vmem:[#allocation7 + $0x148] sm:$0xff] }
 0x26c   : > { %4218 = vmatprep.mubr.f32.mxu1 %v5952_v27  ;;  %v1024_v27 = vld [vmem:[#allocation7 + $0xf0] sm:$0xff] }
 0x26d   : > { %4219 = vmatmul.mubr.f32.gmra.mrb[10].mxu1 %v5950_v20  ;;  %v5197_v20 = vpack.c.bf16 %v1023_v51, %v1022_v50  ;;  %v1485_v50 = vld [vmem:[#allocation2 + $0x198] sm:$0xff] }
 0x26e   : > { %5212 = vmatpush3.bf16.msra.mxu1 %v5209_v48  ;;  %4291 = vmatprep.mubr.f32.mxu1 %v6499_v26  ;;  %v5233_v26 = vpack.c.bf16 %v1155_v10, %v1154_v9  ;;  %v1021_v48 = vld [vmem:[#allocation7 + $0xd8] sm:$0xff]  ;;  %v1248_v9 = vld [vmem:[#allocation5 + $0x110] sm:$0xff] }
 0x26f   : > { %5214 = vmatprep.subr.bf16.mxu1 %v5213_v24  ;;  %v5193_v49 = vpack.c.bf16 %v1021_v48, %v1020_v46  ;;  %v1249_v10 = vld [vmem:[#allocation5 + $0x118] sm:$0xff]  ;;  %v1483_v46 = vld [vmem:[#allocation2 + $0x188] sm:$0xff] }
 0x272   : > { %5216 = vmatpush3.bf16.msra.mxu1 %v5213_v24  ;;  %v1025_v24 = vld [vmem:[#allocation7 + $0xf8] sm:$0xff] }
 0x273   : > { %5218 = vmatprep.subr.bf16.mxu1 %v5217_v61  ;;  %v5201_v57 = vpack.c.bf16 %v1025_v24, %v1024_v27  ;;  %v1486_v24 = vld [vmem:[#allocation2 + $0x1a0] sm:$0xff] }
 0x276   : > { %5220 = vmatpush3.bf16.msra.mxu1 %v5217_v61  ;;  %v1247_v61 = vld [vmem:[#allocation5 + $0x108] sm:$0xff] }
 0x277   : > { %5222 = vmatprep.subr.bf16.mxu1 %v5221_v0  ;;  %v5237_v62 = vpack.c.bf16 %v1247_v61, %v1246_v60 }
 0x27a   : > { %5224 = vmatpush3.bf16.msra.mxu1 %v5221_v0 }
 0x27b   : > { %5226 = vmatprep.subr.bf16.mxu1 %v5225_v4 }
 0x27e   : > { %5228 = vmatpush3.bf16.msra.mxu1 %v5225_v4 }
 0x27f   : > { %5230 = vmatprep.subr.bf16.mxu1 %v5229_v7 }
 0x282   : > { %5232 = vmatpush3.bf16.msra.mxu1 %v5229_v7 }
 0x283   : > { %5234 = vmatprep.subr.bf16.mxu1 %v5233_v26 }
 0x286   : > { %5236 = vmatpush3.bf16.msra.mxu1 %v5233_v26 }
 0x287   : > { %v429_v11 = vpop.xlane.xlu0 %428 }
 0x288   : > { %5953 = vrcp.f32 %v429_v11  ;;  %v5241_v11 = vpack.c.bf16 %v1249_v10, %v1248_v9  ;;  %v1490_v9 = vld [vmem:[#allocation2 + $0x1c0] sm:$0xff]  ;;  %v1491_v10 = vld [vmem:[#allocation2 + $0x1c8] sm:$0xff] }
 0x289   : > { %4292 = vmatmul.mubr.f32.vlgmr.msra.gmra.mrb[12].mxu1 %v6541_v54 }
 0x28a   : > { %4294 = vmatprep.mubr.f32.mxu1 %v6544_v55 }
 0x28b   : > { %v432_v12 = vpop.xlane.xlu1 %431 }
 0x28c   : > { %v435_v13 = vpop.xlane.xlu0 %434  ;;  %5955 = vrcp.f32 %v432_v12 }
 0x28d   : > { %4295 = vmatmul.mubr.f32.gmra.mrb[14].mxu1 %v6550_v59  ;;  %5957 = vrcp.f32 %v435_v13  ;;  %v1250_v13 = vld [vmem:[#allocation5 + $0x120] sm:$0xff] }
 0x28f   : > { %v438_v15 = vpop.xlane.xlu1 %437 }
 0x290   : > { %5959 = vrcp.f32 %v438_v15 }
 0x292   : > { %v5954_v14 = vpop.eup %5953 }
 0x293   : > { %v440_v17 = vmul.f32 %v5954_v14, %v6579_v52  ;;  %v1251_v14 = vld [vmem:[#allocation5 + $0x128] sm:$0xff] }
 0x295   : > { %771 = vperm.xlu0 %5891, %v440_v17  }
 0x296   : > { %v5956_v19 = vpop.eup %5955 }
 0x297   : > { %v5958_v21 = vpop.eup %5957  ;;  %v442_v23 = vmul.f32 %v5956_v19, %v6583_v53  ;;  %v5245_v19 = vpack.c.bf16 %v1251_v14, %v1250_v13  ;;  %v1494_v14 = vld [vmem:[#allocation2 + $0x1e0] sm:$0xff] }
 0x298   : > { %v6604_v54 = vmul.f32 %v5958_v21, %v6585_v18  ;;  %v6253_v18 = vmov 3   ;;  %v1252_v21 = vld [vmem:[#allocation5 + $0x130] sm:$0xff] }
 0x299   : > { %5902 = vset.pattern.permute.xlu0 %v6251_v25  ;;  %776 = vperm.xlu1 %5892, %v442_v23  }
 0x29a   : > { %1124 = vperm.xlu0 %5902, %v6604_v54   ;;  %v5960_v52 = vpop.eup %5959 }
 0x29b   : > { %v446_v53 = vmul.f32 %v5960_v52, %v6591_v56  ;;  %v1014_v56 = vld [vmem:[#allocation7 + $0xa0] sm:$0xff] }
 0x29c   : > { %v5181_v38 = vpack.c.bf16 %v1015_v37, %v1014_v56  ;;  %v1254_v52 = vld [vmem:[#allocation5 + $0x140] sm:$0xff]  ;;  %v5261_v37 = vpack.c.bf16 %v1259_v36, %v1258_v34  ;;  %v1357_v36 = vld [vmem:[#allocation7 + $0x128] sm:$0xff] }
 0x29d   : > { %5893 = vset.pattern.permute.xlu1 %v6251_v25  ;;  %v1356_v34 = vld [vmem:[#allocation7 + $0x120] sm:$0xff] }
 0x29e   : > { %5903 = vset.pattern.permute.xlu0 %v6252_v28  ;;  %1120 = vperm.xlu1 %5893, %v442_v23  }
 0x29f   : > { %1466 = vperm.xlu0 %5903, %v6604_v54   ;;  %5182 = vmatprep.subr.bf16.mxu0 %v5181_v38 }
 0x2a0   : > { %5184 = vmatpush3.bf16.msra.mxu0 %v5181_v38 }
 0x2a1   : > { %5186 = vmatprep.subr.bf16.mxu0 %v5185_v42 }
 0x2a2   : > { %5894 = vset.pattern.permute.xlu1 %v6252_v28 }
 0x2a3   : > { %5905 = vset.pattern.permute.xlu0 %v6253_v18  ;;  %1462 = vperm.xlu1 %5894, %v442_v23  }
 0x2a4   : > { %1812 = vperm.xlu0 %5905, %v446_v53   ;;  %5188 = vmatpush3.bf16.msra.mxu0 %v5185_v42 }
 0x2a5   : > { %5190 = vmatprep.subr.bf16.mxu0 %v5189_v45 }
 0x2a7   : > { %5895 = vset.pattern.permute.xlu1 %v6251_v25 }
 0x2a8   : > { %1116 = vperm.xlu1 %5895, %v440_v17   ;;  %5906 = vset.pattern.permute.xlu0 %v6250_v58 }
 0x2a9   : > { %5192 = vmatpush3.bf16.msra.mxu0 %v5189_v45  ;;  %v1482_v45 = vld [vmem:[#allocation2 + $0x180] sm:$0xff] }
 0x2aa   : > { %5194 = vmatprep.subr.bf16.mxu0 %v5193_v49  ;;  %v5301_v48 = vpack.c.bf16 %v1483_v46, %v1482_v45  ;;  %v1364_v45 = vld [vmem:[#allocation7 + $0x160] sm:$0xff]  ;;  %v1365_v46 = vld [vmem:[#allocation7 + $0x168] sm:$0xff] }
 0x2ac   : > { %5896 = vset.pattern.permute.xlu1 %v6252_v28 }
 0x2ad   : > { %1458 = vperm.xlu1 %5896, %v440_v17   ;;  %5196 = vmatpush3.bf16.msra.mxu0 %v5193_v49  ;;  %v1484_v49 = vld [vmem:[#allocation2 + $0x190] sm:$0xff] }
 0x2ae   : > { %5198 = vmatprep.subr.bf16.mxu0 %v5197_v20 }
 0x2b1   : > { %5897 = vset.pattern.permute.xlu1 %v6253_v18  ;;  %5200 = vmatpush3.bf16.msra.mxu0 %v5197_v20  ;;  %v5305_v20 = vpack.c.bf16 %v1485_v50, %v1484_v49  ;;  %v1366_v49 = vld [vmem:[#allocation7 + $0x170] sm:$0xff]  ;;  %v1367_v50 = vld [vmem:[#allocation7 + $0x178] sm:$0xff] }
 0x2b2   : > { %1800 = vperm.xlu1 %5897, %v440_v17   ;;  %5202 = vmatprep.subr.bf16.mxu0 %v5201_v57 }
 0x2b5   : > { %5204 = vmatpush3.bf16.msra.mxu0 %v5201_v57  ;;  %v1487_v57 = vld [vmem:[#allocation2 + $0x1a8] sm:$0xff] }
 0x2b6   : > { %1804 = vperm.xlu1 %5897, %v442_v23   ;;  %5238 = vmatprep.subr.bf16.mxu0 %v5237_v62  ;;  %v1253_v23 = vld [vmem:[#allocation5 + $0x138] sm:$0xff] }
 0x2ba   : > { %5898 = vset.pattern.permute.xlu1 %v6250_v58 }
 0x2bb   : > { %786 = vperm.xlu1 %5898, %v446_v53  }
 0x2bf   : > { %5899 = vset.pattern.permute.xlu1 %v6251_v25 }
 0x2c0   : > { %1128 = vperm.xlu1 %5899, %v446_v53  }
 0x2c4   : > { %5900 = vset.pattern.permute.xlu1 %v6252_v28 }
 0x2c5   : > { %1470 = vperm.xlu1 %5900, %v446_v53   ;;  %v1255_v53 = vld [vmem:[#allocation5 + $0x148] sm:$0xff] }
 0x2c6   : > { %v5253_v30 = vpack.c.bf16 %v1255_v53, %v1254_v52  ;;  %v1352_v52 = vld [vmem:[#allocation7 + $0x100] sm:$0xff]  ;;  %v1353_v53 = vld [vmem:[#allocation7 + $0x108] sm:$0xff] }
 0x2c9   : > { %5901 = vset.pattern.permute.xlu1 %v6250_v58 }
 0x2ca   : > { %781 = vperm.xlu1 %5901, %v6604_v54  }
 0x2ce   : > { %5904 = vset.pattern.permute.xlu1 %v6253_v18 }
 0x2cf   : > { %1808 = vperm.xlu1 %5904, %v6604_v54   ;;  %v5249_v54 = vpack.c.bf16 %v1253_v23, %v1252_v21  ;;  %v1497_v21 = vld [vmem:[#allocation2 + $0x1f8] sm:$0xff] }
 0x2d3   : > { %5907 = vset.pattern.permute.xlu1 %v6251_v25 }
 0x31c   : > { %v6626_v63 = vpop.f32.mrb[4].mxu1 }
 0x31d   : > { %v6628_v0 = vpop.f32.mrb[5].mxu1 }
 0x320   : > { %v6630_v1 = vpop.f32.mrb[6].mxu1 }
 0x321   : > { %v6632_v2 = vpop.f32.mrb[7].mxu1 }
 0x33c   : > { %v4217_v4 = vpop.f32.mrb[8].mxu1 }
 0x33d   : > { %v986_v5 = vpop.f32.mrb[9].mxu1 }
 0x33e   : > { %5961 = vtanh.f32 %v986_v5  ;;  %v1489_v5 = vld [vmem:[#allocation2 + $0x1b8] sm:$0xff] }
 0x33f   : > { %5963 = vtanh.f32 %v4217_v4  ;;  %v1488_v4 = vld [vmem:[#allocation2 + $0x1b0] sm:$0xff] }
 0x340   : > { %v4220_v6 = vpop.f32.mrb[10].mxu1 }
 0x341   : > { %5965 = vtanh.f32 %v4220_v6  ;;  %v996_v7 = vpop.f32.mrb[11].mxu1  ;;  %v6635_v6 = vld [vmem:[%s6486_s12] sm:$0xff] }
 0x342   : > { %5967 = vtanh.f32 %v996_v7  ;;  %v5313_v7 = vpack.c.bf16 %v1489_v5, %v1488_v4 }
 0x348   : > { %v5962_v26 = vpop.eup %5961 }
 0x349   : > { %v5964_v12 = vpop.eup %5963  ;;  %4253 = vmatprep.mubr.f32.mxu0 %v5962_v26  ;;  %v5317_v26 = vpack.c.bf16 %v1491_v10, %v1490_v9  ;;  %v6658_v10 = vld [vmem:[%s6993_s5] ss:$0 sm:$0xff] }
 0x34a   : > { %4254 = vmatmul.mubr.f32.vlgmr.msra.gmra.mrb[12].mxu0 %v5964_v12  ;;  %v1493_v12 = vld [vmem:[#allocation2 + $0x1d8] sm:$0xff] }
 0x34b   : > { %v5966_v15 = vpop.eup %5965  ;;  %5240 = vmatpush3.bf16.msra.mxu0 %v5237_v62  ;;  %v5309_v62 = vpack.c.bf16 %v1487_v57, %v1486_v24  ;;  %v777_v57 = vpop.permute.xlu1 %776 }
 0x34c   : > { %v5968_v17 = vpop.eup %5967  ;;  %5242 = vmatprep.subr.bf16.mxu0 %v5241_v11 }
 0x34d   : > { %4256 = vmatprep.mubr.f32.mxu0 %v5968_v17 }
 0x34e   : > { %4257 = vmatmul.mubr.f32.gmra.mrb[14].mxu0 %v5966_v15  ;;  %v1495_v15 = vld [vmem:[#allocation2 + $0x1e8] sm:$0xff] }
 0x34f   : > { %5244 = vmatpush3.bf16.msra.mxu0 %v5241_v11  ;;  %v1492_v11 = vld [vmem:[#allocation2 + $0x1d0] sm:$0xff]  ;;  %v5325_v17 = vpack.c.bf16 %v1495_v15, %v1494_v14 }
 0x350   : > { %5246 = vmatprep.subr.bf16.mxu0 %v5245_v19  ;;  %v5321_v13 = vpack.c.bf16 %v1493_v12, %v1492_v11  ;;  %v752_v11 = vadd.f32 %v6626_v63, %v6658_v10  ;;  %v747_v12 = vadd.f32 %v6658_v10, %v6628_v0  ;;  %v762_v63 = vadd.f32 %v6630_v1, %v6658_v10 }
 0x351   : > { %v757_v0 = vadd.f32 %v6658_v10, %v6632_v2 }
 0x353   : > { %5248 = vmatpush3.bf16.msra.mxu0 %v5245_v19  ;;  %v1496_v19 = vld [vmem:[#allocation2 + $0x1f0] sm:$0xff] }
 0x354   : > { %5250 = vmatprep.subr.bf16.mxu0 %v5249_v54  ;;  %v5329_v23 = vpack.c.bf16 %v1497_v21, %v1496_v19  ;;  %v765_v21 = vmul.f32 %v6635_v6, %v747_v12  ;;  %v1591_v12 = vld [vmem:[#allocation5 + $0x198] sm:$0xff] }
 0x357   : > { %5252 = vmatpush3.bf16.msra.mxu0 %v5249_v54  ;;  %v6639_v54 = vld [vmem:[%s6486_s12 + $0x8] sm:$0xff] }
 0x358   : > { %5254 = vmatprep.subr.bf16.mxu0 %v5253_v30  ;;  %v766_v14 = vmul.f32 %v6639_v54, %v752_v11  ;;  %v1590_v11 = vld [vmem:[#allocation5 + $0x190] sm:$0xff] }
 0x35b   : > { %5256 = vmatpush3.bf16.msra.mxu0 %v5253_v30  ;;  %v5269_v30 = vpack.c.bf16 %v1353_v53, %v1352_v52  ;;  %v772_v52 = vpop.permute.xlu0 %771 }
 0x35c   : > { %v4293_v56 = vpop.f32.mrb[12].mxu1  ;;  %5258 = vmatprep.subr.bf16.mxu0 %v5257_v33 }
 0x35d   : > { %v1222_v38 = vpop.f32.mrb[13].mxu1  ;;  %5270 = vmatprep.subr.bf16.mxu1 %v5269_v30 }
 0x35e   : > { %5969 = vtanh.f32 %v1222_v38  ;;  %5272 = vmatpush3.bf16.msra.mxu1 %v5269_v30  ;;  %v1359_v38 = vld [vmem:[#allocation7 + $0x138] sm:$0xff] }
 0x35f   : > { %5971 = vtanh.f32 %v4293_v56  ;;  %5260 = vmatpush3.bf16.msra.mxu0 %v5257_v33  ;;  %v5273_v33 = vpack.c.bf16 %v1355_v32, %v1354_v31  ;;  %v5277_v56 = vpack.c.bf16 %v1357_v36, %v1356_v34  ;;  %v790_v32 = vmul.f32 %v777_v57, %v766_v14 }
 0x360   : > { %v4296_v42 = vpop.f32.mrb[14].mxu1  ;;  %5262 = vmatprep.subr.bf16.mxu0 %v5261_v37  ;;  %v5337_v14 = vpack.c.bf16 %v1591_v12, %v1590_v11  ;;  %v1702_v11 = vld [vmem:[#allocation7 + $0x1c0] sm:$0xff]  ;;  %v1703_v12 = vld [vmem:[#allocation7 + $0x1c8] sm:$0xff] }
 0x361   : > { %5973 = vtanh.f32 %v4296_v42  ;;  %v1232_v44 = vpop.f32.mrb[15].mxu1  ;;  %5274 = vmatprep.subr.bf16.mxu1 %v5273_v33  ;;  %v1362_v42 = vld [vmem:[#allocation7 + $0x150] sm:$0xff] }
 0x362   : > { %5975 = vtanh.f32 %v1232_v44  ;;  %5276 = vmatpush3.bf16.msra.mxu1 %v5273_v33 }
 0x363   : > { %5264 = vmatpush3.bf16.msra.mxu0 %v5261_v37  ;;  %v1358_v37 = vld [vmem:[#allocation7 + $0x130] sm:$0xff]  ;;  %5278 = vmatprep.subr.bf16.mxu1 %v5277_v56 }
 0x364   : > { %5266 = vmatprep.subr.bf16.mxu0 %v5265_v43  ;;  %v5281_v39 = vpack.c.bf16 %v1359_v38, %v1358_v37 }
 0x366   : > { %5280 = vmatpush3.bf16.msra.mxu1 %v5277_v56  ;;  %v789_v56 = vmul.f32 %v772_v52, %v765_v21  ;;  %v1594_v52 = vld [vmem:[#allocation5 + $0x1b0] sm:$0xff] }
 0x367   : > { %5268 = vmatpush3.bf16.msra.mxu0 %v5265_v43  ;;  %5282 = vmatprep.subr.bf16.mxu1 %v5281_v39  ;;  %v1363_v43 = vld [vmem:[#allocation7 + $0x158] sm:$0xff] }
 0x368   : > { %v5970_v51 = vpop.eup %5969  ;;  %5302 = vmatprep.subr.bf16.mxu0 %v5301_v48  ;;  %v5289_v44 = vpack.c.bf16 %v1363_v43, %v1362_v42 }
 0x369   : > { %v5972_v27 = vpop.eup %5971  ;;  %4329 = vmatprep.mubr.f32.mxu0 %v5970_v51  ;;  %v5297_v51 = vpack.c.bf16 %v1367_v50, %v1366_v49 }
 0x36a   : > { %4330 = vmatmul.mubr.f32.vlgmr.msra.gmra.mrb[16].mxu0 %v5972_v27  ;;  %5284 = vmatpush3.bf16.msra.mxu1 %v5281_v39  ;;  %v1589_v27 = vld [vmem:[#allocation5 + $0x188] sm:$0xff]  ;;  %v6679_v39 = vld [vmem:[%s6486_s12 + $0x18] sm:$0xff] }
 0x36b   : > { %v5974_v60 = vpop.eup %5973  ;;  %5304 = vmatpush3.bf16.msra.mxu0 %v5301_v48  ;;  %v5293_v48 = vpack.c.bf16 %v1365_v46, %v1364_v45  ;;  %v768_v1 = vmul.f32 %v6679_v39, %v762_v63  ;;  %v1125_v45 = vpop.permute.xlu0 %1124  ;;  %v1595_v63 = vld [vmem:[#allocation5 + $0x1b8] sm:$0xff] }
 0x36c   : > { %v5976_v61 = vpop.eup %5975  ;;  %5306 = vmatprep.subr.bf16.mxu0 %v5305_v20 }
 0x36d   : > { %4332 = vmatprep.mubr.f32.mxu0 %v5976_v61 }
 0x36e   : > { %4333 = vmatmul.mubr.f32.gmra.mrb[18].mxu0 %v5974_v60  ;;  %v1121_v60 = vpop.permute.xlu1 %1120 }
 0x36f   : > { %5308 = vmatpush3.bf16.msra.mxu0 %v5305_v20  ;;  %4405 = vmatprep.mubr.f32.mxu0 %v6635_v6  ;;  %v1588_v20 = vld [vmem:[#allocation5 + $0x180] sm:$0xff] }
 0x370   : > { %5310 = vmatprep.subr.bf16.mxu0 %v5309_v62  ;;  %v6644_v24 = vpack.c.bf16 %v1589_v27, %v1588_v20 }
 0x372   : > { %v6647_v61 = vpop.permute.xlu1 %1462 }
 0x373   : > { %5312 = vmatpush3.bf16.msra.mxu0 %v5309_v62 }
 0x374   : > { %5314 = vmatprep.subr.bf16.mxu0 %v5313_v7 }
 0x376   : > { %v1117_v62 = vpop.permute.xlu1 %1116 }
 0x377   : > { %5316 = vmatpush3.bf16.msra.mxu0 %v5313_v7 }
 0x378   : > { %5318 = vmatprep.subr.bf16.mxu0 %v5317_v26 }
 0x37a   : > { %v6649_v4 = vpop.permute.xlu1 %1458 }
 0x37b   : > { %5320 = vmatpush3.bf16.msra.mxu0 %v5317_v26 }
 0x37c   : > { %5322 = vmatprep.subr.bf16.mxu0 %v5321_v13 }
 0x37e   : > { %v6651_v5 = vpop.permute.xlu1 %1800 }
 0x37f   : > { %5324 = vmatpush3.bf16.msra.mxu0 %v5321_v13 }
 0x380   : > { %5326 = vmatprep.subr.bf16.mxu0 %v5325_v17 }
 0x382   : > { %v6653_v7 = vpop.permute.xlu1 %1804 }
 0x383   : > { %5328 = vmatpush3.bf16.msra.mxu0 %v5325_v17 }
 0x384   : > { %5330 = vmatprep.subr.bf16.mxu0 %v5329_v23 }
 0x386   : > { %v787_v9 = vpop.permute.xlu1 %786 }
 0x387   : > { %5332 = vmatpush3.bf16.msra.mxu0 %v5329_v23  ;;  %v792_v46 = vmul.f32 %v787_v9, %v768_v1  ;;  %v1602_v1 = vld [vmem:[#allocation5 + $0x1f0] sm:$0xff] }
 0x38a   : > { %4406 = vmatmul.mubr.f32.vlgmr.msra.gmra.mrb[20].mxu0 %v6639_v54  ;;  %v1129_v26 = vpop.permute.xlu1 %1128 }
 0x38b   : > { %4408 = vmatprep.mubr.f32.mxu0 %v6544_v55  ;;  %v1360_v55 = vld [vmem:[#allocation7 + $0x140] sm:$0xff] }
 0x38e   : > { %4409 = vmatmul.mubr.f32.gmra.mrb[22].mxu0 %v6550_v59  ;;  %v5285_v59 = vpack.c.bf16 %v1361_v40, %v1360_v55  ;;  %v6665_v15 = vpop.permute.xlu1 %1470 }
 0x390   : > { %5286 = vmatprep.subr.bf16.mxu1 %v5285_v59 }
 0x391   : > { %5288 = vmatpush3.bf16.msra.mxu1 %v5285_v59  ;;  %v6686_v59 = vld [vmem:[%s6486_s12 + $0x10] sm:$0xff] }
 0x392   : > { %5290 = vmatprep.subr.bf16.mxu1 %v5289_v44  ;;  %v782_v55 = vpop.permute.xlu1 %781  ;;  %v767_v42 = vmul.f32 %v6686_v59, %v757_v0  ;;  %v1596_v0 = vld [vmem:[#allocation5 + $0x1c0] sm:$0xff] }
 0x394   : > { %v791_v49 = vmul.f32 %v782_v55, %v767_v42  ;;  %v1603_v55 = vld [vmem:[#allocation5 + $0x1f8] sm:$0xff] }
 0x395   : > { %5292 = vmatpush3.bf16.msra.mxu1 %v5289_v44  ;;  %v5361_v42 = vpack.c.bf16 %v1603_v55, %v1602_v1 }
 0x396   : > { %5294 = vmatprep.subr.bf16.mxu1 %v5293_v48 }
 0x399   : > { %5296 = vmatpush3.bf16.msra.mxu1 %v5293_v48 }
 0x39a   : > { %5298 = vmatprep.subr.bf16.mxu1 %v5297_v51 }
 0x39d   : > { %5300 = vmatpush3.bf16.msra.mxu1 %v5297_v51 }
 0x39e   : > { %5334 = vmatprep.subr.bf16.mxu1 %v6644_v24 }
 0x41d   : > { %v4255_v13 = vpop.f32.mrb[12].mxu0 }
 0x41e   : > { %v1098_v17 = vadd.f32 %v4255_v13, %v6658_v10  ;;  %v1092_v19 = vpop.f32.mrb[13].mxu0 }
 0x41f   : > { %v1093_v23 = vadd.f32 %v6658_v10, %v1092_v19 }
 0x420   : > { %v1112_v53 = vmul.f32 %v6639_v54, %v1098_v17  ;;  %v1593_v17 = vld [vmem:[#allocation5 + $0x1a8] sm:$0xff] }
 0x421   : > { %v1111_v30 = vmul.f32 %v6635_v6, %v1093_v23  ;;  %v4258_v31 = vpop.f32.mrb[14].mxu0 }
 0x422   : > { %v1132_v33 = vmul.f32 %v1121_v60, %v1112_v53  ;;  %v1108_v34 = vadd.f32 %v4258_v31, %v6658_v10  ;;  %v1102_v36 = vpop.f32.mrb[15].mxu0  ;;  %v5345_v53 = vpack.c.bf16 %v1595_v63, %v1594_v52  ;;  %v1959_v63 = vld [vmem:[#allocation2 + $0x200] sm:$0xff] }
 0x423   : > { %v1131_v37 = vmul.f32 %v1117_v62, %v1111_v30  ;;  %v1103_v38 = vadd.f32 %v6658_v10, %v1102_v36  ;;  %v1597_v30 = vld [vmem:[#allocation5 + $0x1c8] sm:$0xff] }
 0x424   : > { %v6682_v40 = vadd.f32 %v1132_v33, %v790_v32  ;;  %v1114_v2 = vmul.f32 %v6679_v39, %v1108_v34  ;;  %v5349_v31 = vpack.c.bf16 %v1597_v30, %v1596_v0  ;;  %v1598_v32 = vld [vmem:[#allocation5 + $0x1d0] sm:$0xff]  ;;  %v1599_v33 = vld [vmem:[#allocation5 + $0x1d8] sm:$0xff]  ;;  %v1600_v34 = vld [vmem:[#allocation5 + $0x1e0] sm:$0xff] }
 0x425   : > { %v6689_v43 = vadd.f32 %v1131_v37, %v789_v56  ;;  %v1113_v44 = vmul.f32 %v6686_v59, %v1103_v38  ;;  %v1601_v36 = vld [vmem:[#allocation5 + $0x1e8] sm:$0xff] }
 0x426   : > { %v1134_v48 = vmul.f32 %v1129_v26, %v1114_v2  ;;  %v1592_v26 = vld [vmem:[#allocation5 + $0x1a0] sm:$0xff]  ;;  %v5357_v37 = vpack.c.bf16 %v1601_v36, %v1600_v34 }
 0x427   : > { %v1133_v50 = vmul.f32 %v1125_v45, %v1113_v44  ;;  %v5341_v23 = vpack.c.bf16 %v1593_v17, %v1592_v26  ;;  %v1706_v26 = vld [vmem:[#allocation7 + $0x1e0] sm:$0xff]  ;;  %v1707_v17 = vld [vmem:[#allocation7 + $0x1e8] sm:$0xff] }
 0x428   : > { %v6692_v51 = vadd.f32 %v1134_v48, %v792_v46 }
 0x429   : > { %v6694_v20 = vadd.f32 %v1133_v50, %v791_v49  ;;  %v1697_v50 = vld [vmem:[#allocation7 + $0x198] sm:$0xff] }
 0x43d   : > { %v4331_v27 = vpop.f32.mrb[16].mxu0 }
 0x43e   : > { %v1328_v57 = vpop.f32.mrb[17].mxu0 }
 0x43f   : > { %5977 = vtanh.f32 %v1328_v57  ;;  %v1698_v57 = vld [vmem:[#allocation7 + $0x1a0] sm:$0xff] }
 0x440   : > { %5979 = vtanh.f32 %v4331_v27 }
 0x441   : > { %v4334_v60 = vpop.f32.mrb[18].mxu0 }
 0x442   : > { %5981 = vtanh.f32 %v4334_v60  ;;  %v1338_v62 = vpop.f32.mrb[19].mxu0  ;;  %v1700_v60 = vld [vmem:[#allocation7 + $0x1b0] sm:$0xff] }
 0x443   : > { %5983 = vtanh.f32 %v1338_v62  ;;  %v1701_v62 = vld [vmem:[#allocation7 + $0x1b8] sm:$0xff] }
 0x449   : > { %v5978_v13 = vpop.eup %5977 }
 0x44a   : > { %v5980_v9 = vpop.eup %5979  ;;  %4367 = vmatprep.mubr.f32.mxu1 %v5978_v13  ;;  %v1704_v13 = vld [vmem:[#allocation7 + $0x1d0] sm:$0xff] }
 0x44b   : > { %4368 = vmatmul.mubr.f32.vlgmr.msra.gmra.mrb[16].mxu1 %v5980_v9 }
 0x44c   : > { %v5982_v19 = vpop.eup %5981  ;;  %5336 = vmatpush3.bf16.msra.mxu1 %v6644_v24  ;;  %v5353_v24 = vpack.c.bf16 %v1599_v33, %v1598_v32 }
 0x44d   : > { %v5984_v21 = vpop.eup %5983  ;;  %5338 = vmatprep.subr.bf16.mxu1 %v5337_v14 }
 0x44e   : > { %4370 = vmatprep.mubr.f32.mxu1 %v5984_v21  ;;  %v1708_v21 = vld [vmem:[#allocation7 + $0x1f0] sm:$0xff] }
 0x44f   : > { %4371 = vmatmul.mubr.f32.gmra.mrb[18].mxu1 %v5982_v19  ;;  %v5389_v19 = vpack.c.bf16 %v1707_v17, %v1706_v26  ;;  %v1971_v26 = vld [vmem:[#allocation2 + $0x260] sm:$0xff]  ;;  %v1972_v17 = vld [vmem:[#allocation2 + $0x268] sm:$0xff] }
 0x450   : > { %5340 = vmatpush3.bf16.msra.mxu1 %v5337_v14  ;;  %v1705_v14 = vld [vmem:[#allocation7 + $0x1d8] sm:$0xff] }
 0x451   : > { %5342 = vmatprep.subr.bf16.mxu1 %v5341_v23  ;;  %v5385_v9 = vpack.c.bf16 %v1705_v14, %v1704_v13  ;;  %v1969_v13 = vld [vmem:[#allocation2 + $0x250] sm:$0xff]  ;;  %v1970_v14 = vld [vmem:[#allocation2 + $0x258] sm:$0xff] }
 0x454   : > { %5344 = vmatpush3.bf16.msra.mxu1 %v5341_v23  ;;  %v1709_v23 = vld [vmem:[#allocation7 + $0x1f8] sm:$0xff] }
 0x455   : > { %5346 = vmatprep.subr.bf16.mxu1 %v5345_v53  ;;  %v5393_v52 = vpack.c.bf16 %v1709_v23, %v1708_v21  ;;  %v1973_v21 = vld [vmem:[#allocation2 + $0x270] sm:$0xff]  ;;  %v1974_v23 = vld [vmem:[#allocation2 + $0x278] sm:$0xff] }
 0x458   : > { %5348 = vmatpush3.bf16.msra.mxu1 %v5345_v53  ;;  %v1960_v53 = vld [vmem:[#allocation2 + $0x208] sm:$0xff] }
 0x459   : > { %5350 = vmatprep.subr.bf16.mxu1 %v5349_v31  ;;  %v5429_v0 = vpack.c.bf16 %v1960_v53, %v1959_v63  ;;  %v2065_v63 = vld [vmem:[#allocation5 + $0x200] sm:$0xff]  ;;  %v2066_v53 = vld [vmem:[#allocation5 + $0x208] sm:$0xff] }
 0x45c   : > { %5352 = vmatpush3.bf16.msra.mxu1 %v5349_v31 }
 0x45d   : > { %v4407_v56 = vpop.f32.mrb[20].mxu0  ;;  %5354 = vmatprep.subr.bf16.mxu1 %v5353_v24 }
 0x45e   : > { %v1564_v38 = vpop.f32.mrb[21].mxu0 }
 0x45f   : > { %5985 = vtanh.f32 %v1564_v38 }
 0x460   : > { %5987 = vtanh.f32 %v4407_v56  ;;  %5356 = vmatpush3.bf16.msra.mxu1 %v5353_v24 }
 0x461   : > { %v4410_v2 = vpop.f32.mrb[22].mxu0  ;;  %5358 = vmatprep.subr.bf16.mxu1 %v5357_v37 }
 0x462   : > { %5989 = vtanh.f32 %v4410_v2  ;;  %v1574_v44 = vpop.f32.mrb[23].mxu0 }
 0x463   : > { %5991 = vtanh.f32 %v1574_v44 }
 0x464   : > { %5360 = vmatpush3.bf16.msra.mxu1 %v5357_v37 }
 0x465   : > { %5362 = vmatprep.subr.bf16.mxu1 %v5361_v42 }
 0x468   : > { %5364 = vmatpush3.bf16.msra.mxu1 %v5361_v42 }
 0x469   : > { %v5986_v45 = vpop.eup %5985  ;;  %5398 = vmatprep.subr.bf16.mxu1 %v6456_v3 }
 0x46a   : > { %v5988_v46 = vpop.eup %5987  ;;  %4443 = vmatprep.mubr.f32.mxu1 %v5986_v45 }
 0x46b   : > { %4444 = vmatmul.mubr.f32.vlgmr.msra.gmra.mrb[20].mxu1 %v5988_v46  ;;  %v1467_v46 = vpop.permute.xlu0 %1466 }
 0x46c   : > { %v5990_v48 = vpop.eup %5989  ;;  %5400 = vmatpush3.bf16.msra.mxu1 %v6456_v3  ;;  %v1694_v3 = vld [vmem:[#allocation7 + $0x180] sm:$0xff] }
 0x46d   : > { %v5992_v49 = vpop.eup %5991  ;;  %5402 = vmatprep.subr.bf16.mxu1 %v6464_v8 }
 0x46e   : > { %4446 = vmatprep.mubr.f32.mxu1 %v5992_v49 }
 0x46f   : > { %4447 = vmatmul.mubr.f32.gmra.mrb[22].mxu1 %v5990_v48 }
 0x470   : > { %5404 = vmatpush3.bf16.msra.mxu1 %v6464_v8  ;;  %v1695_v8 = vld [vmem:[#allocation7 + $0x188] sm:$0xff] }
 0x471   : > { %5406 = vmatprep.subr.bf16.mxu1 %v6475_v16 }
 0x474   : > { %5408 = vmatpush3.bf16.msra.mxu1 %v6475_v16  ;;  %v5365_v16 = vpack.c.bf16 %v1695_v8, %v1694_v3 }
 0x475   : > { %5410 = vmatprep.subr.bf16.mxu1 %v6490_v22 }
 0x476   : > { %5366 = vmatprep.subr.bf16.mxu0 %v5365_v16 }
 0x477   : > { %5368 = vmatpush3.bf16.msra.mxu0 %v5365_v16  ;;  %v1961_v16 = vld [vmem:[#allocation2 + $0x210] sm:$0xff] }
 0x478   : > { %5412 = vmatpush3.bf16.msra.mxu1 %v6490_v22  ;;  %v1696_v22 = vld [vmem:[#allocation7 + $0x190] sm:$0xff] }
 0x479   : > { %5414 = vmatprep.subr.bf16.mxu1 %v6505_v29  ;;  %v5369_v27 = vpack.c.bf16 %v1697_v50, %v1696_v22  ;;  %v1962_v22 = vld [vmem:[#allocation2 + $0x218] sm:$0xff] }
 0x47b   : > { %5370 = vmatprep.subr.bf16.mxu0 %v5369_v27 }
 0x47c   : > { %5416 = vmatpush3.bf16.msra.mxu1 %v6505_v29  ;;  %v1699_v29 = vld [vmem:[#allocation7 + $0x1a8] sm:$0xff]  ;;  %5372 = vmatpush3.bf16.msra.mxu0 %v5369_v27  ;;  %v5433_v27 = vpack.c.bf16 %v1962_v22, %v1961_v16 }
 0x47d   : > { %5418 = vmatprep.subr.bf16.mxu1 %v6515_v35 }
 0x480   : > { %5420 = vmatpush3.bf16.msra.mxu1 %v6515_v35  ;;  %v5373_v35 = vpack.c.bf16 %v1699_v29, %v1698_v57  ;;  %v1963_v57 = vld [vmem:[#allocation2 + $0x220] sm:$0xff] }
 0x481   : > { %5422 = vmatprep.subr.bf16.mxu1 %v6525_v41 }
 0x482   : > { %5374 = vmatprep.subr.bf16.mxu0 %v5373_v35 }
 0x483   : > { %5376 = vmatpush3.bf16.msra.mxu0 %v5373_v35 }
 0x484   : > { %5424 = vmatpush3.bf16.msra.mxu1 %v6525_v41  ;;  %v5377_v41 = vpack.c.bf16 %v1701_v62, %v1700_v60  ;;  %v1965_v60 = vld [vmem:[#allocation2 + $0x230] sm:$0xff]  ;;  %v1966_v62 = vld [vmem:[#allocation2 + $0x238] sm:$0xff] }
 0x485   : > { %5426 = vmatprep.subr.bf16.mxu1 %v6535_v47 }
 0x486   : > { %5378 = vmatprep.subr.bf16.mxu0 %v5377_v41 }
 0x487   : > { %5380 = vmatpush3.bf16.msra.mxu0 %v5377_v41  ;;  %v5441_v41 = vpack.c.bf16 %v1966_v62, %v1965_v60  ;;  %v2078_v60 = vld [vmem:[#allocation5 + $0x268] sm:$0xff] }
 0x488   : > { %5428 = vmatpush3.bf16.msra.mxu1 %v6535_v47  ;;  %v5381_v47 = vpack.c.bf16 %v1703_v12, %v1702_v11  ;;  %v1967_v11 = vld [vmem:[#allocation2 + $0x240] sm:$0xff]  ;;  %v1968_v12 = vld [vmem:[#allocation2 + $0x248] sm:$0xff] }
 0x48a   : > { %5382 = vmatprep.subr.bf16.mxu0 %v5381_v47 }
 0x48b   : > { %5384 = vmatpush3.bf16.msra.mxu0 %v5381_v47  ;;  %v5445_v47 = vpack.c.bf16 %v1968_v12, %v1967_v11  ;;  %v2080_v11 = vld [vmem:[#allocation5 + $0x278] sm:$0xff] }
 0x48c   : > { %5386 = vmatprep.subr.bf16.mxu0 %v5385_v9 }
 0x48f   : > { %5388 = vmatpush3.bf16.msra.mxu0 %v5385_v9  ;;  %v5449_v9 = vpack.c.bf16 %v1970_v14, %v1969_v13  ;;  %v2312_v13 = vld [vmem:[#allocation2 + $0x288] sm:$0xff] }
 0x490   : > { %5390 = vmatprep.subr.bf16.mxu0 %v5389_v19 }
 0x493   : > { %5392 = vmatpush3.bf16.msra.mxu0 %v5389_v19  ;;  %v5453_v19 = vpack.c.bf16 %v1972_v17, %v1971_v26 }
 0x494   : > { %5394 = vmatprep.subr.bf16.mxu0 %v5393_v52 }
 0x497   : > { %5396 = vmatpush3.bf16.msra.mxu0 %v5393_v52  ;;  %v5457_v52 = vpack.c.bf16 %v1974_v23, %v1973_v21 }
 0x498   : > { %5430 = vmatprep.subr.bf16.mxu0 %v5429_v0 }
 0x51e   : > { %v4369_v30 = vpop.f32.mrb[16].mxu1 }
 0x51f   : > { %v1440_v31 = vadd.f32 %v4369_v30, %v6658_v10  ;;  %v1434_v32 = vpop.f32.mrb[17].mxu1 }
 0x520   : > { %v1435_v33 = vadd.f32 %v6658_v10, %v1434_v32 }
 0x521   : > { %v1454_v24 = vmul.f32 %v6639_v54, %v1440_v31 }
 0x522   : > { %v1453_v34 = vmul.f32 %v6635_v6, %v1435_v33  ;;  %v4372_v36 = vpop.f32.mrb[18].mxu1 }
 0x523   : > { %v1474_v56 = vmul.f32 %v6647_v61, %v1454_v24  ;;  %v1450_v37 = vadd.f32 %v4372_v36, %v6658_v10  ;;  %v1444_v38 = vpop.f32.mrb[19].mxu1 }
 0x524   : > { %v1473_v1 = vmul.f32 %v6649_v4, %v1453_v34  ;;  %v1445_v55 = vadd.f32 %v6658_v10, %v1444_v38 }
 0x525   : > { %v6722_v2 = vadd.f32 %v1474_v56, %v6682_v40  ;;  %v1456_v42 = vmul.f32 %v6679_v39, %v1450_v37 }
 0x526   : > { %v6726_v44 = vadd.f32 %v1473_v1, %v6689_v43  ;;  %v1455_v45 = vmul.f32 %v6686_v59, %v1445_v55 }
 0x527   : > { %v1476_v61 = vmul.f32 %v6665_v15, %v1456_v42 }
 0x528   : > { %v1475_v48 = vmul.f32 %v1467_v46, %v1455_v45  ;;  %v1813_v46 = vpop.permute.xlu0 %1812 }
 0x529   : > { %v6731_v49 = vadd.f32 %v1476_v61, %v6692_v51  ;;  %v1964_v51 = vld [vmem:[#allocation2 + $0x228] sm:$0xff] }
 0x52a   : > { %v6734_v4 = vadd.f32 %v1475_v48, %v6694_v20  ;;  %v5437_v35 = vpack.c.bf16 %v1964_v51, %v1963_v57  ;;  %v2074_v57 = vld [vmem:[#allocation5 + $0x248] sm:$0xff]  ;;  %v2075_v51 = vld [vmem:[#allocation5 + $0x250] sm:$0xff] }
 0x53e   : > { %v4445_v3 = vpop.f32.mrb[20].mxu1 }
 0x53f   : > { %v1670_v40 = vpop.f32.mrb[21].mxu1 }
 0x540   : > { %5993 = vtanh.f32 %v1670_v40  ;;  %v2068_v40 = vld [vmem:[#allocation5 + $0x218] sm:$0xff] }
 0x541   : > { %5995 = vtanh.f32 %v4445_v3  ;;  %v2067_v3 = vld [vmem:[#allocation5 + $0x210] sm:$0xff] }
 0x542   : > { %v4448_v8 = vpop.f32.mrb[22].mxu1 }
 0x543   : > { %5997 = vtanh.f32 %v4448_v8  ;;  %v1680_v43 = vpop.f32.mrb[23].mxu1  ;;  %v1809_v8 = vpop.permute.xlu1 %1808 }
 0x544   : > { %5999 = vtanh.f32 %v1680_v43 }
 0x54a   : > { %v5994_v50 = vpop.eup %5993 }
 0x54b   : > { %v5996_v15 = vpop.eup %5995  ;;  %4481 = vmatprep.mubr.f32.mxu0 %v5994_v50  ;;  %v2070_v50 = vld [vmem:[#allocation5 + $0x228] sm:$0xff] }
 0x54c   : > { %4482 = vmatmul.mubr.f32.vlgmr.msra.gmra.mrb[24].mxu0 %v5996_v15  ;;  %v2073_v15 = vld [vmem:[#allocation5 + $0x240] sm:$0xff] }
 0x54d   : > { %v5998_v29 = vpop.eup %5997  ;;  %5432 = vmatpush3.bf16.msra.mxu0 %v5429_v0  ;;  %v5461_v0 = vpack.c.bf16 %v2066_v53, %v2065_v63 }
 0x54e   : > { %v6000_v20 = vpop.eup %5999  ;;  %5434 = vmatprep.subr.bf16.mxu0 %v5433_v27 }
 0x54f   : > { %4484 = vmatprep.mubr.f32.mxu0 %v6000_v20  ;;  %5462 = vmatprep.subr.bf16.mxu1 %v5461_v0 }
 0x550   : > { %4485 = vmatmul.mubr.f32.gmra.mrb[26].mxu0 %v5998_v29  ;;  %v2076_v29 = vld [vmem:[#allocation5 + $0x258] sm:$0xff] }
 0x551   : > { %5436 = vmatpush3.bf16.msra.mxu0 %v5433_v27  ;;  %v2072_v27 = vld [vmem:[#allocation5 + $0x238] sm:$0xff]  ;;  %v5481_v20 = vpack.c.bf16 %v2076_v29, %v2075_v51  ;;  %v2176_v51 = vld [vmem:[#allocation7 + $0x228] sm:$0xff] }
 0x552   : > { %5438 = vmatprep.subr.bf16.mxu0 %v5437_v35 }
 0x555   : > { %5440 = vmatpush3.bf16.msra.mxu0 %v5437_v35  ;;  %v2077_v35 = vld [vmem:[#allocation5 + $0x260] sm:$0xff] }
 0x556   : > { %5442 = vmatprep.subr.bf16.mxu0 %v5441_v41  ;;  %v5485_v62 = vpack.c.bf16 %v2078_v60, %v2077_v35  ;;  %v2178_v35 = vld [vmem:[#allocation7 + $0x238] sm:$0xff] }
 0x559   : > { %5444 = vmatpush3.bf16.msra.mxu0 %v5441_v41  ;;  %v2079_v41 = vld [vmem:[#allocation5 + $0x270] sm:$0xff] }
 0x55a   : > { %5446 = vmatprep.subr.bf16.mxu0 %v5445_v47  ;;  %v5489_v12 = vpack.c.bf16 %v2080_v11, %v2079_v41  ;;  %v2180_v41 = vld [vmem:[#allocation7 + $0x248] sm:$0xff] }
 0x55d   : > { %5448 = vmatpush3.bf16.msra.mxu0 %v5445_v47  ;;  %v2311_v47 = vld [vmem:[#allocation2 + $0x280] sm:$0xff] }
 0x55e   : > { %5450 = vmatprep.subr.bf16.mxu0 %v5449_v9  ;;  %v5525_v14 = vpack.c.bf16 %v2312_v13, %v2311_v47  ;;  %v2182_v47 = vld [vmem:[#allocation7 + $0x258] sm:$0xff] }
 0x561   : > { %5452 = vmatpush3.bf16.msra.mxu0 %v5449_v9 }
 0x562   : > { %5454 = vmatprep.subr.bf16.mxu0 %v5453_v19 }
 0x565   : > { %5456 = vmatpush3.bf16.msra.mxu0 %v5453_v19 }
 0x566   : > { %5458 = vmatprep.subr.bf16.mxu0 %v5457_v52 }
 0x569   : > { %5460 = vmatpush3.bf16.msra.mxu0 %v5457_v52 }
 0x61f   : > { %v4483_v30 = vpop.f32.mrb[24].mxu0 }
 0x620   : > { %v1782_v31 = vadd.f32 %v4483_v30, %v6658_v10  ;;  %v1776_v32 = vpop.f32.mrb[25].mxu0 }
 0x621   : > { %v1777_v33 = vadd.f32 %v6658_v10, %v1776_v32  ;;  %v2313_v32 = vld [vmem:[#allocation2 + $0x290] sm:$0xff] }
 0x622   : > { %v1796_v24 = vmul.f32 %v6639_v54, %v1782_v31 }
 0x623   : > { %v1795_v34 = vmul.f32 %v6635_v6, %v1777_v33  ;;  %v4486_v36 = vpop.f32.mrb[26].mxu0  ;;  %v2314_v33 = vld [vmem:[#allocation2 + $0x298] sm:$0xff] }
 0x624   : > { %v1816_v56 = vmul.f32 %v6653_v7, %v1796_v24  ;;  %v1792_v37 = vadd.f32 %v4486_v36, %v6658_v10  ;;  %v1786_v38 = vpop.f32.mrb[27].mxu0 }
 0x625   : > { %v1815_v1 = vmul.f32 %v6651_v5, %v1795_v34  ;;  %v1787_v55 = vadd.f32 %v6658_v10, %v1786_v38  ;;  %v5529_v34 = vpack.c.bf16 %v2314_v33, %v2313_v32 }
 0x626   : > { %v1820_v42 = vadd.f32 %v1816_v56, %v6722_v2  ;;  %v1798_v45 = vmul.f32 %v6679_v39, %v1792_v37  ;;  %v5465_v2 = vpack.c.bf16 %v2068_v40, %v2067_v3  ;;  %v2315_v56 = vld [vmem:[#allocation2 + $0x2a0] sm:$0xff]  ;;  %v2316_v37 = vld [vmem:[#allocation2 + $0x2a8] sm:$0xff]  ;;  %v2321_v40 = vld [vmem:[#allocation2 + $0x2d0] sm:$0xff] }
 0x627   : > { %v1819_v61 = vadd.f32 %v1815_v1, %v6726_v44  ;;  %v1797_v48 = vmul.f32 %v6686_v59, %v1787_v55  ;;  %v2069_v44 = vld [vmem:[#allocation5 + $0x220] sm:$0xff]  ;;  %v5533_v1 = vpack.c.bf16 %v2316_v37, %v2315_v56 }
 0x628   : > { %v1818_v7 = vmul.f32 %v1813_v46, %v1798_v45  ;;  %v6752_v5 = vadd.f32 %v6639_v54, %v1820_v42  ;;  %v2317_v42 = vld [vmem:[#allocation2 + $0x2b0] sm:$0xff]  ;;  %v2318_v45 = vld [vmem:[#allocation2 + $0x2b8] sm:$0xff] }
 0x629   : > { %v6749_v43 = vadd.f32 %v6635_v6, %v1819_v61  ;;  %v1817_v16 = vmul.f32 %v1809_v8, %v1797_v48  ;;  %v5537_v46 = vpack.c.bf16 %v2318_v45, %v2317_v42  ;;  %v2319_v61 = vld [vmem:[#allocation2 + $0x2c0] sm:$0xff]  ;;  %v2320_v48 = vld [vmem:[#allocation2 + $0x2c8] sm:$0xff]  ;;  %v2322_v8 = vld [vmem:[#allocation2 + $0x2d8] sm:$0xff] }
 0x62a   : > { %v1822_v10 = vadd.f32 %v1818_v7, %v6731_v49  ;;  %v5469_v49 = vpack.c.bf16 %v2070_v50, %v2069_v44  ;;  %v5541_v3 = vpack.c.bf16 %v2320_v48, %v2319_v61  ;;  %v5545_v7 = vpack.c.bf16 %v2322_v8, %v2321_v40  ;;  %v2326_v44 = vld [vmem:[#allocation2 + $0x2f8] sm:$0xff] }
 0x62b   : > { %v1821_v22 = vadd.f32 %v1817_v16, %v6734_v4  ;;  %4519 = vmatprep.mubr.f32.mxu1 %v6749_v43  ;;  %4557 = vmatprep.mubr.f32.mxu0 %v6749_v43  ;;  %v2071_v4 = vld [vmem:[#allocation5 + $0x230] sm:$0xff]  ;;  %v2323_v16 = vld [vmem:[#allocation2 + $0x2e0] sm:$0xff] }
 0x62c   : > { %4520 = vmatmul.mubr.f32.vlgmr.msra.gmra.mrb[24].mxu1 %v6752_v5  ;;  %4558 = vmatmul.mubr.f32.vlgmr.msra.gmra.mrb[28].mxu0 %v6752_v5  ;;  %v6764_v54 = vadd.f32 %v6679_v39, %v1822_v10  ;;  %v5477_v39 = vpack.c.bf16 %v2074_v57, %v2073_v15  ;;  %v2324_v10 = vld [vmem:[#allocation2 + $0x2e8] sm:$0xff]  ;;  %v2174_v15 = vld [vmem:[#allocation7 + $0x218] sm:$0xff] }
 0x62d   : > { %v6761_v6 = vadd.f32 %v6686_v59, %v1821_v22  ;;  %5464 = vmatpush3.bf16.msra.mxu1 %v5461_v0  ;;  %v5473_v59 = vpack.c.bf16 %v2072_v27, %v2071_v4  ;;  %v2325_v22 = vld [vmem:[#allocation2 + $0x2f0] sm:$0xff]  ;;  %v2172_v4 = vld [vmem:[#allocation7 + $0x208] sm:$0xff] }
 0x62e   : > { %5466 = vmatprep.subr.bf16.mxu1 %v5465_v2  ;;  %v5553_v50 = vpack.c.bf16 %v2326_v44, %v2325_v22  ;;  %v2173_v27 = vld [vmem:[#allocation7 + $0x210] sm:$0xff] }
 0x62f   : > { %4522 = vmatprep.mubr.f32.mxu1 %v6761_v6  ;;  %4560 = vmatprep.mubr.f32.mxu0 %v6761_v6  ;;  %v5497_v57 = vpack.c.bf16 %v2174_v15, %v2173_v27 }
 0x630   : > { %4523 = vmatmul.mubr.f32.gmra.mrb[26].mxu1 %v6764_v54  ;;  %4561 = vmatmul.mubr.f32.gmra.mrb[30].mxu0 %v6764_v54 }
 0x631   : > { %5468 = vmatpush3.bf16.msra.mxu1 %v5465_v2  ;;  %v5549_v2 = vpack.c.bf16 %v2324_v10, %v2323_v16  ;;  %v2419_v10 = vld [vmem:[#allocation5 + $0x290] sm:$0xff] }
 0x632   : > { %5470 = vmatprep.subr.bf16.mxu1 %v5469_v49 }
 0x635   : > { %5472 = vmatpush3.bf16.msra.mxu1 %v5469_v49  ;;  %v2171_v49 = vld [vmem:[#allocation7 + $0x200] sm:$0xff] }
 0x636   : > { %5474 = vmatprep.subr.bf16.mxu1 %v5473_v59 }
 0x639   : > { %5476 = vmatpush3.bf16.msra.mxu1 %v5473_v59  ;;  %v5493_v59 = vpack.c.bf16 %v2172_v4, %v2171_v49  ;;  %v2421_v49 = vld [vmem:[#allocation5 + $0x2a0] sm:$0xff]  ;;  %v2422_v4 = vld [vmem:[#allocation5 + $0x2a8] sm:$0xff] }
 0x63a   : > { %5478 = vmatprep.subr.bf16.mxu1 %v5477_v39 }
 0x63b   : > { %5494 = vmatprep.subr.bf16.mxu0 %v5493_v59 }
 0x63c   : > { %5496 = vmatpush3.bf16.msra.mxu0 %v5493_v59  ;;  %v5565_v59 = vpack.c.bf16 %v2422_v4, %v2421_v49 }
 0x63d   : > { %5480 = vmatpush3.bf16.msra.mxu1 %v5477_v39  ;;  %v2175_v39 = vld [vmem:[#allocation7 + $0x220] sm:$0xff]  ;;  %5498 = vmatprep.subr.bf16.mxu0 %v5497_v57 }
 0x63e   : > { %5482 = vmatprep.subr.bf16.mxu1 %v5481_v20  ;;  %v5501_v29 = vpack.c.bf16 %v2176_v51, %v2175_v39  ;;  %v2424_v39 = vld [vmem:[#allocation5 + $0x2b8] sm:$0xff] }
 0x640   : > { %5500 = vmatpush3.bf16.msra.mxu0 %v5497_v57  ;;  %v2423_v57 = vld [vmem:[#allocation5 + $0x2b0] sm:$0xff] }
 0x641   : > { %5484 = vmatpush3.bf16.msra.mxu1 %v5481_v20  ;;  %v2177_v20 = vld [vmem:[#allocation7 + $0x230] sm:$0xff]  ;;  %5502 = vmatprep.subr.bf16.mxu0 %v5501_v29  ;;  %v5569_v51 = vpack.c.bf16 %v2424_v39, %v2423_v57 }
 0x642   : > { %5486 = vmatprep.subr.bf16.mxu1 %v5485_v62  ;;  %v5505_v60 = vpack.c.bf16 %v2178_v35, %v2177_v20  ;;  %v2426_v20 = vld [vmem:[#allocation5 + $0x2c8] sm:$0xff] }
 0x644   : > { %5504 = vmatpush3.bf16.msra.mxu0 %v5501_v29  ;;  %v2425_v29 = vld [vmem:[#allocation5 + $0x2c0] sm:$0xff] }
 0x645   : > { %5488 = vmatpush3.bf16.msra.mxu1 %v5485_v62  ;;  %v2179_v62 = vld [vmem:[#allocation7 + $0x240] sm:$0xff]  ;;  %5506 = vmatprep.subr.bf16.mxu0 %v5505_v60  ;;  %v5573_v35 = vpack.c.bf16 %v2426_v20, %v2425_v29  ;;  %v2524_v20 = vld [vmem:[#allocation7 + $0x288] sm:$0xff] }
 0x646   : > { %5490 = vmatprep.subr.bf16.mxu1 %v5489_v12  ;;  %v5509_v11 = vpack.c.bf16 %v2180_v41, %v2179_v62  ;;  %v2428_v62 = vld [vmem:[#allocation5 + $0x2d8] sm:$0xff] }
 0x648   : > { %5508 = vmatpush3.bf16.msra.mxu0 %v5505_v60  ;;  %v2427_v60 = vld [vmem:[#allocation5 + $0x2d0] sm:$0xff] }
 0x649   : > { %5492 = vmatpush3.bf16.msra.mxu1 %v5489_v12  ;;  %5510 = vmatprep.subr.bf16.mxu0 %v5509_v11  ;;  %v2181_v12 = vld [vmem:[#allocation7 + $0x250] sm:$0xff]  ;;  %v5577_v41 = vpack.c.bf16 %v2428_v62, %v2427_v60 }
 0x64a   : > { %5526 = vmatprep.subr.bf16.mxu1 %v5525_v14  ;;  %v5513_v13 = vpack.c.bf16 %v2182_v47, %v2181_v12  ;;  %v2430_v12 = vld [vmem:[#allocation5 + $0x2e8] sm:$0xff]  ;;  %v2525_v60 = vld [vmem:[#allocation7 + $0x290] sm:$0xff] }
 0x64c   : > { %5512 = vmatpush3.bf16.msra.mxu0 %v5509_v11  ;;  %v2429_v11 = vld [vmem:[#allocation5 + $0x2e0] sm:$0xff] }
 0x64d   : > { %5514 = vmatprep.subr.bf16.mxu0 %v5513_v13 }
 0x650   : > { %5516 = vmatpush3.bf16.msra.mxu0 %v5513_v13  ;;  %v5581_v13 = vpack.c.bf16 %v2430_v12, %v2429_v11  ;;  %v2528_v11 = vld [vmem:[#allocation7 + $0x2a8] sm:$0xff] }
 0x6ff   : > { %v6770_v9 = vpop.f32.mrb[24].mxu1  ;;  %v4559_v26 = vpop.f32.mrb[28].mxu0 }
 0x700   : > { %v6772_v17 = vpop.f32.mrb[25].mxu1  ;;  %v2041_v19 = vpop.f32.mrb[29].mxu0  ;;  %v1915_v21 = vsel %vm402_vm0, %v6770_v9, -inf }
 0x701   : > { %6001 = vtanh.f32 %v2041_v19  ;;  %1916 = vmax.xlane.f32.xlu0 %v1915_v21  ;;  %v1912_v23 = vsel %vm402_vm0, %v6772_v17, -inf  ;;  %v2185_v21 = vld [vmem:[#allocation7 + $0x270] sm:$0xff] }
 0x702   : > { %6003 = vtanh.f32 %v4559_v26  ;;  %1913 = vmax.xlane.f32.xlu1 %v1912_v23  ;;  %v2184_v26 = vld [vmem:[#allocation7 + $0x268] sm:$0xff]  ;;  %v2186_v23 = vld [vmem:[#allocation7 + $0x278] sm:$0xff] }
 0x703   : > { %v6778_v52 = vpop.f32.mrb[26].mxu1  ;;  %v4562_v63 = vpop.f32.mrb[30].mxu0 }
 0x704   : > { %v6780_v53 = vpop.f32.mrb[27].mxu1  ;;  %v2051_v0 = vpop.f32.mrb[31].mxu0  ;;  %v1921_v30 = vsel %vm402_vm0, %v6778_v52, -inf }
 0x705   : > { %6005 = vtanh.f32 %v2051_v0  ;;  %1922 = vmax.xlane.f32.xlu0 %v1921_v30  ;;  %v1918_v31 = vsel %vm402_vm0, %v6780_v53, -inf  ;;  %v2417_v0 = vld [vmem:[#allocation5 + $0x280] sm:$0xff]  ;;  %v2418_v30 = vld [vmem:[#allocation5 + $0x288] sm:$0xff] }
 0x706   : > { %6007 = vtanh.f32 %v4562_v63  ;;  %1919 = vmax.xlane.f32.xlu1 %v1918_v31  ;;  %v5521_v63 = vpack.c.bf16 %v2186_v23, %v2185_v21  ;;  %v5557_v31 = vpack.c.bf16 %v2418_v30, %v2417_v0  ;;  %v2653_v0 = vld [vmem:[#allocation2 + $0x300] sm:$0xff]  ;;  %v2654_v30 = vld [vmem:[#allocation2 + $0x308] sm:$0xff] }
 0x70b   : > { %v6002_v24 = vpop.eup %6001 }
 0x70c   : > { %v6004_v36 = vpop.eup %6003  ;;  %4595 = vmatprep.mubr.f32.mxu1 %v6002_v24 }
 0x70d   : > { %4596 = vmatmul.mubr.f32.vlgmr.msra.gmra.mrb[28].mxu1 %v6004_v36 }
 0x70e   : > { %5528 = vmatpush3.bf16.msra.mxu1 %v5525_v14  ;;  %v2183_v14 = vld [vmem:[#allocation7 + $0x260] sm:$0xff] }
 0x70f   : > { %v6006_v38 = vpop.eup %6005  ;;  %5530 = vmatprep.subr.bf16.mxu1 %v5529_v34  ;;  %v5517_v19 = vpack.c.bf16 %v2184_v26, %v2183_v14  ;;  %v2431_v26 = vld [vmem:[#allocation5 + $0x2f0] sm:$0xff] }
 0x710   : > { %v6008_v55 = vpop.eup %6007  ;;  %4598 = vmatprep.mubr.f32.mxu1 %v6006_v38 }
 0x711   : > { %4599 = vmatmul.mubr.f32.gmra.mrb[30].mxu1 %v6008_v55  ;;  %5518 = vmatprep.subr.bf16.mxu0 %v5517_v19 }
 0x712   : > { %5532 = vmatpush3.bf16.msra.mxu1 %v5529_v34  ;;  %4671 = vmatprep.mubr.f32.mxu1 %v6749_v43 }
 0x713   : > { %5534 = vmatprep.subr.bf16.mxu1 %v5533_v1  ;;  %5520 = vmatpush3.bf16.msra.mxu0 %v5517_v19  ;;  %v2432_v19 = vld [vmem:[#allocation5 + $0x2f8] sm:$0xff] }
 0x714   : > { %5522 = vmatprep.subr.bf16.mxu0 %v5521_v63  ;;  %v5585_v23 = vpack.c.bf16 %v2432_v19, %v2431_v26  ;;  %v2530_v26 = vld [vmem:[#allocation7 + $0x2b8] sm:$0xff] }
 0x716   : > { %5536 = vmatpush3.bf16.msra.mxu1 %v5533_v1 }
 0x717   : > { %5538 = vmatprep.subr.bf16.mxu1 %v5537_v46  ;;  %5524 = vmatpush3.bf16.msra.mxu0 %v5521_v63 }
 0x718   : > { %5558 = vmatprep.subr.bf16.mxu0 %v5557_v31 }
 0x71a   : > { %5540 = vmatpush3.bf16.msra.mxu1 %v5537_v46 }
 0x71b   : > { %5542 = vmatprep.subr.bf16.mxu1 %v5541_v3 }
 0x71e   : > { %5544 = vmatpush3.bf16.msra.mxu1 %v5541_v3 }
 0x71f   : > { %5546 = vmatprep.subr.bf16.mxu1 %v5545_v7 }
 0x722   : > { %5548 = vmatpush3.bf16.msra.mxu1 %v5545_v7 }
 0x723   : > { %5550 = vmatprep.subr.bf16.mxu1 %v5549_v2 }
 0x726   : > { %5552 = vmatpush3.bf16.msra.mxu1 %v5549_v2  ;;  %v2420_v2 = vld [vmem:[#allocation5 + $0x298] sm:$0xff] }
 0x727   : > { %5554 = vmatprep.subr.bf16.mxu1 %v5553_v50  ;;  %v5561_v44 = vpack.c.bf16 %v2420_v2, %v2419_v10  ;;  %v2666_v10 = vld [vmem:[#allocation2 + $0x368] sm:$0xff] }
 0x72a   : > { %5556 = vmatpush3.bf16.msra.mxu1 %v5553_v50 }
 0x72d   : > { %4672 = vmatmul.mubr.f32.vlgmr.msra.gmra.mrb[32].mxu1 %v6752_v5 }
 0x72e   : > { %4674 = vmatprep.mubr.f32.mxu1 %v6761_v6 }
 0x731   : > { %4675 = vmatmul.mubr.f32.gmra.mrb[34].mxu1 %v6764_v54 }
 0x78e   : > { %v1917_v32 = vpop.xlane.xlu0 %1916 }
 0x78f   : > { %v1925_v33 = vsub.f32 %v6770_v9, %v1917_v32  ;;  %v1914_v24 = vpop.xlane.xlu1 %1913  ;;  %v2655_v32 = vld [vmem:[#allocation2 + $0x310] sm:$0xff] }
 0x790   : > { %v1924_v34 = vsub.f32 %v6772_v17, %v1914_v24 }
 0x791   : > { %v1930_v36 = vmul.f32 1.442695, %v1925_v33  ;;  %v2656_v33 = vld [vmem:[#allocation2 + $0x318] sm:$0xff] }
 0x792   : > { %v1928_v56 = vmul.f32 1.442695, %v1924_v34  ;;  %v1923_v37 = vpop.xlane.xlu0 %1922  ;;  %v5625_v34 = vpack.c.bf16 %v2656_v33, %v2655_v32  ;;  %v2536_v32 = vld [vmem:[#allocation7 + $0x2e8] sm:$0xff] }
 0x793   : > { %6009 = vpow2.f32 %v1930_v36  ;;  %v1927_v38 = vsub.f32 %v6778_v52, %v1923_v37  ;;  %v1920_v1 = vpop.xlane.xlu1 %1919  ;;  %v2658_v37 = vld [vmem:[#allocation2 + $0x328] sm:$0xff] }
 0x794   : > { %6011 = vpow2.f32 %v1928_v56  ;;  %v1926_v55 = vsub.f32 %v6780_v53, %v1920_v1  ;;  %v2657_v56 = vld [vmem:[#allocation2 + $0x320] sm:$0xff] }
 0x795   : > { %v1934_v42 = vmul.f32 1.442695, %v1927_v38  ;;  %v5629_v1 = vpack.c.bf16 %v2658_v37, %v2657_v56  ;;  %v2760_v56 = vld [vmem:[#allocation5 + $0x308] sm:$0xff] }
 0x796   : > { %v1932_v45 = vmul.f32 1.442695, %v1926_v55 }
 0x797   : > { %6013 = vpow2.f32 %v1934_v42  ;;  %v2659_v42 = vld [vmem:[#allocation2 + $0x330] sm:$0xff] }
 0x798   : > { %6015 = vpow2.f32 %v1932_v45  ;;  %v2660_v45 = vld [vmem:[#allocation2 + $0x338] sm:$0xff] }
 0x79d   : > { %v6794_v46 = vpop.eup %6009 }
 0x79e   : > { %v6796_v9 = vpop.eup %6011  ;;  %v1939_v17 = vsel %vm402_vm0, %v6794_v46, 0.0 }
 0x79f   : > { %1940 = vadd.xlane.f32.xlu0 %v1939_v17  ;;  %v1936_v61 = vsel %vm402_vm0, %v6796_v9, 0.0  ;;  %v5633_v17 = vpack.c.bf16 %v2660_v45, %v2659_v42 }
 0x7a0   : > { %1937 = vadd.xlane.f32.xlu1 %v1936_v61  ;;  %v2661_v61 = vld [vmem:[#allocation2 + $0x340] sm:$0xff] }
 0x7a1   : > { %v6802_v52 = vpop.eup %6013 }
 0x7a2   : > { %v6804_v48 = vpop.eup %6015  ;;  %v1945_v53 = vsel %vm402_vm0, %v6802_v52, 0.0 }
 0x7a3   : > { %1946 = vadd.xlane.f32.xlu0 %v1945_v53  ;;  %v1942_v3 = vsel %vm402_vm0, %v6804_v48, 0.0  ;;  %v2662_v53 = vld [vmem:[#allocation2 + $0x348] sm:$0xff] }
 0x7a4   : > { %1943 = vadd.xlane.f32.xlu1 %v1942_v3  ;;  %v5637_v3 = vpack.c.bf16 %v2662_v53, %v2661_v61  ;;  %v2762_v61 = vld [vmem:[#allocation5 + $0x318] sm:$0xff] }
 0x7e0   : > { %v4597_v40 = vpop.f32.mrb[28].mxu1 }
 0x7e1   : > { %v2147_v8 = vpop.f32.mrb[29].mxu1 }
 0x7e2   : > { %6017 = vtanh.f32 %v2147_v8  ;;  %v2664_v8 = vld [vmem:[#allocation2 + $0x358] sm:$0xff] }
 0x7e3   : > { %6019 = vtanh.f32 %v4597_v40  ;;  %v2663_v40 = vld [vmem:[#allocation2 + $0x350] sm:$0xff] }
 0x7e4   : > { %v4600_v7 = vpop.f32.mrb[30].mxu1 }
 0x7e5   : > { %v2157_v16 = vpop.f32.mrb[31].mxu1 }
 0x7e6   : > { %6021 = vtanh.f32 %v2157_v16  ;;  %v2665_v16 = vld [vmem:[#allocation2 + $0x360] sm:$0xff] }
 0x7e7   : > { %6023 = vtanh.f32 %v4600_v7  ;;  %v5641_v7 = vpack.c.bf16 %v2664_v8, %v2663_v40  ;;  %v5645_v2 = vpack.c.bf16 %v2666_v10, %v2665_v16  ;;  %v2763_v8 = vld [vmem:[#allocation5 + $0x320] sm:$0xff] }
 0x7ec   : > { %v6018_v22 = vpop.eup %6017 }
 0x7ed   : > { %v6020_v50 = vpop.eup %6019  ;;  %4633 = vmatprep.mubr.f32.mxu0 %v6018_v22  ;;  %v2667_v22 = vld [vmem:[#allocation2 + $0x370] sm:$0xff] }
 0x7ee   : > { %4634 = vmatmul.mubr.f32.vlgmr.msra.gmra.mrb[32].mxu0 %v6020_v50 }
 0x7ef   : > { %5560 = vmatpush3.bf16.msra.mxu0 %v5557_v31  ;;  %v5621_v31 = vpack.c.bf16 %v2654_v30, %v2653_v0  ;;  %v2533_v0 = vld [vmem:[#allocation7 + $0x2d0] sm:$0xff]  ;;  %v2534_v30 = vld [vmem:[#allocation7 + $0x2d8] sm:$0xff] }
 0x7f0   : > { %v6022_v27 = vpop.eup %6021  ;;  %5562 = vmatprep.subr.bf16.mxu0 %v5561_v44 }
 0x7f1   : > { %v6024_v15 = vpop.eup %6023  ;;  %4636 = vmatprep.mubr.f32.mxu0 %v6022_v27 }
 0x7f2   : > { %4637 = vmatmul.mubr.f32.gmra.mrb[34].mxu0 %v6024_v15 }
 0x7f3   : > { %5564 = vmatpush3.bf16.msra.mxu0 %v5561_v44  ;;  %v2668_v44 = vld [vmem:[#allocation2 + $0x378] sm:$0xff] }
 0x7f4   : > { %5566 = vmatprep.subr.bf16.mxu0 %v5565_v59  ;;  %v5649_v50 = vpack.c.bf16 %v2668_v44, %v2667_v22  ;;  %v2765_v22 = vld [vmem:[#allocation5 + $0x330] sm:$0xff]  ;;  %v2766_v44 = vld [vmem:[#allocation5 + $0x338] sm:$0xff] }
 0x7f7   : > { %5568 = vmatpush3.bf16.msra.mxu0 %v5565_v59 }
 0x7f8   : > { %5570 = vmatprep.subr.bf16.mxu0 %v5569_v51 }
 0x7fb   : > { %5572 = vmatpush3.bf16.msra.mxu0 %v5569_v51 }
 0x7fc   : > { %5574 = vmatprep.subr.bf16.mxu0 %v5573_v35 }
 0x7ff   : > { %5576 = vmatpush3.bf16.msra.mxu0 %v5573_v35 }
 0x800   : > { %v4673_v47 = vpop.f32.mrb[32].mxu1  ;;  %5578 = vmatprep.subr.bf16.mxu0 %v5577_v41 }
 0x801   : > { %v2393_v14 = vpop.f32.mrb[33].mxu1 }
 0x802   : > { %6025 = vtanh.f32 %v2393_v14  ;;  %v2529_v14 = vld [vmem:[#allocation7 + $0x2b0] sm:$0xff] }
 0x803   : > { %6027 = vtanh.f32 %v4673_v47  ;;  %5580 = vmatpush3.bf16.msra.mxu0 %v5577_v41  ;;  %v2527_v41 = vld [vmem:[#allocation7 + $0x2a0] sm:$0xff]  ;;  %v5601_v19 = vpack.c.bf16 %v2530_v26, %v2529_v14 }
 0x804   : > { %v4676_v21 = vpop.f32.mrb[34].mxu1  ;;  %5582 = vmatprep.subr.bf16.mxu0 %v5581_v13  ;;  %v5597_v47 = vpack.c.bf16 %v2528_v11, %v2527_v41  ;;  %v2995_v41 = vld [vmem:[#allocation2 + $0x380] sm:$0xff]  ;;  %v2996_v11 = vld [vmem:[#allocation2 + $0x388] sm:$0xff] }
 0x805   : > { %v2403_v63 = vpop.f32.mrb[35].mxu1 }
 0x806   : > { %6029 = vtanh.f32 %v2403_v63 }
 0x807   : > { %6031 = vtanh.f32 %v4676_v21  ;;  %5584 = vmatpush3.bf16.msra.mxu0 %v5581_v13  ;;  %v2531_v21 = vld [vmem:[#allocation7 + $0x2c0] sm:$0xff] }
 0x808   : > { %5586 = vmatprep.subr.bf16.mxu0 %v5585_v23 }
 0x80b   : > { %5588 = vmatpush3.bf16.msra.mxu0 %v5585_v23  ;;  %v2532_v23 = vld [vmem:[#allocation7 + $0x2c8] sm:$0xff] }
 0x80c   : > { %v6026_v24 = vpop.eup %6025  ;;  %5622 = vmatprep.subr.bf16.mxu0 %v5621_v31  ;;  %v5605_v63 = vpack.c.bf16 %v2532_v23, %v2531_v21  ;;  %v2999_v21 = vld [vmem:[#allocation2 + $0x3a0] sm:$0xff]  ;;  %v3000_v23 = vld [vmem:[#allocation2 + $0x3a8] sm:$0xff] }
 0x80d   : > { %v6028_v36 = vpop.eup %6027  ;;  %4709 = vmatprep.mubr.f32.mxu0 %v6026_v24  ;;  %v2537_v24 = vld [vmem:[#allocation7 + $0x2f0] sm:$0xff] }
 0x80e   : > { %4710 = vmatmul.mubr.f32.vlgmr.msra.gmra.mrb[36].mxu0 %v6028_v36 }
 0x80f   : > { %5624 = vmatpush3.bf16.msra.mxu0 %v5621_v31  ;;  %v2535_v31 = vld [vmem:[#allocation7 + $0x2e0] sm:$0xff] }
 0x810   : > { %v6030_v38 = vpop.eup %6029  ;;  %5626 = vmatprep.subr.bf16.mxu0 %v5625_v34  ;;  %v5613_v33 = vpack.c.bf16 %v2536_v32, %v2535_v31  ;;  %v3002_v31 = vld [vmem:[#allocation2 + $0x3b8] sm:$0xff] }
 0x811   : > { %v6032_v55 = vpop.eup %6031  ;;  %4712 = vmatprep.mubr.f32.mxu0 %v6030_v38 }
 0x812   : > { %4713 = vmatmul.mubr.f32.gmra.mrb[38].mxu0 %v6032_v55 }
 0x813   : > { %5628 = vmatpush3.bf16.msra.mxu0 %v5625_v34  ;;  %4785 = vmatprep.mubr.f32.mxu0 %v6749_v43  ;;  %v2538_v34 = vld [vmem:[#allocation7 + $0x2f8] sm:$0xff] }
 0x814   : > { %5630 = vmatprep.subr.bf16.mxu0 %v5629_v1  ;;  %v5617_v36 = vpack.c.bf16 %v2538_v34, %v2537_v24  ;;  %v3004_v24 = vld [vmem:[#allocation2 + $0x3c8] sm:$0xff] }
 0x817   : > { %5632 = vmatpush3.bf16.msra.mxu0 %v5629_v1 }
 0x818   : > { %5634 = vmatprep.subr.bf16.mxu0 %v5633_v17 }
 0x81b   : > { %5636 = vmatpush3.bf16.msra.mxu0 %v5633_v17 }
 0x81c   : > { %5638 = vmatprep.subr.bf16.mxu0 %v5637_v3 }
 0x81f   : > { %5640 = vmatpush3.bf16.msra.mxu0 %v5637_v3 }
 0x820   : > { %5642 = vmatprep.subr.bf16.mxu0 %v5641_v7 }
 0x823   : > { %5644 = vmatpush3.bf16.msra.mxu0 %v5641_v7  ;;  %v2764_v7 = vld [vmem:[#allocation5 + $0x328] sm:$0xff] }
 0x824   : > { %5646 = vmatprep.subr.bf16.mxu0 %v5645_v2  ;;  %v5661_v10 = vpack.c.bf16 %v2764_v7, %v2763_v8  ;;  %v2868_v8 = vld [vmem:[#allocation7 + $0x318] sm:$0xff] }
 0x827   : > { %5648 = vmatpush3.bf16.msra.mxu0 %v5645_v2 }
 0x828   : > { %5650 = vmatprep.subr.bf16.mxu0 %v5649_v50 }
 0x82b   : > { %5652 = vmatpush3.bf16.msra.mxu0 %v5649_v50  ;;  %v5665_v50 = vpack.c.bf16 %v2766_v44, %v2765_v22  ;;  %v2871_v22 = vld [vmem:[#allocation7 + $0x330] sm:$0xff]  ;;  %v2872_v44 = vld [vmem:[#allocation7 + $0x338] sm:$0xff] }
 0x82c   : > { %v1941_v49 = vpop.xlane.xlu0 %1940 }
 0x82d   : > { %6033 = vrcp.f32 %v1941_v49  ;;  %v1938_v4 = vpop.xlane.xlu1 %1937  ;;  %v2767_v49 = vld [vmem:[#allocation5 + $0x340] sm:$0xff] }
 0x82e   : > { %4786 = vmatmul.mubr.f32.vlgmr.msra.gmra.mrb[40].mxu0 %v6752_v5 }
 0x82f   : > { %4788 = vmatprep.mubr.f32.mxu0 %v6761_v6 }
 0x831   : > { %v1944_v27 = vpop.xlane.xlu1 %1943 }
 0x832   : > { %4789 = vmatmul.mubr.f32.gmra.mrb[42].mxu0 %v6764_v54  ;;  %6035 = vrcp.f32 %v1944_v27 }
 0x833   : > { %6037 = vrcp.f32 %v1938_v4  ;;  %v2768_v4 = vld [vmem:[#allocation5 + $0x348] sm:$0xff] }
 0x834   : > { %v5669_v27 = vpack.c.bf16 %v2768_v4, %v2767_v49  ;;  %v2873_v49 = vld [vmem:[#allocation7 + $0x340] sm:$0xff]  ;;  %v2874_v4 = vld [vmem:[#allocation7 + $0x348] sm:$0xff] }
 0x837   : > { %v6034_v59 = vpop.eup %6033 }
 0x838   : > { %v1951_v15 = vmul.f32 %v6034_v59, %v6794_v46  ;;  %v1947_v46 = vpop.xlane.xlu0 %1946  ;;  %v2769_v59 = vld [vmem:[#allocation5 + $0x350] sm:$0xff] }
 0x839   : > { %6039 = vrcp.f32 %v1947_v46 }
 0x83a   : > { %2289 = vperm.xlu0 %5906, %v1951_v15   ;;  %2633 = vperm.xlu1 %5907, %v1951_v15  }
 0x83c   : > { %v6036_v57 = vpop.eup %6035 }
 0x83d   : > { %v6816_v39 = vmul.f32 %v6036_v57, %v6804_v48  ;;  %v6038_v51 = vpop.eup %6037  ;;  %v2523_v48 = vld [vmem:[#allocation7 + $0x280] sm:$0xff] }
 0x83e   : > { %5918 = vset.pattern.permute.xlu0 %v6252_v28  ;;  %5908 = vset.pattern.permute.xlu1 %v6252_v28  ;;  %v1949_v29 = vmul.f32 %v6038_v51, %v6796_v9  ;;  %v5589_v35 = vpack.c.bf16 %v2524_v20, %v2523_v48  ;;  %v2526_v9 = vld [vmem:[#allocation7 + $0x298] sm:$0xff]  ;;  %v2772_v51 = vld [vmem:[#allocation5 + $0x368] sm:$0xff]  ;;  %v2773_v20 = vld [vmem:[#allocation5 + $0x370] sm:$0xff] }
 0x83f   : > { %2975 = vperm.xlu1 %5908, %v1951_v15   ;;  %2979 = vperm.xlu0 %5918, %v6816_v39   ;;  %v5593_v62 = vpack.c.bf16 %v2526_v9, %v2525_v60 }
 0x840   : > { %5590 = vmatprep.subr.bf16.mxu1 %v5589_v35 }
 0x841   : > { %5592 = vmatpush3.bf16.msra.mxu1 %v5589_v35  ;;  %v2774_v35 = vld [vmem:[#allocation5 + $0x378] sm:$0xff] }
 0x842   : > { %5594 = vmatprep.subr.bf16.mxu1 %v5593_v62  ;;  %v5681_v9 = vpack.c.bf16 %v2774_v35, %v2773_v20  ;;  %v3101_v35 = vld [vmem:[#allocation5 + $0x380] sm:$0xff] }
 0x843   : > { %5909 = vset.pattern.permute.xlu1 %v6250_v58  ;;  %5919 = vset.pattern.permute.xlu0 %v6253_v18  ;;  %v6040_v12 = vpop.eup %6039 }
 0x844   : > { %2284 = vperm.xlu1 %5909, %v1949_v29   ;;  %3317 = vperm.xlu0 %5919, %v1951_v15   ;;  %v1955_v13 = vmul.f32 %v6040_v12, %v6802_v52  ;;  %v5609_v52 = vpack.c.bf16 %v2534_v30, %v2533_v0  ;;  %v2770_v15 = vld [vmem:[#allocation5 + $0x358] sm:$0xff]  ;;  %v5717_v12 = vpack.c.bf16 %v2996_v11, %v2995_v41 }
 0x845   : > { %5596 = vmatpush3.bf16.msra.mxu1 %v5593_v62  ;;  %v5673_v57 = vpack.c.bf16 %v2770_v15, %v2769_v59  ;;  %v5725_v0 = vpack.c.bf16 %v3000_v23, %v2999_v21  ;;  %v2875_v59 = vld [vmem:[#allocation7 + $0x350] sm:$0xff]  ;;  %v2876_v15 = vld [vmem:[#allocation7 + $0x358] sm:$0xff] }
 0x846   : > { %5598 = vmatprep.subr.bf16.mxu1 %v5597_v47 }
 0x848   : > { %5910 = vset.pattern.permute.xlu1 %v6251_v25 }
 0x849   : > { %2629 = vperm.xlu1 %5910, %v1949_v29   ;;  %5600 = vmatpush3.bf16.msra.mxu1 %v5597_v47  ;;  %v2997_v47 = vld [vmem:[#allocation2 + $0x390] sm:$0xff] }
 0x84a   : > { %5602 = vmatprep.subr.bf16.mxu1 %v5601_v19 }
 0x84d   : > { %5911 = vset.pattern.permute.xlu1 %v6252_v28  ;;  %5604 = vmatpush3.bf16.msra.mxu1 %v5601_v19 }
 0x84e   : > { %2971 = vperm.xlu1 %5911, %v1949_v29   ;;  %5606 = vmatprep.subr.bf16.mxu1 %v5605_v63 }
 0x851   : > { %5608 = vmatpush3.bf16.msra.mxu1 %v5605_v63 }
 0x852   : > { %5912 = vset.pattern.permute.xlu1 %v6253_v18  ;;  %5610 = vmatprep.subr.bf16.mxu1 %v5609_v52 }
 0x853   : > { %3313 = vperm.xlu1 %5912, %v1949_v29  }
 0x855   : > { %5612 = vmatpush3.bf16.msra.mxu1 %v5609_v52  ;;  %v3001_v52 = vld [vmem:[#allocation2 + $0x3b0] sm:$0xff] }
 0x856   : > { %5614 = vmatprep.subr.bf16.mxu1 %v5613_v33  ;;  %v5729_v32 = vpack.c.bf16 %v3002_v31, %v3001_v52 }
 0x857   : > { %5913 = vset.pattern.permute.xlu1 %v6250_v58 }
 0x858   : > { %2299 = vperm.xlu1 %5913, %v1955_v13  }
 0x859   : > { %5616 = vmatpush3.bf16.msra.mxu1 %v5613_v33  ;;  %v3003_v33 = vld [vmem:[#allocation2 + $0x3c0] sm:$0xff] }
 0x85a   : > { %5618 = vmatprep.subr.bf16.mxu1 %v5617_v36  ;;  %v5733_v34 = vpack.c.bf16 %v3004_v24, %v3003_v33  ;;  %v6875_v33 = vld [vmem:[%s6486_s12] sm:$0xff] }
 0x85c   : > { %5914 = vset.pattern.permute.xlu1 %v6251_v25 }
 0x85d   : > { %2641 = vperm.xlu1 %5914, %v1955_v13   ;;  %5620 = vmatpush3.bf16.msra.mxu1 %v5617_v36  ;;  %v3005_v36 = vld [vmem:[#allocation2 + $0x3d0] sm:$0xff] }
 0x861   : > { %5915 = vset.pattern.permute.xlu1 %v6252_v28  ;;  %v2759_v28 = vld [vmem:[#allocation5 + $0x300] sm:$0xff] }
 0x862   : > { %2983 = vperm.xlu1 %5915, %v1955_v13   ;;  %v5653_v37 = vpack.c.bf16 %v2760_v56, %v2759_v28  ;;  %v3006_v28 = vld [vmem:[#allocation2 + $0x3d8] sm:$0xff] }
 0x863   : > { %v5737_v56 = vpack.c.bf16 %v3006_v28, %v3005_v36 }
 0x864   : > { %5654 = vmatprep.subr.bf16.mxu1 %v5653_v37 }
 0x866   : > { %5916 = vset.pattern.permute.xlu1 %v6250_v58 }
 0x867   : > { %2294 = vperm.xlu1 %5916, %v6816_v39  }
 0x86b   : > { %5917 = vset.pattern.permute.xlu1 %v6251_v25 }
 0x86c   : > { %2637 = vperm.xlu1 %5917, %v6816_v39  }
 0x870   : > { %5920 = vset.pattern.permute.xlu1 %v6253_v18  ;;  %v2761_v18 = vld [vmem:[#allocation5 + $0x310] sm:$0xff] }
 0x871   : > { %3321 = vperm.xlu1 %5920, %v6816_v39   ;;  %v5657_v3 = vpack.c.bf16 %v2762_v61, %v2761_v18  ;;  %v2771_v39 = vld [vmem:[#allocation5 + $0x360] sm:$0xff] }
 0x872   : > { %v5677_v46 = vpack.c.bf16 %v2772_v51, %v2771_v39  ;;  %v2865_v61 = vld [vmem:[#allocation7 + $0x300] sm:$0xff]  ;;  %v2878_v51 = vld [vmem:[#allocation7 + $0x368] sm:$0xff] }
 0x873   : > { %v2877_v39 = vld [vmem:[#allocation7 + $0x360] sm:$0xff] }
 0x875   : > { %3325 = vperm.xlu1 %5920, %v1955_v13   ;;  %v2998_v13 = vld [vmem:[#allocation2 + $0x398] sm:$0xff] }
 0x876   : > { %v5721_v26 = vpack.c.bf16 %v2998_v13, %v2997_v47 }
 0x8b9   : > { %v2290_v28 = vpop.permute.xlu0 %2289 }
 0x8c1   : > { %v6837_v58 = vpop.f32.mrb[32].mxu0 }
 0x8c2   : > { %v6839_v38 = vpop.f32.mrb[33].mxu0 }
 0x8c5   : > { %v6841_v1 = vpop.f32.mrb[34].mxu0 }
 0x8c6   : > { %v6843_v55 = vpop.f32.mrb[35].mxu0 }
 0x8e1   : > { %v4711_v25 = vpop.f32.mrb[36].mxu0 }
 0x8e2   : > { %v2499_v42 = vpop.f32.mrb[37].mxu0 }
 0x8e3   : > { %6041 = vtanh.f32 %v2499_v42 }
 0x8e4   : > { %6043 = vtanh.f32 %v4711_v25  ;;  %v3008_v25 = vld [vmem:[#allocation2 + $0x3e8] sm:$0xff] }
 0x8e5   : > { %v4714_v45 = vpop.f32.mrb[38].mxu0 }
 0x8e6   : > { %v2509_v17 = vpop.f32.mrb[39].mxu0 }
 0x8e7   : > { %6045 = vtanh.f32 %v2509_v17  ;;  %v3010_v17 = vld [vmem:[#allocation2 + $0x3f8] sm:$0xff] }
 0x8e8   : > { %6047 = vtanh.f32 %v4714_v45  ;;  %v3009_v45 = vld [vmem:[#allocation2 + $0x3f0] sm:$0xff] }
 0x8e9   : > { %v5745_v18 = vpack.c.bf16 %v3010_v17, %v3009_v45 }
 0x8ed   : > { %v6042_v53 = vpop.eup %6041 }
 0x8ee   : > { %v6044_v40 = vpop.eup %6043  ;;  %4747 = vmatprep.mubr.f32.mxu1 %v6042_v53  ;;  %v2866_v53 = vld [vmem:[#allocation7 + $0x308] sm:$0xff] }
 0x8ef   : > { %4748 = vmatmul.mubr.f32.vlgmr.msra.gmra.mrb[36].mxu1 %v6044_v40  ;;  %v2867_v40 = vld [vmem:[#allocation7 + $0x310] sm:$0xff] }
 0x8f0   : > { %5656 = vmatpush3.bf16.msra.mxu1 %v5653_v37  ;;  %v3007_v37 = vld [vmem:[#allocation2 + $0x3e0] sm:$0xff]  ;;  %v5689_v7 = vpack.c.bf16 %v2868_v8, %v2867_v40 }
 0x8f1   : > { %v6046_v16 = vpop.eup %6045  ;;  %5658 = vmatprep.subr.bf16.mxu1 %v5657_v3  ;;  %v5741_v42 = vpack.c.bf16 %v3008_v25, %v3007_v37 }
 0x8f2   : > { %v6048_v2 = vpop.eup %6047  ;;  %4750 = vmatprep.mubr.f32.mxu1 %v6046_v16  ;;  %v2869_v16 = vld [vmem:[#allocation7 + $0x320] sm:$0xff] }
 0x8f3   : > { %4751 = vmatmul.mubr.f32.gmra.mrb[38].mxu1 %v6048_v2 }
 0x8f4   : > { %5660 = vmatpush3.bf16.msra.mxu1 %v5657_v3  ;;  %v5685_v3 = vpack.c.bf16 %v2866_v53, %v2865_v61 }
 0x8f5   : > { %5662 = vmatprep.subr.bf16.mxu1 %v5661_v10 }
 0x8f6   : > { %5686 = vmatprep.subr.bf16.mxu0 %v5685_v3 }
 0x8f7   : > { %5688 = vmatpush3.bf16.msra.mxu0 %v5685_v3  ;;  %v6888_v3 = vld [vmem:[%s6486_s12 + $0x18] sm:$0xff] }
 0x8f8   : > { %5664 = vmatpush3.bf16.msra.mxu1 %v5661_v10  ;;  %v2870_v10 = vld [vmem:[#allocation7 + $0x328] sm:$0xff]  ;;  %5690 = vmatprep.subr.bf16.mxu0 %v5689_v7 }
 0x8f9   : > { %5666 = vmatprep.subr.bf16.mxu1 %v5665_v50  ;;  %v5693_v2 = vpack.c.bf16 %v2870_v10, %v2869_v16 }
 0x8fb   : > { %5692 = vmatpush3.bf16.msra.mxu0 %v5689_v7  ;;  %v6895_v7 = vld [vmem:[%s6486_s12 + $0x10] sm:$0xff] }
 0x8fc   : > { %5668 = vmatpush3.bf16.msra.mxu1 %v5665_v50  ;;  %5694 = vmatprep.subr.bf16.mxu0 %v5693_v2  ;;  %v5697_v50 = vpack.c.bf16 %v2872_v44, %v2871_v22 }
 0x8fd   : > { %5670 = vmatprep.subr.bf16.mxu1 %v5669_v27 }
 0x8ff   : > { %5696 = vmatpush3.bf16.msra.mxu0 %v5693_v2 }
 0x900   : > { %5672 = vmatpush3.bf16.msra.mxu1 %v5669_v27  ;;  %5698 = vmatprep.subr.bf16.mxu0 %v5697_v50  ;;  %v5701_v27 = vpack.c.bf16 %v2874_v4, %v2873_v49 }
 0x901   : > { %v4787_v29 = vpop.f32.mrb[40].mxu0  ;;  %5674 = vmatprep.subr.bf16.mxu1 %v5673_v57 }
 0x902   : > { %v2735_v48 = vpop.f32.mrb[41].mxu0 }
 0x903   : > { %6049 = vtanh.f32 %v2735_v48  ;;  %5700 = vmatpush3.bf16.msra.mxu0 %v5697_v50  ;;  %v2880_v48 = vld [vmem:[#allocation7 + $0x378] sm:$0xff] }
 0x904   : > { %6051 = vtanh.f32 %v4787_v29  ;;  %5676 = vmatpush3.bf16.msra.mxu1 %v5673_v57  ;;  %5702 = vmatprep.subr.bf16.mxu0 %v5701_v27  ;;  %v5705_v57 = vpack.c.bf16 %v2876_v15, %v2875_v59  ;;  %v5709_v29 = vpack.c.bf16 %v2878_v51, %v2877_v39 }
 0x905   : > { %v4790_v60 = vpop.f32.mrb[42].mxu0  ;;  %5678 = vmatprep.subr.bf16.mxu1 %v5677_v46 }
 0x906   : > { %v2745_v62 = vpop.f32.mrb[43].mxu0 }
 0x907   : > { %6053 = vtanh.f32 %v2745_v62  ;;  %5704 = vmatpush3.bf16.msra.mxu0 %v5701_v27  ;;  %v2634_v62 = vpop.permute.xlu1 %2633 }
 0x908   : > { %6055 = vtanh.f32 %v4790_v60  ;;  %5680 = vmatpush3.bf16.msra.mxu1 %v5677_v46  ;;  %5706 = vmatprep.subr.bf16.mxu0 %v5705_v57  ;;  %v2879_v46 = vld [vmem:[#allocation7 + $0x370] sm:$0xff]  ;;  %v3102_v60 = vld [vmem:[#allocation5 + $0x388] sm:$0xff] }
 0x909   : > { %5682 = vmatprep.subr.bf16.mxu1 %v5681_v9  ;;  %v5713_v20 = vpack.c.bf16 %v2880_v48, %v2879_v46  ;;  %v3104_v46 = vld [vmem:[#allocation5 + $0x398] sm:$0xff] }
 0x90b   : > { %5708 = vmatpush3.bf16.msra.mxu0 %v5705_v57  ;;  %v6852_v41 = vpop.permute.xlu1 %2975 }
 0x90c   : > { %5684 = vmatpush3.bf16.msra.mxu1 %v5681_v9  ;;  %5710 = vmatprep.subr.bf16.mxu0 %v5709_v29  ;;  %v6849_v9 = vpack.c.bf16 %v3102_v60, %v3101_v35  ;;  %v3105_v60 = vld [vmem:[#allocation5 + $0x3a0] sm:$0xff] }
 0x90d   : > { %v6050_v14 = vpop.eup %6049  ;;  %5718 = vmatprep.subr.bf16.mxu1 %v5717_v12 }
 0x90e   : > { %v6052_v19 = vpop.eup %6051  ;;  %4823 = vmatprep.mubr.f32.mxu1 %v6050_v14 }
 0x90f   : > { %4824 = vmatmul.mubr.f32.vlgmr.msra.gmra.mrb[40].mxu1 %v6052_v19  ;;  %5712 = vmatpush3.bf16.msra.mxu0 %v5709_v29  ;;  %v2285_v11 = vpop.permute.xlu1 %2284  ;;  %v6861_v19 = vld [vmem:[%s6993_s5 + $0x1] ss:$0 sm:$0xff]  ;;  %v3103_v29 = vld [vmem:[#allocation5 + $0x390] sm:$0xff] }
 0x910   : > { %5720 = vmatpush3.bf16.msra.mxu1 %v5717_v12  ;;  %5714 = vmatprep.subr.bf16.mxu0 %v5713_v20  ;;  %v2265_v21 = vadd.f32 %v6837_v58, %v6861_v19 }
 0x911   : > { %v6054_v63 = vpop.eup %6053  ;;  %5722 = vmatprep.subr.bf16.mxu1 %v5721_v26 }
 0x912   : > { %v6056_v30 = vpop.eup %6055  ;;  %4826 = vmatprep.mubr.f32.mxu1 %v6054_v63  ;;  %v2260_v63 = vadd.f32 %v6861_v19, %v6839_v38 }
 0x913   : > { %4827 = vmatmul.mubr.f32.gmra.mrb[42].mxu1 %v6056_v30  ;;  %5716 = vmatpush3.bf16.msra.mxu0 %v5713_v20  ;;  %v2630_v12 = vpop.permute.xlu1 %2629  ;;  %v6870_v30 = vld [vmem:[%s6486_s12 + $0x8] sm:$0xff]  ;;  %v5753_v20 = vpack.c.bf16 %v3104_v46, %v3103_v29  ;;  %v3217_v46 = vld [vmem:[#allocation7 + $0x3d0] sm:$0xff]  ;;  %s287_s12 = sand.u32 1, %s6235_s22  }
 0x914   : > { %5724 = vmatpush3.bf16.msra.mxu1 %v5721_v26  ;;  %4899 = vmatprep.mubr.f32.mxu1 %v6749_v43  ;;  %v2279_v52 = vmul.f32 %v6870_v30, %v2265_v21  ;;  %v2278_v24 = vmul.f32 %v6875_v33, %v2260_v63  ;;  %v3108_v21 = vld [vmem:[#allocation5 + $0x3b8] sm:$0xff]  ;;  %s3461_s19 = sshll.u32 %s287_s12, 5  ;;  %s6947_s25 = scalar_lea.sflag [#allocation4], %s287_s12 }
 0x915   : > { %5726 = vmatprep.subr.bf16.mxu1 %v5725_v0  ;;  %5750 = vmatprep.subr.bf16.mxu0 %v6849_v9  ;;  %s289_s26 = scalar_lea.vmem [#allocation8], %s3461_s19 }
 0x916   : > { %v2302_v61 = vmul.f32 %v2285_v11, %v2278_v24  ;;  %v3112_v24 = vld [vmem:[#allocation5 + $0x3d8] sm:$0xff]  ;;  %s3358_s29 = sshll.u32 %s289_s26, 4  ;;  %s6942_s29 = int_to_ptr.vmem [resolvable:$true] %s3358_s29 }
 0x917   : > { %v6854_v47 = vpop.permute.xlu1 %2971  ;;  %s6173_s14 = scalar_lea.vmem %s6942_s29, 512  ;;  %p6180_p13 = scmp.lt.s32.totalorder %s6942_s29, %s6178_s28 }
 0x918   : > { %5728 = vmatpush3.bf16.msra.mxu1 %v5725_v0  ;;  %p6174_p12 = scmp.ne.s32.totalorder %s6942_s29, %s6173_s14  ;;  %p6181_p1 = scmp.lt.s32.totalorder %s6179_s16, %s6173_s14 }
 0x919   : > { %5730 = vmatprep.subr.bf16.mxu1 %v5729_v32 }
 0x91a   : > { %p6175_p8 = pnand %p6174_p12, %p7011_p7  ;;  %p6182_p6 = por %p6181_p1, %p6180_p13 }
 0x91b   : > { %v6856_v13 = vpop.permute.xlu1 %3313 }
 0x91c   : > { %5732 = vmatpush3.bf16.msra.mxu1 %v5729_v32  ;;  %p6176_p11 = pneg %p6175_p8 }
 0x91d   : > { %5734 = vmatprep.subr.bf16.mxu1 %v5733_v34 }
 0x91e   : > { %p6183_p9 = pnand %p6182_p6, %p6176_p11 }
 0x91f   : > { %v2300_v14 = vpop.permute.xlu1 %2299 }
 0x920   : > { %5736 = vmatpush3.bf16.msra.mxu1 %v5733_v34  ;;  %v2275_v34 = vadd.f32 %v6841_v1, %v6861_v19 }
 0x921   : > { %5738 = vmatprep.subr.bf16.mxu1 %v5737_v56 }
 0x922   : > { %v2281_v40 = vmul.f32 %v6888_v3, %v2275_v34  ;;  %v3114_v34 = vld [vmem:[#allocation5 + $0x3e8] sm:$0xff] }
 0x923   : > { %v2642_v26 = vpop.permute.xlu1 %2641 }
 0x924   : > { %5740 = vmatpush3.bf16.msra.mxu1 %v5737_v56  ;;  %v2270_v56 = vadd.f32 %v6861_v19, %v6843_v55  ;;  %v2305_v22 = vmul.f32 %v2300_v14, %v2281_v40  ;;  %v3208_v40 = vld [vmem:[#allocation7 + $0x388] sm:$0xff] }
 0x925   : > { %5742 = vmatprep.subr.bf16.mxu1 %v5741_v42 }
 0x926   : > { %v2280_v16 = vmul.f32 %v6895_v7, %v2270_v56  ;;  %v3115_v56 = vld [vmem:[#allocation5 + $0x3f0] sm:$0xff] }
 0x927   : > { %v6865_v23 = vpop.permute.xlu1 %2983 }
 0x928   : > { %5744 = vmatpush3.bf16.msra.mxu1 %v5741_v42  ;;  %v2303_v42 = vmul.f32 %v2290_v28, %v2279_v52  ;;  %v3110_v52 = vld [vmem:[#allocation5 + $0x3c8] sm:$0xff] }
 0x929   : > { %5746 = vmatprep.subr.bf16.mxu1 %v5745_v18 }
 0x92b   : > { %v2295_v36 = vpop.permute.xlu1 %2294 }
 0x92c   : > { %5748 = vmatpush3.bf16.msra.mxu1 %v5745_v18  ;;  %v2304_v49 = vmul.f32 %v2295_v36, %v2280_v16  ;;  %v3209_v16 = vld [vmem:[#allocation7 + $0x390] sm:$0xff] }
 0x92f   : > { %4900 = vmatmul.mubr.f32.vlgmr.msra.gmra.mrb[44].mxu1 %v6752_v5  ;;  %v2638_v44 = vpop.permute.xlu1 %2637 }
 0x930   : > { %4902 = vmatprep.mubr.f32.mxu1 %v6761_v6 }
 0x933   : > { %4903 = vmatmul.mubr.f32.gmra.mrb[46].mxu1 %v6764_v54 }
 0x9c2   : > { %v4749_v0 = vpop.f32.mrb[36].mxu1 }
 0x9c3   : > { %v2611_v31 = vadd.f32 %v4749_v0, %v6861_v19  ;;  %v2605_v32 = vpop.f32.mrb[37].mxu1  ;;  %v3109_v0 = vld [vmem:[#allocation5 + $0x3c0] sm:$0xff] }
 0x9c4   : > { %v2606_v58 = vadd.f32 %v6861_v19, %v2605_v32  ;;  %v3111_v32 = vld [vmem:[#allocation5 + $0x3d0] sm:$0xff] }
 0x9c5   : > { %v2625_v38 = vmul.f32 %v6870_v30, %v2611_v31  ;;  %v5765_v31 = vpack.c.bf16 %v3110_v52, %v3109_v0 }
 0x9c6   : > { %v2624_v37 = vmul.f32 %v6875_v33, %v2606_v58  ;;  %v4752_v25 = vpop.f32.mrb[38].mxu1  ;;  %v3113_v58 = vld [vmem:[#allocation5 + $0x3e0] sm:$0xff] }
 0x9c7   : > { %v2645_v45 = vmul.f32 %v2634_v62, %v2625_v38  ;;  %v2621_v17 = vadd.f32 %v4752_v25, %v6861_v19  ;;  %v2615_v18 = vpop.f32.mrb[39].mxu1  ;;  %v3106_v62 = vld [vmem:[#allocation5 + $0x3a8] sm:$0xff]  ;;  %v5773_v38 = vpack.c.bf16 %v3114_v34, %v3113_v58 }
 0x9c8   : > { %v2644_v53 = vmul.f32 %v2630_v12, %v2624_v37  ;;  %v2616_v1 = vadd.f32 %v6861_v19, %v2615_v18  ;;  %v5757_v12 = vpack.c.bf16 %v3106_v62, %v3105_v60  ;;  %v3116_v37 = vld [vmem:[#allocation5 + $0x3f8] sm:$0xff]  ;;  %v3220_v60 = vld [vmem:[#allocation7 + $0x3e8] sm:$0xff] }
 0x9c9   : > { %v6891_v8 = vadd.f32 %v2645_v45, %v2303_v42  ;;  %v2627_v55 = vmul.f32 %v6888_v3, %v2621_v17  ;;  %v5777_v42 = vpack.c.bf16 %v3116_v37, %v3115_v56 }
 0x9ca   : > { %v6898_v10 = vadd.f32 %v2644_v53, %v2302_v61  ;;  %v2626_v2 = vmul.f32 %v6895_v7, %v2616_v1  ;;  %v3207_v1 = vld [vmem:[#allocation7 + $0x380] sm:$0xff] }
 0x9cb   : > { %v2647_v50 = vmul.f32 %v2642_v26, %v2627_v55  ;;  %v3107_v26 = vld [vmem:[#allocation5 + $0x3b0] sm:$0xff]  ;;  %v5781_v55 = vpack.c.bf16 %v3208_v40, %v3207_v1 }
 0x9cc   : > { %v2646_v4 = vmul.f32 %v2638_v44, %v2626_v2  ;;  %v5761_v63 = vpack.c.bf16 %v3108_v21, %v3107_v26  ;;  %v3210_v2 = vld [vmem:[#allocation7 + $0x398] sm:$0xff]  ;;  %v3211_v44 = vld [vmem:[#allocation7 + $0x3a0] sm:$0xff] }
 0x9cd   : > { %v6901_v27 = vadd.f32 %v2647_v50, %v2305_v22  ;;  %v5785_v22 = vpack.c.bf16 %v3210_v2, %v3209_v16  ;;  %v3212_v50 = vld [vmem:[#allocation7 + $0x3a8] sm:$0xff]  ;;  %5782 = vmatprep.subr.bf16.mxu1 %v5781_v55 }
 0x9ce   : > { %v6903_v59 = vadd.f32 %v2646_v4, %v2304_v49  ;;  %5784 = vmatpush3.bf16.msra.mxu1 %v5781_v55  ;;  %v5789_v49 = vpack.c.bf16 %v3212_v50, %v3211_v44  ;;  %v3213_v4 = vld [vmem:[#allocation7 + $0x3b0] sm:$0xff]  ;;  %v3322_v55 = vpop.permute.xlu1 %3321 }
 0x9cf   : > { %5786 = vmatprep.subr.bf16.mxu1 %v5785_v22 }
 0x9d2   : > { %5788 = vmatpush3.bf16.msra.mxu1 %v5785_v22 }
 0x9d3   : > { %5790 = vmatprep.subr.bf16.mxu1 %v5789_v49 }
 0x9d6   : > { %5792 = vmatpush3.bf16.msra.mxu1 %v5789_v49 }
 0x9e2   : > { %v4825_v15 = vpop.f32.mrb[40].mxu1 }
 0x9e3   : > { %v2841_v57 = vpop.f32.mrb[41].mxu1 }
 0x9e4   : > { %6057 = vtanh.f32 %v2841_v57 }
 0x9e5   : > { %6059 = vtanh.f32 %v4825_v15  ;;  %v3214_v15 = vld [vmem:[#allocation7 + $0x3b8] sm:$0xff] }
 0x9e6   : > { %v4828_v39 = vpop.f32.mrb[42].mxu1  ;;  %v5793_v57 = vpack.c.bf16 %v3214_v15, %v3213_v4 }
 0x9e7   : > { %v2851_v51 = vpop.f32.mrb[43].mxu1 }
 0x9e8   : > { %6061 = vtanh.f32 %v2851_v51  ;;  %v3216_v51 = vld [vmem:[#allocation7 + $0x3c8] sm:$0xff]  ;;  %5794 = vmatprep.subr.bf16.mxu1 %v5793_v57 }
 0x9e9   : > { %6063 = vtanh.f32 %v4828_v39  ;;  %v3215_v39 = vld [vmem:[#allocation7 + $0x3c0] sm:$0xff]  ;;  %5796 = vmatpush3.bf16.msra.mxu1 %v5793_v57 }
 0x9ea   : > { %v5797_v29 = vpack.c.bf16 %v3216_v51, %v3215_v39 }
 0x9ec   : > { %5798 = vmatprep.subr.bf16.mxu1 %v5797_v29 }
 0x9ed   : > { %5800 = vmatpush3.bf16.msra.mxu1 %v5797_v29 }
 0x9ee   : > { %v6058_v48 = vpop.eup %6057 }
 0x9ef   : > { %v6060_v35 = vpop.eup %6059  ;;  %4861 = vmatprep.mubr.f32.mxu0 %v6058_v48  ;;  %v3218_v48 = vld [vmem:[#allocation7 + $0x3d8] sm:$0xff] }
 0x9f0   : > { %4862 = vmatmul.mubr.f32.vlgmr.msra.gmra.mrb[44].mxu0 %v6060_v35  ;;  %v3219_v35 = vld [vmem:[#allocation7 + $0x3e0] sm:$0xff] }
 0x9f1   : > { %5752 = vmatpush3.bf16.msra.mxu0 %v6849_v9  ;;  %v5769_v9 = vpack.c.bf16 %v3112_v24, %v3111_v32  ;;  %v5805_v62 = vpack.c.bf16 %v3220_v60, %v3219_v35 }
 0x9f2   : > { %v6062_v11 = vpop.eup %6061  ;;  %5754 = vmatprep.subr.bf16.mxu0 %v5753_v20 }
 0x9f3   : > { %v6064_v14 = vpop.eup %6063  ;;  %4864 = vmatprep.mubr.f32.mxu0 %v6062_v11  ;;  %v3221_v11 = vld [vmem:[#allocation7 + $0x3f0] sm:$0xff] }
 0x9f4   : > { %4865 = vmatmul.mubr.f32.gmra.mrb[46].mxu0 %v6064_v14 }
 0x9f5   : > { %5756 = vmatpush3.bf16.msra.mxu0 %v5753_v20  ;;  %v5801_v20 = vpack.c.bf16 %v3218_v48, %v3217_v46  ;;  %v3326_v46 = vpop.permute.xlu1 %3325 }
 0x9f6   : > { %5758 = vmatprep.subr.bf16.mxu0 %v5757_v12 }
 0x9f7   : > { %5802 = vmatprep.subr.bf16.mxu1 %v5801_v20 }
 0x9f8   : > { %5804 = vmatpush3.bf16.msra.mxu1 %v5801_v20 }
 0x9f9   : > { %5760 = vmatpush3.bf16.msra.mxu0 %v5757_v12  ;;  %5806 = vmatprep.subr.bf16.mxu1 %v5805_v62  ;;  %v3222_v12 = vld [vmem:[#allocation7 + $0x3f8] sm:$0xff] }
 0x9fa   : > { %5762 = vmatprep.subr.bf16.mxu0 %v5761_v63  ;;  %v5809_v14 = vpack.c.bf16 %v3222_v12, %v3221_v11 }
 0x9fc   : > { %5808 = vmatpush3.bf16.msra.mxu1 %v5805_v62 }
 0x9fd   : > { %5764 = vmatpush3.bf16.msra.mxu0 %v5761_v63  ;;  %5810 = vmatprep.subr.bf16.mxu1 %v5809_v14 }
 0x9fe   : > { %5766 = vmatprep.subr.bf16.mxu0 %v5765_v31 }
 0xa00   : > { %5812 = vmatpush3.bf16.msra.mxu1 %v5809_v14 }
 0xa01   : > { %5768 = vmatpush3.bf16.msra.mxu0 %v5765_v31 }
 0xa02   : > { %v4901_v36 = vpop.f32.mrb[44].mxu1  ;;  %5770 = vmatprep.subr.bf16.mxu0 %v5769_v9 }
 0xa03   : > { %v3077_v28 = vpop.f32.mrb[45].mxu1 }
 0xa04   : > { %6065 = vtanh.f32 %v3077_v28 }
 0xa05   : > { %6067 = vtanh.f32 %v4901_v36  ;;  %5772 = vmatpush3.bf16.msra.mxu0 %v5769_v9 }
 0xa06   : > { %v4904_v25 = vpop.f32.mrb[46].mxu1  ;;  %5774 = vmatprep.subr.bf16.mxu0 %v5773_v38 }
 0xa07   : > { %v3087_v45 = vpop.f32.mrb[47].mxu1 }
 0xa08   : > { %6069 = vtanh.f32 %v3087_v45 }
 0xa09   : > { %6071 = vtanh.f32 %v4904_v25  ;;  %5776 = vmatpush3.bf16.msra.mxu0 %v5773_v38  ;;  %v2980_v25 = vpop.permute.xlu0 %2979 }
 0xa0a   : > { %5778 = vmatprep.subr.bf16.mxu0 %v5777_v42 }
 0xa0d   : > { %5780 = vmatpush3.bf16.msra.mxu0 %v5777_v42  ;;  %v3318_v22 = vpop.permute.xlu0 %3317 }
 0xa0e   : > { %v6066_v17 = vpop.eup %6065 }
 0xa0f   : > { %v6068_v18 = vpop.eup %6067  ;;  %4937 = vmatprep.mubr.f32.mxu0 %v6066_v17 }
 0xa10   : > { %4938 = vmatmul.mubr.f32.vlgmr.msra.gmra.mrb[48].mxu0 %v6068_v18 }
 0xa12   : > { %v6070_v61 = vpop.eup %6069 }
 0xa13   : > { %v6072_v53 = vpop.eup %6071  ;;  %4940 = vmatprep.mubr.f32.mxu0 %v6070_v61 }
 0xa14   : > { %4941 = vmatmul.mubr.f32.gmra.mrb[50].mxu0 %v6072_v53 }
 0xac3   : > { %v4863_v26 = vpop.f32.mrb[44].mxu0 }
 0xac4   : > { %v2953_v21 = vadd.f32 %v4863_v26, %v6861_v19  ;;  %v2947_v63 = vpop.f32.mrb[45].mxu0 }
 0xac5   : > { %v2948_v0 = vadd.f32 %v6861_v19, %v2947_v63 }
 0xac6   : > { %v2967_v52 = vmul.f32 %v6870_v30, %v2953_v21 }
 0xac7   : > { %v2966_v31 = vmul.f32 %v6875_v33, %v2948_v0  ;;  %v4866_v32 = vpop.f32.mrb[46].mxu0 }
 0xac8   : > { %v2987_v24 = vmul.f32 %v6852_v41, %v2967_v52  ;;  %v2963_v9 = vadd.f32 %v4866_v32, %v6861_v19  ;;  %v2957_v58 = vpop.f32.mrb[47].mxu0 }
 0xac9   : > { %v2986_v34 = vmul.f32 %v6854_v47, %v2966_v31  ;;  %v2958_v36 = vadd.f32 %v6861_v19, %v2957_v58 }
 0xaca   : > { %v2991_v38 = vadd.f32 %v2987_v24, %v6891_v8  ;;  %v2969_v28 = vmul.f32 %v6888_v3, %v2963_v9 }
 0xacb   : > { %v2990_v56 = vadd.f32 %v2986_v34, %v6898_v10  ;;  %v2968_v37 = vmul.f32 %v6895_v7, %v2958_v36 }
 0xacc   : > { %v2989_v42 = vmul.f32 %v6865_v23, %v2969_v28 }
 0xacd   : > { %v2988_v45 = vmul.f32 %v2980_v25, %v2968_v37 }
 0xace   : > { %v2993_v41 = vadd.f32 %v2989_v42, %v6901_v27 }
 0xacf   : > { %v2992_v17 = vadd.f32 %v2988_v45, %v6903_v59 }
 0xae3   : > { %v4939_v18 = vpop.f32.mrb[48].mxu0 }
 0xae4   : > { %v3183_v47 = vpop.f32.mrb[49].mxu0 }
 0xae5   : > { %6073 = vtanh.f32 %v3183_v47 }
 0xae6   : > { %6075 = vtanh.f32 %v4939_v18 }
 0xae7   : > { %v4942_v61 = vpop.f32.mrb[50].mxu0 }
 0xae8   : > { %v3193_v8 = vpop.f32.mrb[51].mxu0 }
 0xae9   : > { %6077 = vtanh.f32 %v3193_v8 }
 0xaea   : > { %6079 = vtanh.f32 %v4942_v61 }
 0xaef   : > { %v6074_v10 = vpop.eup %6073 }
 0xaf0   : > { %v6076_v53 = vpop.eup %6075  ;;  %4975 = vmatprep.mubr.f32.mxu1 %v6074_v10 }
 0xaf1   : > { %4976 = vmatmul.mubr.f32.vlgmr.msra.gmra.mrb[48].mxu1 %v6076_v53 }
 0xaf3   : > { %v6078_v23 = vpop.eup %6077 }
 0xaf4   : > { %v6080_v1 = vpop.eup %6079  ;;  %4978 = vmatprep.mubr.f32.mxu1 %v6078_v23 }
 0xaf5   : > { %4979 = vmatmul.mubr.f32.gmra.mrb[50].mxu1 %v6080_v1 }
 0xbc4   : > { %v4977_v27 = vpop.f32.mrb[48].mxu1 }
 0xbc5   : > { %v3295_v59 = vadd.f32 %v4977_v27, %v6861_v19  ;;  %v3289_v40 = vpop.f32.mrb[49].mxu1 }
 0xbc6   : > { %v3290_v16 = vadd.f32 %v6861_v19, %v3289_v40 }
 0xbc7   : > { %v3309_v2 = vmul.f32 %v6870_v30, %v3295_v59 }
 0xbc8   : > { %v3308_v44 = vmul.f32 %v6875_v33, %v3290_v16  ;;  %v4980_v50 = vpop.f32.mrb[50].mxu1 }
 0xbc9   : > { %v3329_v49 = vmul.f32 %v3318_v22, %v3309_v2  ;;  %v3305_v4 = vadd.f32 %v4980_v50, %v6861_v19  ;;  %v3299_v15 = vpop.f32.mrb[51].mxu1 }
 0xbca   : > { %v3328_v57 = vmul.f32 %v6856_v13, %v3308_v44  ;;  %v3300_v39 = vadd.f32 %v6861_v19, %v3299_v15 }
 0xbcb   : > { %v3333_v51 = vadd.f32 %v3329_v49, %v2991_v38  ;;  %v3311_v29 = vmul.f32 %v6888_v3, %v3305_v4 }
 0xbcc   : > { %v3332_v30 = vadd.f32 %v3328_v57, %v2990_v56  ;;  %v3310_v48 = vmul.f32 %v6895_v7, %v3300_v39 }
 0xbcd   : > { %v3337_v33 = vadd.f32 %v3333_v51, %v6752_v5  ;;  %v3331_v20 = vmul.f32 %v3326_v46, %v3311_v29 }
 0xbce   : > { %v3336_v35 = vadd.f32 %v3332_v30, %v6749_v43  ;;  %v3330_v60 = vmul.f32 %v3322_v55, %v3310_v48 }
 0xbcf   : > { %3341 = vst [vmem:[%s289_s26 + $0x8] sm:$0xff] %v3337_v33  ;;  %v3335_v13 = vadd.f32 %v3331_v20, %v2993_v41 }
 0xbd0   : > { %3340 = vst [vmem:[%s289_s26] sm:$0xff] %v3336_v35  ;;  %v3334_v19 = vadd.f32 %v3330_v60, %v2992_v17 }
 0xbd1   : > { %v3339_v3 = vadd.f32 %v3335_v13, %v6764_v54 }
 0xbd2   : > { %v3338_v43 = vadd.f32 %v3334_v19, %v6761_v6 }
 0xbd3   : > { %3343 = vst [vmem:[%s289_s26 + $0x18] sm:$0xff] %v3339_v3 }
 0xbd4   : > { %3342 = vst [vmem:[%s289_s26 + $0x10] sm:$0xff] %v3338_v43 }
 0xbd5   : > { %6186 = shalt.err (!%p6183_p9)
}
 0xbd6   : > { %s6187_s9 = scalar_lea.hbm %s6940_s11, 512  ;;  %s6191_s30 = scalar_lea.hbm %s6994_s6, 1024 }
 0xbd7   : > { %p6188_p2 = scmp.ne.s32.totalorder %s6940_s11, %s6187_s9  ;;  %p6192_p5 = scmp.lt.u32.totalorder %s6940_s11, %s6994_s6 }
 0xbd8   : > { %p6193_p10 = scmp.lt.u32.totalorder %s6191_s30, %s6187_s9  ;;  %p6195_p12 = scmp.lt.u32.totalorder %s6187_s9, %s6940_s11 }
 0xbd9   : > { %p6189_p0 = pnand %p6188_p2, %p7011_p7 }
 0xbda   : > { %p6194_p4 = por %p6193_p10, %p6192_p5 }
 0xbdb   : > { %p6190_p3 = pneg %p6189_p0 }
 0xbdc   : > { %p6196_p8 = por %p6195_p12, %p6194_p4 }
 0xbde   : > { %p6197_p11 = pnand %p6196_p8, %p6190_p3 }
 0xbe0   : > { %6200 = shalt.err (!%p6197_p11)
}
 0xbe1   : > { %s6255_s19 = smov 128   ;;  %s6256_s20 = smov 8  }
 0xbe2   : > { %5825 = dma.vmem_to_hbm [thread:$0]  (%p7011_p7), %s6942_s29, 512, %s6940_s11, %s6947_s25, %s6255_s19, %s6255_s19, %s6256_s20  }
 0xbe3 PF: > { %p5847_p13 = scmp.ge.s32.totalorder %s6243_s24, 2  ;;  %s3373_s26 = sand.u32 1, %s6231_s21  }
 0xbe4   : > { %p7012_p1 = scmp.ne.s32.totalorder %s7002_s8, 0  ;;  %s3374_s10 = scalar_lea.sflag [#allocation4], %s3373_s26 }
 0xbe6   : > { %p5838_p6 = pnand %p5847_p13, %p7012_p1 }
 0xbe8   : > { %6226 = dma.done.wait (!%p5838_p6), %s3374_s10, 512  }
 0xbe9   : > { %6228 = vsyncadd (!%p5838_p6), %s3374_s10, 4294966784  ;;  %s7013_s13 = sld [smem:[#allocation12_spill]]  ;;  %s7014_s23 = sld [smem:[#allocation13_spill]] }
 0xbea   : > { %p18_p9 = scmp.ge.s32.totalorder %s6317_s27, 4   ;;  %s7015_s21 = smov %s6235_s22 }
 0xbeb   : > { %s7017_s24 = smov %s6317_s27 }
 0xbec   :  { %20 = sbr.rel (!%p18_p9) target bundleno = 5 (0x5), region = 114 }
 0xbef   : > { %s7016_s22 = smov %s7013_s13 }
 0xbf3   :  { %3379 = vsyncpa [#allocation3], 1 }
 0xbf4   :  { %3381 = vsyncpa [#allocation3 + $0x1], 1 }
 0xbf5   :  { %3382 = vsyncpa [#allocation6], 1 }
 0xbf6   :  { %3383 = vsyncpa [#allocation4], 1 }
 0xbf7   :  { %3385 = vsyncpa [#allocation4 + $0x1], 1 }

</bundles_post_ra>
